<compile_context>
chip_gen: v5e
topology: v5e:2x2
jax: 0.10.0
libtpu: 0.0.40
codegen_flags: <defaults>
</compile_context>

<pallas_src>
import functools

import jax
import jax.numpy as jnp
from jax.experimental import pallas as pl
from jax.experimental.pallas import tpu as pltpu

# Logical (PyTorch) dims and lane-padded output dims.
D_IN, D_H1, D_H2, D_OUT = 784, 392, 150, 10
P_H1, P_H2, P_OUT = 512, 256, 128


def ffnn_kernel(x_ref, w1_ref, b1_ref, w2_ref, b2_ref, w3_ref, b3_ref, o_ref):
    # In-kernel cast (f32 -> bf16) so no padded/cast copy of x ever hits HBM.
    x = x_ref[...].astype(w1_ref.dtype)
    # Layer 1: (TB, 784) @ (784, 512) + (1, 512), ReLU   (f32 accumulate)
    h1 = jnp.dot(x, w1_ref[...], preferred_element_type=jnp.float32)
    h1 = jnp.maximum(h1 + b1_ref[...], 0.0)
    # Layer 2: (TB, 512) @ (512, 256) + (1, 256), ReLU
    h2 = jnp.dot(h1.astype(w2_ref.dtype), w2_ref[...],
                 preferred_element_type=jnp.float32)
    h2 = jnp.maximum(h2 + b2_ref[...], 0.0)
    # Layer 3: (TB, 256) @ (256, 128) + (1, 128), ReLU (lane-dense output)
    h3 = jnp.dot(h2.astype(w3_ref.dtype), w3_ref[...],
                 preferred_element_type=jnp.float32)
    o_ref[...] = jnp.maximum(h3 + b3_ref[...], 0.0).astype(o_ref.dtype)


def _pad2d(a, rows, cols, dtype):
    out = jnp.zeros((rows, cols), dtype)
    return out.at[: a.shape[0], : a.shape[1]].set(a.astype(dtype))


def prepare_params(params, compute_dtype=jnp.bfloat16):
    """Pad/cast parameters ONCE (hoisted out of the per-call forward path).

    Weights stored as (in, out); only output dims are lane-padded with zeros,
    so the padding is numerically exact (pad activations stay 0 through ReLU).
    """
    w1, b1, w2, b2, w3, b3 = params
    return (
        _pad2d(w1, D_IN, P_H1, compute_dtype),   # (784, 512): K stays 784
        _pad2d(b1, 1, P_H1, jnp.float32),
        _pad2d(w2, P_H1, P_H2, compute_dtype),   # (512, 256)
        _pad2d(b2, 1, P_H2, jnp.float32),
        _pad2d(w3, P_H2, P_OUT, compute_dtype),  # (256, 128)
        _pad2d(b3, 1, P_OUT, jnp.float32),
    )


def _auto_tile_b(batch, max_tile=512):
    # >= 2 grid steps whenever the batch allows it (keeps both v7x TensorCores
    # busy via the "parallel" axis); tiles sublane-aligned (multiple of 8).
    half = (batch + 1) // 2
    tile = ((half + 7) // 8) * 8
    return max(8, min(tile, max_tile))


def _vmem_limit_bytes(tile_b, x_buffers, out_itemsize):
    x_bytes = x_buffers * tile_b * D_IN * 4                       # f32 x tiles
    w_bytes = 2 * ((D_IN * P_H1 + P_H1 * P_H2 + P_H2 * P_OUT) * 2
                   + (P_H1 + P_H2 + P_OUT) * 4)                   # bf16 w, f32 b
    o_bytes = 2 * tile_b * P_OUT * out_itemsize
    act_bytes = tile_b * (P_H1 + P_H2 + P_OUT) * 4                # f32 temps
    total = x_bytes + w_bytes + o_bytes + act_bytes
    # ~2x headroom for compiler scratch; well under v7x's 64 MiB VMEM.
    return int(min(max(2 * total, 16 * 1024 * 1024), 32 * 1024 * 1024))


def ffnn_forward(x, padded_params, *, tile_b=None, out_dtype=jnp.bfloat16):
    """x: (B, 1, 28, 28) or (B, 784) float32.  Returns (B, 10) float32."""
    w1p, b1p, w2p, b2p, w3p, b3p = padded_params
    x2d = x.reshape(-1, D_IN)            # mimics x.view(-1, 784); stays f32
    B = x2d.shape[0]

    if tile_b is None:
        tile_b = _auto_tile_b(B)
    grid_b = pl.cdiv(B, tile_b)          # ragged final block: writes are masked

    x_spec_kwargs = {}
    x_buffers = 2
    if grid_b >= 3:
        # Extra pipeline depth for the streamed x tiles (hides DMA jitter on v6e).
        x_spec_kwargs["pipeline_mode"] = pl.Buffered(3)
        x_buffers = 3
    x_spec = pl.BlockSpec((tile_b, D_IN), lambda i: (i, 0), **x_spec_kwargs)

    full = lambda shape: pl.BlockSpec(shape, lambda i: (0, 0))  # grid-invariant

    out = pl.pallas_call(
        ffnn_kernel,
        out_shape=jax.ShapeDtypeStruct((B, P_OUT), out_dtype),
        grid_spec=pltpu.PrefetchScalarGridSpec(
            num_scalar_prefetch=0,
            grid=(grid_b,),
            in_specs=[
                x_spec,                                           # x tile
                full((D_IN, P_H1)), full((1, P_H1)),              # layer 1
                full((P_H1, P_H2)), full((1, P_H2)),              # layer 2
                full((P_H2, P_OUT)), full((1, P_OUT)),            # layer 3
            ],
            out_specs=pl.BlockSpec((tile_b, P_OUT), lambda i: (i, 0)),
        ),
        compiler_params=pltpu.CompilerParams(
            dimension_semantics=("parallel",),
            vmem_limit_bytes=_vmem_limit_bytes(
                tile_b, x_buffers, jnp.dtype(out_dtype).itemsize),
        ),
    )(x2d, w1p, b1p, w2p, b2p, w3p, b3p)

    return out[:, :D_OUT].astype(jnp.float32)


def init_params(key):
    """Deterministic init mirroring nn.Linear defaults: U(-1/sqrt(in), 1/sqrt(in)).
    Weights stored as (in_dim, out_dim) (torch weight transposed)."""
    dims = [(D_IN, D_H1), (D_H1, D_H2), (D_H2, D_OUT)]
    params = []
    for i, (din, dout) in enumerate(dims):
        kw, kb = jax.random.split(jax.random.fold_in(key, i))
        bound = 1.0 / jnp.sqrt(jnp.float32(din))
        w = jax.random.uniform(kw, (din, dout), jnp.float32, -bound, bound)
        b = jax.random.uniform(kb, (1, dout), jnp.float32, -bound, bound)
        params += [w, b]
    return tuple(params)


def ffnn_reference(x, params, compute_dtype=jnp.float32):
    """Plain-JAX reference with the same casting chain as the kernel."""
    w1, b1, w2, b2, w3, b3 = params
    mm = functools.partial(jnp.dot, preferred_element_type=jnp.float32)
    h = x.reshape(-1, D_IN).astype(compute_dtype)
    h = jnp.maximum(mm(h, w1.astype(compute_dtype)) + b1, 0.0)
    h = jnp.maximum(mm(h.astype(compute_dtype), w2.astype(compute_dtype)) + b2, 0.0)
    h = jnp.maximum(mm(h.astype(compute_dtype), w3.astype(compute_dtype)) + b3, 0.0)
    return h


if __name__ == "__main__":
    key = jax.random.PRNGKey(0)
    kx, kp = jax.random.split(key)
    # Small MNIST-like batch, deliberately not a tile multiple so the masked
    # ragged final block is exercised; auto tile gives a 2-step grid.
    B = 200
    x = jax.random.normal(kx, (B, 1, 28, 28), jnp.float32)
    params = init_params(kp)
    padded_params = prepare_params(params)   # hoisted: pad/cast params once

    out = ffnn_forward(x, padded_params)
    out = jax.block_until_ready(out)

    ref = ffnn_reference(x, params, compute_dtype=jnp.bfloat16)
    assert out.shape == (B, 10)
    assert jnp.allclose(out, ref, atol=2e-2, rtol=2e-2)
    print("KERNEL_OK")
</pallas_src>

<mosaic_0001>
module attributes {stable_mosaic.version = 11 : i64} {
  func.func @ffnn_kernel(%arg0: i32, %arg1: memref<104x784xf32, #tpu.memory_space<vmem>>, %arg2: memref<784x512xbf16, #tpu.memory_space<vmem>>, %arg3: memref<1x512xf32, #tpu.memory_space<vmem>>, %arg4: memref<512x256xbf16, #tpu.memory_space<vmem>>, %arg5: memref<1x256xf32, #tpu.memory_space<vmem>>, %arg6: memref<256x128xbf16, #tpu.memory_space<vmem>>, %arg7: memref<1x128xf32, #tpu.memory_space<vmem>>, %arg8: memref<104x128xbf16, #tpu.memory_space<vmem>>) attributes {dimension_semantics = [#tpu.dimension_semantics<parallel>], iteration_bounds = array<i64: 2>, scalar_prefetch = 0 : i64, scratch_operands = 0 : i64, tpu.core_type = #tpu.core_type<tc>, window_params = [{transform_indices = @transform_0, window_bounds = array<i64: 104, 784>}, {pipeline_mode = #tpu.pipeline_mode<synchronous>, transform_indices = @transform_1, window_bounds = array<i64: 784, 512>}, {pipeline_mode = #tpu.pipeline_mode<synchronous>, transform_indices = @transform_2, window_bounds = array<i64: 1, 512>}, {pipeline_mode = #tpu.pipeline_mode<synchronous>, transform_indices = @transform_3, window_bounds = array<i64: 512, 256>}, {pipeline_mode = #tpu.pipeline_mode<synchronous>, transform_indices = @transform_4, window_bounds = array<i64: 1, 256>}, {pipeline_mode = #tpu.pipeline_mode<synchronous>, transform_indices = @transform_5, window_bounds = array<i64: 256, 128>}, {pipeline_mode = #tpu.pipeline_mode<synchronous>, transform_indices = @transform_6, window_bounds = array<i64: 1, 128>}, {transform_indices = @transform_7, window_bounds = array<i64: 104, 128>}]} {
    %c0 = arith.constant 0 : index
    %c0_0 = arith.constant 0 : index
    %0 = vector.load %arg1[%c0, %c0_0] : memref<104x784xf32, #tpu.memory_space<vmem>>, vector<104x784xf32>
    %1 = arith.truncf %0 : vector<104x784xf32> to vector<104x784xbf16>
    %c0_1 = arith.constant 0 : index
    %c0_2 = arith.constant 0 : index
    %2 = vector.load %arg2[%c0_1, %c0_2] : memref<784x512xbf16, #tpu.memory_space<vmem>>, vector<784x512xbf16>
    %cst = arith.constant dense<0.000000e+00> : vector<104x512xf32>
    %3 = tpu.matmul %1, %2, %cst {dimension_numbers = #tpu.dot_dimension_numbers<[1], [0], [0], [1], [0, 0, 1, 1], [], []>} : vector<104x784xbf16>, vector<784x512xbf16>, vector<104x512xf32> -> vector<104x512xf32>
    %c0_3 = arith.constant 0 : index
    %c0_4 = arith.constant 0 : index
    %4 = vector.load %arg3[%c0_3, %c0_4] : memref<1x512xf32, #tpu.memory_space<vmem>>, vector<1x512xf32>
    %5 = vector.broadcast %4 : vector<1x512xf32> to vector<104x512xf32>
    %6 = arith.addf %3, %5 : vector<104x512xf32>
    %cst_5 = arith.constant 0.000000e+00 : f32
    %7 = vector.broadcast %cst_5 : f32 to vector<104x512xf32>
    %8 = arith.maximumf %6, %7 : vector<104x512xf32>
    %9 = arith.truncf %8 : vector<104x512xf32> to vector<104x512xbf16>
    %c0_6 = arith.constant 0 : index
    %c0_7 = arith.constant 0 : index
    %10 = vector.load %arg4[%c0_6, %c0_7] : memref<512x256xbf16, #tpu.memory_space<vmem>>, vector<512x256xbf16>
    %cst_8 = arith.constant dense<0.000000e+00> : vector<104x256xf32>
    %11 = tpu.matmul %9, %10, %cst_8 {dimension_numbers = #tpu.dot_dimension_numbers<[1], [0], [0], [1], [0, 0, 1, 1], [], []>} : vector<104x512xbf16>, vector<512x256xbf16>, vector<104x256xf32> -> vector<104x256xf32>
    %c0_9 = arith.constant 0 : index
    %c0_10 = arith.constant 0 : index
    %12 = vector.load %arg5[%c0_9, %c0_10] : memref<1x256xf32, #tpu.memory_space<vmem>>, vector<1x256xf32>
    %13 = vector.broadcast %12 : vector<1x256xf32> to vector<104x256xf32>
    %14 = arith.addf %11, %13 : vector<104x256xf32>
    %cst_11 = arith.constant 0.000000e+00 : f32
    %15 = vector.broadcast %cst_11 : f32 to vector<104x256xf32>
    %16 = arith.maximumf %14, %15 : vector<104x256xf32>
    %17 = arith.truncf %16 : vector<104x256xf32> to vector<104x256xbf16>
    %c0_12 = arith.constant 0 : index
    %c0_13 = arith.constant 0 : index
    %18 = vector.load %arg6[%c0_12, %c0_13] : memref<256x128xbf16, #tpu.memory_space<vmem>>, vector<256x128xbf16>
    %cst_14 = arith.constant dense<0.000000e+00> : vector<104x128xf32>
    %19 = tpu.matmul %17, %18, %cst_14 {dimension_numbers = #tpu.dot_dimension_numbers<[1], [0], [0], [1], [0, 0, 1, 1], [], []>} : vector<104x256xbf16>, vector<256x128xbf16>, vector<104x128xf32> -> vector<104x128xf32>
    %c0_15 = arith.constant 0 : index
    %c0_16 = arith.constant 0 : index
    %20 = vector.load %arg7[%c0_15, %c0_16] : memref<1x128xf32, #tpu.memory_space<vmem>>, vector<1x128xf32>
    %21 = vector.broadcast %20 : vector<1x128xf32> to vector<104x128xf32>
    %22 = arith.addf %19, %21 : vector<104x128xf32>
    %cst_17 = arith.constant 0.000000e+00 : f32
    %23 = vector.broadcast %cst_17 : f32 to vector<104x128xf32>
    %24 = arith.maximumf %22, %23 : vector<104x128xf32>
    %25 = arith.truncf %24 : vector<104x128xf32> to vector<104x128xbf16>
    %c0_18 = arith.constant 0 : index
    %c0_19 = arith.constant 0 : index
    %26 = vector.load %arg8[%c0_18, %c0_19] : memref<104x128xbf16, #tpu.memory_space<vmem>>, vector<104x128xbf16>
    tpu.vector_store %arg8[%c0_18, %c0_19], %25 {strides = array<i32>} : memref<104x128xbf16, #tpu.memory_space<vmem>>, vector<104x128xbf16>,
    return
  }
  func.func @transform_0(%arg0: i32) -> (i32, i32) {
    %c0_i32 = arith.constant 0 : i32
    %c0_i32_0 = arith.constant 0 : i32
    return %arg0, %c0_i32 : i32, i32
  }
  func.func @transform_1(%arg0: i32) -> (i32, i32) {
    %c0_i32 = arith.constant 0 : i32
    %c0_i32_0 = arith.constant 0 : i32
    %c0_i32_1 = arith.constant 0 : i32
    return %c0_i32, %c0_i32_0 : i32, i32
  }
  func.func @transform_2(%arg0: i32) -> (i32, i32) {
    %c0_i32 = arith.constant 0 : i32
    %c0_i32_0 = arith.constant 0 : i32
    %c0_i32_1 = arith.constant 0 : i32
    return %c0_i32, %c0_i32_0 : i32, i32
  }
  func.func @transform_3(%arg0: i32) -> (i32, i32) {
    %c0_i32 = arith.constant 0 : i32
    %c0_i32_0 = arith.constant 0 : i32
    %c0_i32_1 = arith.constant 0 : i32
    return %c0_i32, %c0_i32_0 : i32, i32
  }
  func.func @transform_4(%arg0: i32) -> (i32, i32) {
    %c0_i32 = arith.constant 0 : i32
    %c0_i32_0 = arith.constant 0 : i32
    %c0_i32_1 = arith.constant 0 : i32
    return %c0_i32, %c0_i32_0 : i32, i32
  }
  func.func @transform_5(%arg0: i32) -> (i32, i32) {
    %c0_i32 = arith.constant 0 : i32
    %c0_i32_0 = arith.constant 0 : i32
    %c0_i32_1 = arith.constant 0 : i32
    return %c0_i32, %c0_i32_0 : i32, i32
  }
  func.func @transform_6(%arg0: i32) -> (i32, i32) {
    %c0_i32 = arith.constant 0 : i32
    %c0_i32_0 = arith.constant 0 : i32
    %c0_i32_1 = arith.constant 0 : i32
    return %c0_i32, %c0_i32_0 : i32, i32
  }
  func.func @transform_7(%arg0: i32) -> (i32, i32) {
    %c0_i32 = arith.constant 0 : i32
    %c0_i32_0 = arith.constant 0 : i32
    return %arg0, %c0_i32 : i32, i32
  }
}

</mosaic_0001>

<bundles_post_ra>
// kernel: tpu_custom_call.1
= control target key start
LH: loop header
LB: loop body
LE: loop exit
PB: predicated region body
PF: predicated region fallthrough
CT: control target
= control target key end

     0   :  { %s7293_s0 = inlined_call_operand.hbm [shape: f32[200,784], index: 0, kind: input, shape index: {}]   ;;  %s7294_s1 = inlined_call_operand.hbm [shape: bf16[784,512], index: 1, kind: input, shape index: {}]   ;;  %s7295_s2 = inlined_call_operand.hbm [shape: f32[1,512], index: 2, kind: input, shape index: {}]   ;;  %s7296_s3 = inlined_call_operand.hbm [shape: bf16[512,256], index: 3, kind: input, shape index: {}]   ;;  %s7297_s4 = inlined_call_operand.vmem [shape: f32[1,256], index: 4, kind: input, shape index: {}]   ;;  %s7298_s5 = inlined_call_operand.hbm [shape: bf16[256,128], index: 5, kind: input, shape index: {}]   ;;  %s7299_s6 = inlined_call_operand.vmem [shape: f32[1,128], index: 6, kind: input, shape index: {}]   ;;  %s7300_s7 = inlined_call_operand.hbm [shape: bf16[200,128], index: 7, kind: output, shape index: {}]  }
   0x1   :  { %7370 = sst [smem:[#allocation50_spill]] %s7294_s1 }
   0x2   :  { %7371 = sst [smem:[#allocation51_spill]] %s7296_s3 }
   0x3   :  { %7372 = sst [smem:[#allocation52_spill]] %s7300_s7 }
   0x4   :  { %12 = vsyncpa [#allocation3], 0 }
   0x5   :  { %14 = vsyncpa [#allocation3 + $0x1], 0 }
   0x6   :  { %15 = vsyncpa [#allocation6], 0 }
   0x7   :  { %16 = vsyncpa [#allocation9], 0 }
   0x8   :  { %17 = vsyncpa [#allocation4], 0 }
   0x9   :  { %19 = vsyncpa [#allocation4 + $0x1], 0  ;;  %s6064_s24 = smov 0   ;;  %s6066_s25 = smov 0  }
   0xa   :  { %s6068_s26 = smov 0   ;;  %s6070_s27 = smov 0  }
   0xb LB: > { %7373 = sst [smem:[#allocation16_spill]] %s5994_s24  ;;  %s6085_s28 = sadd.s32 4294967295, %s6006_s27   ;;  %s6006_s27 = sphi %s6070_s27, %s7487_s27   ;;  %s6002_s26 = sphi %s6068_s26, %s7491_s26   ;;  %s5998_s25 = sphi %s6066_s25, %s7490_s25   ;;  %s5994_s24 = sphi %s6064_s24, %s7489_s24  }
   0xc   : > { %s4181_s29 = sadd.s32 4294967294, %s6006_s27   ;;  %s6089_s30 = sadd.s32 1, %s6006_s27  }
   0xd   : > { %7374 = sst [smem:[#allocation17_spill]] %s6089_s30  ;;  %s32_s8 = sadd.s32 1, %s6002_s26 }
   0xe   : > { %s29_s9 = ssub.s32 %s6006_s27, %s6089_s30  ;;  %p39_p0 = scmp.ne.s32.totalorder %s6002_s26, %s5998_s25 }
   0xf   : > { %p30_p1 = scmp.eq.s32.totalorder %s29_s9, 0  ;;  %p40_p2 = scmp.eq.s32.totalorder %s6006_s27, 0 }
  0x10   : > { %p45_p3 = scmp.ne.s32.totalorder %s5998_s25, %s5994_s24  ;;  %p7307_p4 = scmp.eq.s32.totalorder %s6085_s28, 0 }
  0x11   : > { %s6101_s10 = scalar_select %p30_p1, %s6002_s26, %s32_s8  }
  0x12   : > { %p6103_p5 = por %p40_p2, %p39_p0  ;;  %p6109_p6 = por %p7307_p4, %p45_p3 }
  0x13   : > { %7375 = sst [smem:[#allocation18_spill]] %s6101_s10  ;;  %p195_p7 = scmp.eq.s32.totalorder %s6085_s28, 1 }
  0x14   : > { %p201_p8 = scmp.eq.s32.totalorder %s4181_s29, 1  ;;  %p4182_p9 = scmp.ge.s32.totalorder %s6006_s27, 1 }
  0x15   : > { %p208_p10 = scmp.lt.s32.totalorder %s6006_s27, 3  ;;  %p6116_p11 = por %p195_p7, %p39_p0 }
  0x16   : > { %p6120_p12 = por %p201_p8, %p45_p3  ;;  %s7382_s1 = sld [smem:[#allocation50_spill]] }
  0x17   : > { %p6124_p13 = pnand %p4182_p9, %p208_p10  ;;  %s6008_s19 = smov [#allocation5]  }
  0x18   : > { %s7379_s14 = scalar_select %p6120_p12, 1, 0 }
  0x19   : > { %p5687_p1 = pneg %p6124_p13  ;;  %s221_s20 = sshll.u32 %s6008_s19, 4  ;;  %s222_s20 = int_to_ptr.vmem [resolvable:$true] %s221_s20 }
  0x1a   : > { %7380 = sst [smem:[#allocation19_spill]] %s7379_s14  ;;  %s6009_s8 = smov 256  }
  0x1b   : > { %p6135_p0 = pnand %p5687_p1, %p7307_p4  ;;  %s7384_s3 = sld [smem:[#allocation51_spill]] }
  0x1c   : > { %s219_s18 = sshll.u32 %s7382_s1, 4  ;;  %s6010_s9 = smov 16   ;;  %s220_s18 = int_to_ptr.hbm [resolvable:$true] %s219_s18 }
  0x1d   : > { %5690 = dma.hbm_to_vmem [thread:$0]  (!%p6135_p0), %s220_s18, 25088, %s222_s20, [#allocation6], %s6009_s8, %s6009_s8, %s6010_s9  }
  0x1e   : > { %s6011_s16 = smov [#allocation8]   ;;  %s234_s10 = sshll.u32 %s7295_s2, 4  ;;  %s235_s10 = int_to_ptr.hbm [resolvable:$true] %s234_s10 }
  0x1f   : > { %s247_s17 = sshll.u32 %s6011_s16, 4  ;;  %s6012_s30 = smov 128   ;;  %s248_s17 = int_to_ptr.vmem [resolvable:$true] %s247_s17 }
  0x20   : > { %s6013_s14 = smov 8   ;;  %s6014_s22 = smov [#allocation7]  }
  0x21   : > { %s245_s29 = sshll.u32 %s7384_s3, 4  ;;  %s236_s23 = sshll.u32 %s6014_s22, 4  ;;  %s246_s29 = int_to_ptr.hbm [resolvable:$true] %s245_s29  ;;  %s237_s23 = int_to_ptr.vmem [resolvable:$true] %s236_s23 }
  0x22   : > { %5696 = dma.hbm_to_vmem [thread:$0]  (!%p6135_p0), %s246_s29, 8192, %s248_s17, [#allocation9], %s6012_s30, %s6012_s30, %s6013_s14  }
  0x23   : > { %s262_s7 = sshll.u32 %s7298_s5, 4  ;;  %s6015_s18 = smov [#allocation10]   ;;  %s263_s7 = int_to_ptr.hbm [resolvable:$true] %s262_s7 }
  0x24   : > { %5693 = dma.hbm_to_vmem [thread:$0]  (!%p6135_p0), %s235_s10, 64, %s237_s23, [#allocation6]  }
  0x25   : > { %s264_s20 = sshll.u32 %s6015_s18, 4  ;;  %s6016_s1 = smov 64   ;;  %s265_s20 = int_to_ptr.vmem [resolvable:$true] %s264_s20 }
  0x26   : > { %s6017_s8 = smov 4   ;;  %p7306_p2 = scmp.ge.s32.totalorder %s6006_s27, 2 }
  0x27   : > { %5699 = dma.hbm_to_vmem [thread:$0]  (!%p6135_p0), %s263_s7, 2048, %s265_s20, [#allocation9], %s6016_s1, %s6016_s1, %s6017_s8  }
  0x28   : > { %277 = sbr.rel (%p7306_p2) target bundleno = 87 (0x57), region = 40 }
  0x2d   : > { %280 = sbr.rel (!%p6103_p5) target bundleno = 87 (0x57), region = 44  ;;  %s281_s3 = sand.u32 (%p6103_p5), 1, %s6002_s26  }
  0x2e   : > { %s286_s24 = smul.u32 (%p6103_p5), 13, %s6006_s27  ;;  %s6163_s7 = scalar_lea.sflag (%p6103_p5), [#allocation3], %s281_s3 }
  0x2f   : > { %s5665_s30 = smul.u32 (%p6103_p5), 728, %s281_s3 }
  0x30   : > { %s287_s10 = ssub.s32 (%p6103_p5), 25, %s286_s24 }
  0x31   : > { %p288_p3 = scmp.lt.s32.totalorder (%p6103_p5), %s287_s10, 13  ;;  %s285_s9 = scalar_lea.vmem (%p6103_p5), [#allocation2], %s5665_s30 }
  0x33   : > { %s7493_s10 = smov (!%p288_p3, %s287_s10), 13 }
  0x34   : > { %s4189_s14 = smul.u32 56, %s7493_s10 }
  0x36   : > { %s292_s29 = ssub.s32 728, %s4189_s14 }
  0x37   : > { %s293_s21 = sshll.u32 %s292_s29, 4 }
  0x38   : > { %294 = vsyncadd %s6163_s7, %s293_s21  ;;  %p6166_p7 = scmp.ne.s32.totalorder %s4189_s14, 0  ;;  %s5708_s16 = smul.u32 728, %s6006_s27 }
  0x39   : > { %s6171_s17 = sshll.u32 %s285_s9, 4  ;;  %s6173_s19 = smul.u32 896, %s7493_s10  ;;  %s303_s17 = int_to_ptr.vmem [resolvable:$true] %s6171_s17 }
  0x3a   : > { %s298_s18 = scalar_lea.hbm %s7293_s0, %s5708_s16  ;;  %s5893_s29 = scalar_lea.hbm %s7293_s0, 1400 }
  0x3b   : > { %s300_s20 = sshll.u32 %s298_s18, 4  ;;  %s5884_s8 = sshrl.u32 %s6173_s19, 4  ;;  %s6179_s20 = int_to_ptr.hbm [resolvable:$true] %s300_s20 }
  0x3c   : > { %s5882_s1 = sshra.s32 %s6179_s20, 4  ;;  %s5920_s3 = sshll.u32 %s5884_s8, 4  ;;  %s5883_s1 = int_to_ptr.hbm [resolvable:$true] %s5882_s1 }
  0x3d   : > { %p5886_p5 = scmp.ne.s32.totalorder %s5920_s3, %s6173_s19  ;;  %s5887_s24 = sadd.s32 1, %s5884_s8 }
  0x3e   : > { %p5894_p1 = scmp.lt.s32.totalorder %s5883_s1, %s7293_s0 }
  0x3f   : > { %s7495_s24 = smov (!%p5886_p5, %s5887_s24), %s5884_s8 }
  0x40   : > { %s5889_s30 = scalar_lea.hbm %s5883_s1, %s7495_s24 }
  0x41   : > { %p5890_p8 = scmp.ne.s32.totalorder %s5883_s1, %s5889_s30  ;;  %p5895_p0 = scmp.lt.s32.totalorder %s5893_s29, %s5889_s30 }
  0x43   : > { %p5891_p9 = pnand %p5890_p8, %p6166_p7  ;;  %p5896_p3 = por %p5895_p0, %p5894_p1 }
  0x45   : > { %p5892_p10 = pneg %p5891_p9 }
  0x47   : > { %p5897_p2 = pnand %p5896_p3, %p5892_p10 }
  0x49   : > { %5900 = shalt.err (!%p5897_p2)
}
  0x4a   : > { %s5901_s16 = sshra.s32 %s303_s17, 4  ;;  %s6018_s23 = smov [#allocation2]   ;;  %s5902_s16 = int_to_ptr.vmem [resolvable:$true] %s5901_s16 }
  0x4b   : > { %s5908_s22 = scalar_lea.vmem %s5902_s16, %s7495_s24  ;;  %s5912_s18 = scalar_lea.vmem %s6018_s23, 1456 }
  0x4c   : > { %p5909_p5 = scmp.ne.s32.totalorder %s5902_s16, %s5908_s22  ;;  %p5914_p4 = scmp.lt.s32.totalorder %s5912_s18, %s5908_s22 }
  0x4e   : > { %p5910_p8 = pnand %p5909_p5, %p6166_p7 }
  0x50   : > { %p5911_p9 = pneg %p5910_p8 }
  0x52   : > { %p5916_p12 = pnand %p5914_p4, %p5911_p9 }
  0x54   : > { %5919 = shalt.err (!%p5916_p12)
}
  0x55   : > { %s6019_s1 = smov 896   ;;  %s6020_s8 = smov 56  }
  0x56   : > { %308 = dma.hbm_to_vmem [thread:$0]  (%p6166_p7), %s6179_s20, %s6173_s19, %s303_s17, %s6163_s7, %s6019_s1, %s6019_s1, %s6020_s8  }
  0x57 PF: > { %314 = sbr.rel (%p6124_p13) target bundleno = 1525 (0x5f5), region = 48 }
  0x5c   : > { %s6206_s3 = sand.u32 1, %s5998_s25  }
  0x5d   : > { %s5667_s24 = smul.u32 728, %s6206_s3  ;;  %s317_s30 = scalar_lea.sflag [#allocation3], %s6206_s3 }
  0x5f   : > { %s6210_s10 = scalar_lea.vmem [#allocation2], %s5667_s24 }
  0x60   : > { %5977 = dma.done.wait (%p6109_p6), %s317_s30, 11648  }
  0x61   : > { %5979 = vsyncadd (%p6109_p6), %s317_s30, 4294955648  ;;  %p7386_p4 = scmp.eq.s32.totalorder %s6085_s28, 0 }
  0x63   : > { %5981 = dma.done.wait (%p7386_p4), [#allocation6], 25152   ;;  %p7387_p12 = pmov %p7386_p4 }
  0x64   : > { %p7388_p13 = pmov %p7386_p4 }
  0x65   : > { %5983 = vsyncadd (%p7387_p12), [#allocation6], 4294942144 }
  0x66   : > { %5985 = dma.done.wait (%p7388_p13), [#allocation9], 10240   ;;  %p7389_p2 = pmov %p7386_p4 }
  0x67   : > { %v4312_v0 = vld [vmem:[#allocation5 + $0xe0] sm:$0xf]  ;;  %v5367_v1 = vld [vmem:[#allocation5 + $0xec] sm:$0xf0]  ;;  %vm1710_vm0 = vcmask 130048   ;;  %s5668_s17 = smul.u32 52, %s6206_s3 }
  0x68   : > { %5987 = vsyncadd (%p7389_p2), [#allocation9], 4294957056  ;;  %v4440_v2 = vld [vmem:[#allocation5 + $0x1e0] sm:$0xf]  ;;  %v4313_v3 = vor.u32 %v5367_v1, %v4312_v0  ;;  %v5399_v4 = vld [vmem:[#allocation5 + $0x1ec] sm:$0xf0] }
  0x69   : > { %v4296_v5 = vld [vmem:[#allocation5 + $0xc0] sm:$0xf]  ;;  %v5363_v6 = vld [vmem:[#allocation5 + $0xcc] sm:$0xf0]  ;;  %v4441_v7 = vor.u32 %v5399_v4, %v4440_v2  ;;  %s7217_s19 = scalar_lea.vmem [#allocation11], %s5668_s17  ;;  %s4048_s20 = scalar_lea.sflag [#allocation4], %s6206_s3 }
  0x6a   : > { %v4424_v8 = vld [vmem:[#allocation5 + $0x1c0] sm:$0xf]  ;;  %v5395_v9 = vld [vmem:[#allocation5 + $0x1cc] sm:$0xf0]  ;;  %1732 = vmatpush.bf16.msra.mxu0 %v4313_v3  ;;  %5649 = vmatpush.bf16.msra.mxu2 %v4313_v3  ;;  %v4297_v10 = vor.u32 %v5363_v6, %v4296_v5  ;;  %s4055_s14 = smul.u32 (%p6116_p11), 13, %s6085_s28 }
  0x6b   : > { %1775 = vmatpush.bf16.msra.mxu1 %v4441_v7  ;;  %5657 = vmatpush.bf16.msra.mxu3 %v4441_v7  ;;  %v4425_v11 = vor.u32 %v5395_v9, %v4424_v8  ;;  %v4280_v12 = vld [vmem:[#allocation5 + $0xa0] sm:$0xf]  ;;  %v5359_v13 = vld [vmem:[#allocation5 + $0xac] sm:$0xf0] }
  0x6c   : > { %v4408_v14 = vld [vmem:[#allocation5 + $0x1a0] sm:$0xf]  ;;  %v5391_v15 = vld [vmem:[#allocation5 + $0x1ac] sm:$0xf0]  ;;  %v4281_v16 = vor.u32 %v5359_v13, %v4280_v12  ;;  %s4056_s29 = ssub.s32 (%p6116_p11), 25, %s4055_s14 }
  0x6d   : > { %v4409_v17 = vor.u32 %v5391_v15, %v4408_v14  ;;  %v4264_v18 = vld [vmem:[#allocation5 + $0x80] sm:$0xf]  ;;  %v5355_v19 = vld [vmem:[#allocation5 + $0x8c] sm:$0xf0]  ;;  %p4057_p6 = scmp.lt.s32.totalorder (%p6116_p11), %s4056_s29, 13 }
  0x6e   : > { %1733 = vmatpush.bf16.msra.mxu0 %v4297_v10  ;;  %5650 = vmatpush.bf16.msra.mxu2 %v4297_v10  ;;  %v4392_v20 = vld [vmem:[#allocation5 + $0x180] sm:$0xf]  ;;  %v5387_v21 = vld [vmem:[#allocation5 + $0x18c] sm:$0xf0]  ;;  %v4265_v22 = vor.u32 %v5355_v19, %v4264_v18 }
  0x6f   : > { %1776 = vmatpush.bf16.msra.mxu1 %v4425_v11  ;;  %5658 = vmatpush.bf16.msra.mxu3 %v4425_v11  ;;  %v4393_v23 = vor.u32 %v5387_v21, %v4392_v20  ;;  %v4248_v24 = vld [vmem:[#allocation5 + $0x60] sm:$0xf]  ;;  %v5351_v25 = vld [vmem:[#allocation5 + $0x6c] sm:$0xf0] }
  0x70   : > { %v4376_v26 = vld [vmem:[#allocation5 + $0x160] sm:$0xf]  ;;  %v5383_v27 = vld [vmem:[#allocation5 + $0x16c] sm:$0xf0]  ;;  %v4249_v28 = vor.u32 %v5351_v25, %v4248_v24 }
  0x71   : > { %v4377_v29 = vor.u32 %v5383_v27, %v4376_v26  ;;  %v4232_v30 = vld [vmem:[#allocation5 + $0x40] sm:$0xf]  ;;  %v5347_v31 = vld [vmem:[#allocation5 + $0x4c] sm:$0xf0] }
  0x72   : > { %1734 = vmatpush.bf16.msra.mxu0 %v4281_v16  ;;  %5651 = vmatpush.bf16.msra.mxu2 %v4281_v16  ;;  %v4360_v32 = vld [vmem:[#allocation5 + $0x140] sm:$0xf]  ;;  %v5379_v33 = vld [vmem:[#allocation5 + $0x14c] sm:$0xf0]  ;;  %v4233_v34 = vor.u32 %v5347_v31, %v4232_v30 }
  0x73   : > { %1777 = vmatpush.bf16.msra.mxu1 %v4409_v17  ;;  %5659 = vmatpush.bf16.msra.mxu3 %v4409_v17  ;;  %v4361_v35 = vor.u32 %v5379_v33, %v4360_v32  ;;  %v4216_v36 = vld [vmem:[#allocation5 + $0x20] sm:$0xf]  ;;  %v5343_v37 = vld [vmem:[#allocation5 + $0x2c] sm:$0xf0] }
  0x74   : > { %v4344_v38 = vld [vmem:[#allocation5 + $0x120] sm:$0xf]  ;;  %v5375_v39 = vld [vmem:[#allocation5 + $0x12c] sm:$0xf0]  ;;  %v4217_v40 = vor.u32 %v5343_v37, %v4216_v36 }
  0x75   : > { %v4200_v41 = vld [vmem:[#allocation5] sm:$0xf]  ;;  %v5339_v42 = vld [vmem:[#allocation5 + $0xc] sm:$0xf0]  ;;  %v4345_v43 = vor.u32 %v5375_v39, %v4344_v38 }
  0x76   : > { %1735 = vmatpush.bf16.msra.mxu0 %v4265_v22  ;;  %5652 = vmatpush.bf16.msra.mxu2 %v4265_v22  ;;  %v4328_v44 = vld [vmem:[#allocation5 + $0x100] sm:$0xf]  ;;  %v5371_v45 = vld [vmem:[#allocation5 + $0x10c] sm:$0xf0]  ;;  %v4201_v52 = vor.u32 %v5339_v42, %v4200_v41 }
  0x77   : > { %1778 = vmatpush.bf16.msra.mxu1 %v4393_v23  ;;  %5660 = vmatpush.bf16.msra.mxu3 %v4393_v23  ;;  %v384_v46 = vld [vmem:[%s6210_s10] sm:$0xff]  ;;  %v391_v47 = vld [vmem:[%s6210_s10 + $0x38] sm:$0xff]  ;;  %v385_v55 = vld [vmem:[%s6210_s10 + $0x8] sm:$0xff]  ;;  %v4329_v56 = vor.u32 %v5371_v45, %v4328_v44 }
  0x78   : > { %v4568_v48 = vld [vmem:[#allocation5 + $0x2e0] sm:$0xf]  ;;  %v5431_v49 = vld [vmem:[#allocation5 + $0x2ec] sm:$0xf0]  ;;  %v6232_v63 = vpack.c.bf16 %v391_v47, %v384_v46 }
  0x79   : > { %v4696_v50 = vld [vmem:[#allocation5 + $0x3e0] sm:$0xf]  ;;  %v5463_v51 = vld [vmem:[#allocation5 + $0x3ec] sm:$0xf0]  ;;  %v4569_v60 = vor.u32 %v5431_v49, %v4568_v48 }
  0x7a   : > { %1736 = vmatpush.bf16.msra.mxu0 %v4249_v28  ;;  %5653 = vmatpush.bf16.msra.mxu2 %v4249_v28  ;;  %v440_v53 = vld [vmem:[%s6210_s10 + $0x1c0] sm:$0xff]  ;;  %v447_v54 = vld [vmem:[%s6210_s10 + $0x1f8] sm:$0xff]  ;;  %v441_v58 = vld [vmem:[%s6210_s10 + $0x1c8] sm:$0xff]  ;;  %v4697_v61 = vor.u32 %v5463_v51, %v4696_v50  ;;  %7390 = vst [vmem:[#allocation20_spill] sm:$0xff] %v6232_v63 }
  0x7b   : > { %1779 = vmatpush.bf16.msra.mxu1 %v4377_v29  ;;  %5661 = vmatpush.bf16.msra.mxu3 %v4377_v29  ;;  %v392_v57 = vld [vmem:[%s6210_s10 + $0x40] sm:$0xff]  ;;  %v4552_v62 = vld [vmem:[#allocation5 + $0x2c0] sm:$0xf]  ;;  %v6234_v0 = vpack.c.bf16 %v447_v54, %v440_v53  ;;  %v405_v36 = vld [vmem:[%s6210_s10 + $0xa8] sm:$0xff] }
  0x7c   : > { %v448_v59 = vld [vmem:[%s6210_s10 + $0x200] sm:$0xff]  ;;  %v4680_v2 = vld [vmem:[#allocation5 + $0x3c0] sm:$0xf]  ;;  %v6236_v4 = vpack.c.bf16 %v392_v57, %v385_v55  ;;  %v461_v47 = vld [vmem:[%s6210_s10 + $0x268] sm:$0xff] }
  0x7d   : > { %7391 = vst [vmem:[#allocation21_spill] sm:$0xff] %v6234_v0  ;;  %v5427_v1 = vld [vmem:[#allocation5 + $0x2cc] sm:$0xf0]  ;;  %v6238_v5 = vpack.c.bf16 %v448_v59, %v441_v58  ;;  %v4536_v6 = vld [vmem:[#allocation5 + $0x2a0] sm:$0xf] }
  0x7e   : > { %1737 = vmatpush.bf16.msra.mxu0 %v4233_v34  ;;  %5654 = vmatpush.bf16.msra.mxu2 %v4233_v34  ;;  %v5459_v3 = vld [vmem:[#allocation5 + $0x3cc] sm:$0xf0]  ;;  %7392 = vst [vmem:[#allocation22_spill] sm:$0xff] %v6236_v4  ;;  %v4553_v8 = vor.u32 %v5427_v1, %v4552_v62  ;;  %v4664_v10 = vld [vmem:[#allocation5 + $0x3a0] sm:$0xf] }
  0x7f   : > { %1780 = vmatpush.bf16.msra.mxu1 %v4361_v35  ;;  %5662 = vmatpush.bf16.msra.mxu3 %v4361_v35  ;;  %v5423_v7 = vld [vmem:[#allocation5 + $0x2ac] sm:$0xf0]  ;;  %v4681_v9 = vor.u32 %v5459_v3, %v4680_v2  ;;  %v4824_v11 = vld [vmem:[#allocation5 + $0x4e0] sm:$0xf] }
  0x80   : > { %v5495_v12 = vld [vmem:[#allocation5 + $0x4ec] sm:$0xf0]  ;;  %v4952_v15 = vld [vmem:[#allocation5 + $0x5e0] sm:$0xf]  ;;  %v4537_v22 = vor.u32 %v5423_v7, %v4536_v6 }
  0x81   : > { %v5455_v13 = vld [vmem:[#allocation5 + $0x3ac] sm:$0xf0]  ;;  %v4825_v14 = vor.u32 %v5495_v12, %v4824_v11  ;;  %v4520_v18 = vld [vmem:[#allocation5 + $0x280] sm:$0xf] }
  0x82   : > { %1738 = vmatpush.bf16.msra.mxu0 %v4217_v40  ;;  %5655 = vmatpush.bf16.msra.mxu2 %v4217_v40  ;;  %v5527_v16 = vld [vmem:[#allocation5 + $0x5ec] sm:$0xf0]  ;;  %v4808_v20 = vld [vmem:[#allocation5 + $0x4c0] sm:$0xf]  ;;  %v4665_v23 = vor.u32 %v5455_v13, %v4664_v10 }
  0x83   : > { %1781 = vmatpush.bf16.msra.mxu1 %v4345_v43  ;;  %5663 = vmatpush.bf16.msra.mxu3 %v4345_v43  ;;  %v4953_v17 = vor.u32 %v5527_v16, %v4952_v15  ;;  %v5419_v19 = vld [vmem:[#allocation5 + $0x28c] sm:$0xf0]  ;;  %v4648_v24 = vld [vmem:[#allocation5 + $0x380] sm:$0xf] }
  0x84   : > { %v5491_v21 = vld [vmem:[#allocation5 + $0x4cc] sm:$0xf0]  ;;  %v4936_v26 = vld [vmem:[#allocation5 + $0x5c0] sm:$0xf]  ;;  %v4521_v37 = vor.u32 %v5419_v19, %v4520_v18 }
  0x85   : > { %v4809_v25 = vor.u32 %v5491_v21, %v4808_v20  ;;  %v5523_v27 = vld [vmem:[#allocation5 + $0x5cc] sm:$0xf0]  ;;  %v4792_v30 = vld [vmem:[#allocation5 + $0x4a0] sm:$0xf] }
  0x86   : > { %1739 = vmatpush.bf16.msra.mxu0 %v4201_v52  ;;  %5656 = vmatpush.bf16.msra.mxu2 %v4201_v52  ;;  %v5451_v28 = vld [vmem:[#allocation5 + $0x38c] sm:$0xf0]  ;;  %v4937_v29 = vor.u32 %v5523_v27, %v4936_v26  ;;  %v4920_v32 = vld [vmem:[#allocation5 + $0x5a0] sm:$0xf] }
  0x87   : > { %1782 = vmatpush.bf16.msra.mxu1 %v4329_v56  ;;  %5664 = vmatpush.bf16.msra.mxu3 %v4329_v56  ;;  %v5487_v31 = vld [vmem:[#allocation5 + $0x4ac] sm:$0xf0]  ;;  %v398_v35 = vld [vmem:[%s6210_s10 + $0x70] sm:$0xff]  ;;  %v4649_v38 = vor.u32 %v5451_v28, %v4648_v24  ;;  %v399_v48 = vld [vmem:[%s6210_s10 + $0x78] sm:$0xff] }
  0x88   : > { %v5519_v33 = vld [vmem:[#allocation5 + $0x5ac] sm:$0xf0]  ;;  %v4793_v34 = vor.u32 %v5487_v31, %v4792_v30  ;;  %v4504_v39 = vld [vmem:[#allocation5 + $0x260] sm:$0xf]  ;;  %v6252_v58 = vpack.c.bf16 %v405_v36, %v398_v35  ;;  %v5365_v31 = vld [vmem:[#allocation5 + $0xe4] sm:$0xf] }
  0x89   : > { %1740 = vmatmul.bf16.vlgmr.msra.gmra.mxu0 %v6232_v63  ;;  %1760 = vmatmul.bf16.vlgmr.msra.gmra.mxu2 %v6234_v0  ;;  %v4776_v40 = vld [vmem:[#allocation5 + $0x480] sm:$0xf]  ;;  %v5483_v41 = vld [vmem:[#allocation5 + $0x48c] sm:$0xf0]  ;;  %v4921_v45 = vor.u32 %v5519_v33, %v4920_v32  ;;  %v4314_v32 = vld [vmem:[#allocation5 + $0xf0] sm:$0xf0] }
  0x8a   : > { %1818 = vmatpush.bf16.msrb.mxu2 %v4569_v60  ;;  %1783 = vmatmul.bf16.vlgmr.msra.gmra.mxu1 %v6236_v4  ;;  %v5415_v42 = vld [vmem:[#allocation5 + $0x26c] sm:$0xf0]  ;;  %v4632_v43 = vld [vmem:[#allocation5 + $0x360] sm:$0xf]  ;;  %v4777_v52 = vor.u32 %v5483_v41, %v4776_v40  ;;  %7393 = vst [vmem:[#allocation23_spill] sm:$0xff] %v6252_v58 }
  0x8b   : > { %1861 = vmatpush.bf16.msrb.mxu3 %v4697_v61  ;;  %1904 = vmatpush.bf16.msrb.mxu0 %v4825_v14  ;;  %v5447_v44 = vld [vmem:[#allocation5 + $0x36c] sm:$0xf0]  ;;  %v454_v46 = vld [vmem:[%s6210_s10 + $0x230] sm:$0xff]  ;;  %v455_v50 = vld [vmem:[%s6210_s10 + $0x238] sm:$0xff]  ;;  %v4505_v53 = vor.u32 %v5415_v42, %v4504_v39  ;;  %v4317_v42 = vor.u32 %v5365_v31, %v4314_v32 }
  0x8c   : > { %1803 = vmatmul.bf16.vlgmr.msra.gmra.mxu3 %v6238_v5  ;;  %1947 = vmatpush.bf16.msrb.mxu1 %v4953_v17  ;;  %v406_v49 = vld [vmem:[%s6210_s10 + $0xb0] sm:$0xff]  ;;  %v4633_v54 = vor.u32 %v5447_v44, %v4632_v43  ;;  %v5515_v57 = vld [vmem:[#allocation5 + $0x58c] sm:$0xf0]  ;;  %v6254_v59 = vpack.c.bf16 %v461_v47, %v454_v46  ;;  %v419_v43 = vld [vmem:[%s6210_s10 + $0x118] sm:$0xff] }
  0x8d   : > { %v462_v51 = vld [vmem:[%s6210_s10 + $0x270] sm:$0xff]  ;;  %v5411_v60 = vld [vmem:[#allocation5 + $0x24c] sm:$0xf0]  ;;  %v6256_v1 = vpack.c.bf16 %v406_v49, %v399_v48 }
  0x8e   : > { %1819 = vmatpush.bf16.msrb.mxu2 %v4553_v8  ;;  %v4488_v55 = vld [vmem:[#allocation5 + $0x240] sm:$0xf]  ;;  %7394 = vst [vmem:[#allocation24_spill] sm:$0xff] %v6254_v59  ;;  %v5443_v62 = vld [vmem:[#allocation5 + $0x34c] sm:$0xf0]  ;;  %v6258_v2 = vpack.c.bf16 %v462_v51, %v455_v50 }
  0x8f   : > { %1862 = vmatpush.bf16.msrb.mxu3 %v4681_v9  ;;  %1905 = vmatpush.bf16.msrb.mxu0 %v4809_v25  ;;  %v4904_v56 = vld [vmem:[#allocation5 + $0x580] sm:$0xf]  ;;  %7395 = vst [vmem:[#allocation25_spill] sm:$0xff] %v6256_v1  ;;  %v4489_v7 = vor.u32 %v5411_v60, %v4488_v55  ;;  %v5407_v9 = vld [vmem:[#allocation5 + $0x22c] sm:$0xf0] }
  0x90   : > { %1948 = vmatpush.bf16.msrb.mxu1 %v4937_v29  ;;  %v4616_v61 = vld [vmem:[#allocation5 + $0x340] sm:$0xf]  ;;  %7396 = vst [vmem:[#allocation26_spill] sm:$0xff] %v6258_v2  ;;  %v4905_v6 = vor.u32 %v5515_v57, %v4904_v56  ;;  %v5439_v11 = vld [vmem:[#allocation5 + $0x32c] sm:$0xf0] }
  0x91   : > { %v4472_v3 = vld [vmem:[#allocation5 + $0x220] sm:$0xf]  ;;  %v4617_v8 = vor.u32 %v5443_v62, %v4616_v61  ;;  %v5479_v13 = vld [vmem:[#allocation5 + $0x46c] sm:$0xf0]  ;;  %v5361_v62 = vld [vmem:[#allocation5 + $0xc4] sm:$0xf] }
  0x92   : > { %1820 = vmatpush.bf16.msrb.mxu2 %v4537_v22  ;;  %v4600_v10 = vld [vmem:[#allocation5 + $0x320] sm:$0xf]  ;;  %v5511_v16 = vld [vmem:[#allocation5 + $0x56c] sm:$0xf0]  ;;  %v4473_v21 = vor.u32 %v5407_v9, %v4472_v3  ;;  %v4298_v3 = vld [vmem:[#allocation5 + $0xd0] sm:$0xf0] }
  0x93   : > { %1863 = vmatpush.bf16.msrb.mxu3 %v4665_v23  ;;  %1906 = vmatpush.bf16.msrb.mxu0 %v4793_v34  ;;  %v4760_v12 = vld [vmem:[#allocation5 + $0x460] sm:$0xf]  ;;  %v5403_v18 = vld [vmem:[#allocation5 + $0x20c] sm:$0xf0]  ;;  %v4601_v22 = vor.u32 %v5439_v11, %v4600_v10 }
  0x94   : > { %1949 = vmatpush.bf16.msrb.mxu1 %v4921_v45  ;;  %v4888_v14 = vld [vmem:[#allocation5 + $0x560] sm:$0xf]  ;;  %v4761_v15 = vor.u32 %v5479_v13, %v4760_v12  ;;  %v5475_v23 = vld [vmem:[#allocation5 + $0x44c] sm:$0xf0] }
  0x95   : > { %v4456_v17 = vld [vmem:[#allocation5 + $0x200] sm:$0xf]  ;;  %v4889_v19 = vor.u32 %v5511_v16, %v4888_v14  ;;  %v5507_v25 = vld [vmem:[#allocation5 + $0x54c] sm:$0xf0] }
  0x96   : > { %1821 = vmatpush.bf16.msrb.mxu2 %v4521_v37  ;;  %v4744_v20 = vld [vmem:[#allocation5 + $0x440] sm:$0xf]  ;;  %v5435_v27 = vld [vmem:[#allocation5 + $0x30c] sm:$0xf0]  ;;  %v4457_v36 = vor.u32 %v5403_v18, %v4456_v17 }
  0x97   : > { %1864 = vmatpush.bf16.msrb.mxu3 %v4649_v38  ;;  %1907 = vmatpush.bf16.msrb.mxu0 %v4777_v52  ;;  %v4872_v24 = vld [vmem:[#allocation5 + $0x540] sm:$0xf]  ;;  %v4745_v29 = vor.u32 %v5475_v23, %v4744_v20  ;;  %v5531_v30 = vld [vmem:[#allocation5 + $0x60c] sm:$0xf0]  ;;  %v4266_v23 = vld [vmem:[#allocation5 + $0x90] sm:$0xf0] }
  0x98   : > { %1950 = vmatpush.bf16.msrb.mxu1 %v4905_v6  ;;  %v4584_v26 = vld [vmem:[#allocation5 + $0x300] sm:$0xf]  ;;  %v4873_v33 = vor.u32 %v5507_v25, %v4872_v24  ;;  %v5471_v35 = vld [vmem:[#allocation5 + $0x42c] sm:$0xf0]  ;;  %v5357_v6 = vld [vmem:[#allocation5 + $0xa4] sm:$0xf] }
  0x99   : > { %1745 = vmatmul.bf16.gmra.mxu0 %v6252_v58  ;;  %1765 = vmatmul.bf16.gmra.mxu2 %v6254_v59  ;;  %v4968_v28 = vld [vmem:[#allocation5 + $0x600] sm:$0xf]  ;;  %v4585_v37 = vor.u32 %v5435_v27, %v4584_v26  ;;  %v5503_v39 = vld [vmem:[#allocation5 + $0x52c] sm:$0xf0] }
  0x9a   : > { %1822 = vmatpush.bf16.msrb.mxu2 %v4505_v53  ;;  %1788 = vmatmul.bf16.gmra.mxu1 %v6256_v1  ;;  %v4728_v34 = vld [vmem:[#allocation5 + $0x420] sm:$0xf]  ;;  %v412_v40 = vld [vmem:[%s6210_s10 + $0xe0] sm:$0xff]  ;;  %v4969_v41 = vor.u32 %v5531_v30, %v4968_v28  ;;  %v413_v45 = vld [vmem:[%s6210_s10 + $0xe8] sm:$0xff] }
  0x9b   : > { %1865 = vmatpush.bf16.msrb.mxu3 %v4633_v54  ;;  %1908 = vmatpush.bf16.msrb.mxu0 %v4761_v15  ;;  %v4856_v38 = vld [vmem:[#allocation5 + $0x520] sm:$0xf]  ;;  %v468_v44 = vld [vmem:[%s6210_s10 + $0x2a0] sm:$0xff]  ;;  %v4729_v46 = vor.u32 %v5471_v35, %v4728_v34  ;;  %v469_v48 = vld [vmem:[%s6210_s10 + $0x2a8] sm:$0xff]  ;;  %v6270_v54 = vpack.c.bf16 %v419_v43, %v412_v40 }
  0x9c   : > { %1808 = vmatmul.bf16.gmra.mxu3 %v6258_v2  ;;  %1951 = vmatpush.bf16.msrb.mxu1 %v4889_v19  ;;  %v420_v47 = vld [vmem:[%s6210_s10 + $0x120] sm:$0xff]  ;;  %v4857_v49 = vor.u32 %v5503_v39, %v4856_v38  ;;  %v4712_v50 = vld [vmem:[#allocation5 + $0x400] sm:$0xf]  ;;  %v6272_v55 = vpack.c.bf16 %v468_v44, %v468_v44  ;;  %v6276_v57 = vpack.c.bf16 %v469_v48, %v469_v48  ;;  %v433_v11 = vld [vmem:[%s6210_s10 + $0x188] sm:$0xff] }
  0x9d   : > { %v5467_v51 = vld [vmem:[#allocation5 + $0x40c] sm:$0xf0]  ;;  %v4840_v52 = vld [vmem:[#allocation5 + $0x500] sm:$0xf]  ;;  %v6274_v56 = vpack.c.bf16 %v420_v47, %v413_v45  ;;  %v4250_v38 = vld [vmem:[#allocation5 + $0x70] sm:$0xf0] }
  0x9e   : > { %1823 = vmatpush.bf16.msrb.mxu2 %v4489_v7  ;;  %v5499_v53 = vld [vmem:[#allocation5 + $0x50c] sm:$0xf0]  ;;  %v4713_v60 = vor.u32 %v5467_v51, %v4712_v50  ;;  %v4301_v7 = vor.u32 %v5361_v62, %v4298_v3  ;;  %v426_v10 = vld [vmem:[%s6210_s10 + $0x150] sm:$0xff]  ;;  %v427_v12 = vld [vmem:[%s6210_s10 + $0x158] sm:$0xff] }
  0x9f   : > { %1866 = vmatpush.bf16.msrb.mxu3 %v4617_v8  ;;  %1909 = vmatpush.bf16.msrb.mxu0 %v4745_v29  ;;  %v4841_v61 = vor.u32 %v5499_v53, %v4840_v52  ;;  %v4282_v8 = vld [vmem:[#allocation5 + $0xb0] sm:$0xf0]  ;;  %v386_v13 = vld [vmem:[%s6210_s10 + $0x10] sm:$0xff]  ;;  %v387_v16 = vld [vmem:[%s6210_s10 + $0x18] sm:$0xff]  ;;  %v6290_v18 = vpack.c.bf16 %v433_v11, %v426_v10 }
  0xa0   : > { %1952 = vmatpush.bf16.msrb.mxu1 %v4873_v33  ;;  %v4285_v9 = vor.u32 %v5357_v6, %v4282_v8  ;;  %v393_v14 = vld [vmem:[%s6210_s10 + $0x48] sm:$0xff]  ;;  %v434_v15 = vld [vmem:[%s6210_s10 + $0x190] sm:$0xff]  ;;  %v400_v25 = vld [vmem:[%s6210_s10 + $0x80] sm:$0xff] }
  0xa1   : > { %v394_v17 = vld [vmem:[%s6210_s10 + $0x50] sm:$0xff]  ;;  %v6292_v19 = vpack.c.bf16 %v393_v14, %v386_v13  ;;  %v6294_v20 = vpack.c.bf16 %v434_v15, %v427_v12  ;;  %v407_v26 = vld [vmem:[%s6210_s10 + $0xb8] sm:$0xff]  ;;  %v401_v27 = vld [vmem:[%s6210_s10 + $0x88] sm:$0xff] }
  0xa2   : > { %1824 = vmatpush.bf16.msrb.mxu2 %v4473_v21  ;;  %v6296_v21 = vpack.c.bf16 %v394_v17, %v387_v16  ;;  %v388_v28 = vld [vmem:[%s6210_s10 + $0x20] sm:$0xff]  ;;  %v395_v29 = vld [vmem:[%s6210_s10 + $0x58] sm:$0xff]  ;;  %v389_v31 = vld [vmem:[%s6210_s10 + $0x28] sm:$0xff]  ;;  %v6310_v33 = vpack.c.bf16 %v407_v26, %v400_v25 }
  0xa3   : > { %1867 = vmatpush.bf16.msrb.mxu3 %v4601_v22  ;;  %1910 = vmatpush.bf16.msrb.mxu0 %v4729_v46  ;;  %7397 = vst [vmem:[#allocation27_spill] sm:$0xff] %v6292_v19  ;;  %v5353_v22 = vld [vmem:[#allocation5 + $0x84] sm:$0xf]  ;;  %v408_v30 = vld [vmem:[%s6210_s10 + $0xc0] sm:$0xff]  ;;  %v6312_v34 = vpack.c.bf16 %v395_v29, %v388_v28  ;;  %v409_v44 = vld [vmem:[%s6210_s10 + $0xc8] sm:$0xff] }
  0xa4   : > { %1953 = vmatpush.bf16.msrb.mxu1 %v4857_v49  ;;  %7398 = vst [vmem:[#allocation28_spill] sm:$0xff] %v6296_v21  ;;  %v4269_v24 = vor.u32 %v5353_v22, %v4266_v23  ;;  %v396_v32 = vld [vmem:[%s6210_s10 + $0x60] sm:$0xff]  ;;  %v6314_v35 = vpack.c.bf16 %v408_v30, %v401_v27  ;;  %v414_v40 = vld [vmem:[%s6210_s10 + $0xf0] sm:$0xff]  ;;  %v403_v46 = vld [vmem:[%s6210_s10 + $0x98] sm:$0xff] }
  0xa5   : > { %7399 = vst [vmem:[#allocation29_spill] sm:$0xff] %v6310_v33  ;;  %v402_v43 = vld [vmem:[%s6210_s10 + $0x90] sm:$0xff]  ;;  %v4234_v53 = vld [vmem:[#allocation5 + $0x50] sm:$0xf0]  ;;  %v435_v62 = vld [vmem:[%s6210_s10 + $0x198] sm:$0xff] }
  0xa6   : > { %1825 = vmatpush.bf16.msrb.mxu2 %v4457_v36  ;;  %7400 = vst [vmem:[#allocation30_spill] sm:$0xff] %v6314_v35  ;;  %v6316_v36 = vpack.c.bf16 %v396_v32, %v389_v31  ;;  %v422_v45 = vld [vmem:[%s6210_s10 + $0x130] sm:$0xff]  ;;  %v6332_v49 = vpack.c.bf16 %v409_v44, %v402_v43  ;;  %v429_v3 = vld [vmem:[%s6210_s10 + $0x168] sm:$0xff]  ;;  %v416_v6 = vld [vmem:[%s6210_s10 + $0x100] sm:$0xff] }
  0xa7   : > { %1868 = vmatpush.bf16.msrb.mxu3 %v4585_v37  ;;  %1911 = vmatpush.bf16.msrb.mxu0 %v4713_v60  ;;  %v5349_v37 = vld [vmem:[#allocation5 + $0x64] sm:$0xf]  ;;  %v436_v8 = vld [vmem:[%s6210_s10 + $0x1a0] sm:$0xff]  ;;  %v449_v16 = vld [vmem:[%s6210_s10 + $0x208] sm:$0xff] }
  0xa8   : > { %1954 = vmatpush.bf16.msrb.mxu1 %v4841_v61  ;;  %v4253_v39 = vor.u32 %v5349_v37, %v4250_v38  ;;  %v410_v47 = vld [vmem:[%s6210_s10 + $0xd0] sm:$0xff]  ;;  %v428_v61 = vld [vmem:[%s6210_s10 + $0x160] sm:$0xff]  ;;  %v6354_v13 = vpack.c.bf16 %v436_v8, %v429_v3  ;;  %v443_v23 = vld [vmem:[%s6210_s10 + $0x1d8] sm:$0xff] }
  0xa9   : > { %1750 = vmatmul.bf16.gmra.mxu0 %v6270_v54  ;;  %1770 = vmatmul.bf16.gmra.mxu2 %v6272_v55  ;;  %v6336_v51 = vpack.c.bf16 %v410_v47, %v403_v46  ;;  %v5345_v52 = vld [vmem:[#allocation5 + $0x44] sm:$0xf]  ;;  %v424_v10 = vld [vmem:[%s6210_s10 + $0x140] sm:$0xff]  ;;  %v6350_v11 = vpack.c.bf16 %v435_v62, %v428_v61  ;;  %v437_v25 = vld [vmem:[%s6210_s10 + $0x1a8] sm:$0xff] }
  0xaa   : > { %1997 = vmatpush.bf16.msra.mxu2 %v4969_v41  ;;  %1793 = vmatmul.bf16.gmra.mxu1 %v6274_v56  ;;  %v421_v41 = vld [vmem:[%s6210_s10 + $0x128] sm:$0xff]  ;;  %v4237_v60 = vor.u32 %v5345_v52, %v4234_v53  ;;  %v442_v15 = vld [vmem:[%s6210_s10 + $0x1d0] sm:$0xff]  ;;  %v431_v28 = vld [vmem:[%s6210_s10 + $0x178] sm:$0xff] }
  0xab   : > { %2033 = vmatpush.bf16.msra.mxu3 %v4317_v42  ;;  %v415_v42 = vld [vmem:[%s6210_s10 + $0xf8] sm:$0xff]  ;;  %v6330_v48 = vpack.c.bf16 %v421_v41, %v414_v40  ;;  %7402 = vst [vmem:[#allocation32_spill] sm:$0xff] %v6350_v11  ;;  %v4218_v22 = vld [vmem:[#allocation5 + $0x30] sm:$0xf0]  ;;  %v450_v27 = vld [vmem:[%s6210_s10 + $0x210] sm:$0xff]  ;;  %v6370_v30 = vpack.c.bf16 %v449_v16, %v442_v15 }
  0xac   : > { %1813 = vmatmul.bf16.gmra.mxu3 %v6276_v57  ;;  %v6334_v50 = vpack.c.bf16 %v422_v45, %v415_v42  ;;  %v5341_v17 = vld [vmem:[#allocation5 + $0x24] sm:$0xf]  ;;  %v6374_v32 = vpack.c.bf16 %v450_v27, %v443_v23  ;;  %v4570_v42 = vld [vmem:[#allocation5 + $0x2f0] sm:$0xf0]  ;;  %v6382_v62 = vld [vmem:[#allocation7] sm:$0xf] }
  0xad   : > { %7401 = vst [vmem:[#allocation31_spill] sm:$0xff] %v6330_v48  ;;  %v4221_v26 = vor.u32 %v5341_v17, %v4218_v22  ;;  %v438_v29 = vld [vmem:[%s6210_s10 + $0x1b0] sm:$0xff]  ;;  %v4426_v45 = vld [vmem:[#allocation5 + $0x1d0] sm:$0xf0]  ;;  %v451_v23 = vld [vmem:[%s6210_s10 + $0x218] sm:$0xff] }
  0xae   : > { %7403 = vst [vmem:[#allocation33_spill] sm:$0xff] %v6370_v30  ;;  %v6376_v37 = vpack.c.bf16 %v438_v29, %v431_v28  ;;  %v5397_v38 = vld [vmem:[#allocation5 + $0x1e4] sm:$0xf]  ;;  %v4554_v52 = vld [vmem:[#allocation5 + $0x2d0] sm:$0xf0] }
  0xaf   : > { %2034 = vmatpush.bf16.msra.mxu3 %v4301_v7  ;;  %v423_v7 = vld [vmem:[%s6210_s10 + $0x138] sm:$0xff]  ;;  %7404 = vst [vmem:[#allocation34_spill] sm:$0xff] %v6374_v32  ;;  %v4202_v61 = vld [vmem:[#allocation5 + $0x10] sm:$0xf0] }
  0xb0   : > { %v6352_v12 = vpack.c.bf16 %v423_v7, %v416_v6  ;;  %7405 = vst [vmem:[#allocation35_spill] sm:$0xff] %v6376_v37  ;;  %v5429_v40 = vld [vmem:[#allocation5 + $0x2e4] sm:$0xf]  ;;  %v4410_v7 = vld [vmem:[#allocation5 + $0x1b0] sm:$0xf0] }
  0xb1   : > { %v4573_v43 = vor.u32 %v5429_v40, %v4570_v42  ;;  %v5393_v44 = vld [vmem:[#allocation5 + $0x1c4] sm:$0xf]  ;;  %v4538_v16 = vld [vmem:[#allocation5 + $0x2b0] sm:$0xf0] }
  0xb2   : > { %v5425_v46 = vld [vmem:[#allocation5 + $0x2c4] sm:$0xf]  ;;  %v4429_v47 = vor.u32 %v5393_v44, %v4426_v45  ;;  %v457_v17 = vld [vmem:[%s6210_s10 + $0x248] sm:$0xff]  ;;  %v444_v22 = vld [vmem:[%s6210_s10 + $0x1e0] sm:$0xff] }
  0xb3   : > { %2035 = vmatpush.bf16.msra.mxu3 %v4285_v9  ;;  %v417_v9 = vld [vmem:[%s6210_s10 + $0x108] sm:$0xff]  ;;  %2119 = vmatpush.bf16.msra.mxu1 %v4573_v43  ;;  %v4557_v53 = vor.u32 %v5425_v46, %v4554_v52  ;;  %v5389_v6 = vld [vmem:[#allocation5 + $0x1a4] sm:$0xf]  ;;  %v452_v27 = vld [vmem:[%s6210_s10 + $0x220] sm:$0xff] }
  0xb4   : > { %v6356_v14 = vpack.c.bf16 %v424_v10, %v417_v9  ;;  %v5421_v8 = vld [vmem:[#allocation5 + $0x2a4] sm:$0xf]  ;;  %v456_v9 = vld [vmem:[%s6210_s10 + $0x240] sm:$0xff]  ;;  %v4413_v15 = vor.u32 %v5389_v6, %v4410_v7 }
  0xb5   : > { %v463_v10 = vld [vmem:[%s6210_s10 + $0x278] sm:$0xff]  ;;  %v4394_v29 = vld [vmem:[#allocation5 + $0x190] sm:$0xf0] }
  0xb6   : > { %v5385_v28 = vld [vmem:[#allocation5 + $0x184] sm:$0xf]  ;;  %v6395_v40 = vpack.c.bf16 %v463_v10, %v456_v9  ;;  %v4522_v43 = vld [vmem:[#allocation5 + $0x290] sm:$0xf0] }
  0xb7   : > { %2036 = vmatpush.bf16.msra.mxu3 %v4269_v24  ;;  %v430_v24 = vld [vmem:[%s6210_s10 + $0x170] sm:$0xff]  ;;  %2120 = vmatpush.bf16.msra.mxu1 %v4557_v53  ;;  %v4397_v42 = vor.u32 %v5385_v28, %v4394_v29  ;;  %v4698_v10 = vld [vmem:[#allocation5 + $0x3f0] sm:$0xf0] }
  0xb8   : > { %v6372_v31 = vpack.c.bf16 %v437_v25, %v430_v24  ;;  %v4541_v24 = vor.u32 %v5421_v8, %v4538_v16  ;;  %v464_v25 = vld [vmem:[%s6210_s10 + $0x280] sm:$0xff]  ;;  %v5413_v7 = vld [vmem:[#allocation5 + $0x264] sm:$0xf] }
  0xb9   : > { %1755 = vmatmul.bf16.gmra.mxu0 %v6290_v18  ;;  %1826 = vmatmul.bf16.vlgmr.msrb.gmra.mxu2 %v6292_v19  ;;  %v6399_v45 = vpack.c.bf16 %v464_v25, %v457_v17  ;;  %v4506_v8 = vld [vmem:[#allocation5 + $0x270] sm:$0xf0]  ;;  %v5461_v9 = vld [vmem:[#allocation5 + $0x3e4] sm:$0xf] }
  0xba   : > { %1798 = vmatmul.bf16.gmra.mxu1 %v6294_v20  ;;  %v4701_v16 = vor.u32 %v5461_v9, %v4698_v10  ;;  %v4509_v17 = vor.u32 %v5413_v7, %v4506_v8  ;;  %v5377_v25 = vld [vmem:[#allocation5 + $0x144] sm:$0xf]  ;;  %v4474_v9 = vld [vmem:[#allocation5 + $0x230] sm:$0xf0] }
  0xbb   : > { %2037 = vmatpush.bf16.msra.mxu3 %v4253_v39  ;;  %v4442_v39 = vld [vmem:[#allocation5 + $0x1f0] sm:$0xf0]  ;;  %2121 = vmatpush.bf16.msra.mxu1 %v4541_v24  ;;  %7407 = vst [vmem:[#allocation37_spill] sm:$0xff] %v6399_v45  ;;  %v470_v10 = vld [vmem:[%s6210_s10 + $0x2b0] sm:$0xff] }
  0xbc   : > { %1869 = vmatmul.bf16.vlgmr.msrb.gmra.mxu3 %v6296_v21  ;;  %v4445_v41 = vor.u32 %v5397_v38, %v4442_v39  ;;  %v5417_v38 = vld [vmem:[#allocation5 + $0x284] sm:$0xf]  ;;  %v6393_v39 = vperm.slane %v6382_v62, 0  ;;  %2162 = vmatpush.bf16.msrb.mxu2 %v4701_v16  ;;  %v465_v16 = vld [vmem:[%s6210_s10 + $0x288] sm:$0xff] }
  0xbd   : > { %v4525_v53 = vor.u32 %v5417_v38, %v4522_v43 }
  0xbe   : > { %2076 = vmatpush.bf16.msra.mxu0 %v4445_v41  ;;  %v6397_v41 = vpack.c.bf16 %v451_v23, %v444_v22  ;;  %v4826_v22 = vld [vmem:[#allocation5 + $0x4f0] sm:$0xf0] }
  0xbf   : > { %2038 = vmatpush.bf16.msra.mxu3 %v4237_v60  ;;  %v5337_v60 = vld [vmem:[#allocation5 + $0x4] sm:$0xf]  ;;  %2122 = vmatpush.bf16.msra.mxu1 %v4525_v53 }
  0xc0   : > { %v4205_v3 = vor.u32 %v5337_v60, %v4202_v61  ;;  %7406 = vst [vmem:[#allocation36_spill] sm:$0xff] %v6397_v41  ;;  %v5381_v60 = vld [vmem:[#allocation5 + $0x164] sm:$0xf]  ;;  %v4378_v61 = vld [vmem:[#allocation5 + $0x170] sm:$0xf0] }
  0xc1   : > { %v4381_v6 = vor.u32 %v5381_v60, %v4378_v61  ;;  %v5373_v60 = vld [vmem:[#allocation5 + $0x124] sm:$0xf]  ;;  %v4346_v61 = vld [vmem:[#allocation5 + $0x130] sm:$0xf0] }
  0xc2   : > { %2077 = vmatpush.bf16.msra.mxu0 %v4429_v47  ;;  %v4349_v8 = vor.u32 %v5373_v60, %v4346_v61 }
  0xc3   : > { %2039 = vmatpush.bf16.msra.mxu3 %v4221_v26  ;;  %v445_v26 = vld [vmem:[%s6210_s10 + $0x1e8] sm:$0xff]  ;;  %2123 = vmatpush.bf16.msra.mxu1 %v4509_v17  ;;  %v5369_v17 = vld [vmem:[#allocation5 + $0x104] sm:$0xf] }
  0xc4   : > { %v6401_v46 = vpack.c.bf16 %v452_v27, %v445_v26  ;;  %v4362_v26 = vld [vmem:[#allocation5 + $0x150] sm:$0xf0]  ;;  %v5409_v27 = vld [vmem:[#allocation5 + $0x244] sm:$0xf] }
  0xc5   : > { %v4365_v38 = vor.u32 %v5377_v25, %v4362_v26 }
  0xc6   : > { %2078 = vmatpush.bf16.msra.mxu0 %v4413_v15  ;;  %7408 = vst [vmem:[#allocation38_spill] sm:$0xff] %v6401_v46  ;;  %v5493_v15 = vld [vmem:[#allocation5 + $0x4e4] sm:$0xf] }
  0xc7   : > { %2040 = vmatpush.bf16.msra.mxu3 %v4205_v3  ;;  %v4829_v24 = vor.u32 %v5493_v15, %v4826_v22  ;;  %v458_v15 = vld [vmem:[%s6210_s10 + $0x250] sm:$0xff]  ;;  %v471_v22 = vld [vmem:[%s6210_s10 + $0x2b8] sm:$0xff] }
  0xc8   : > { %v6427_v61 = vpack.c.bf16 %v471_v22, %v471_v22  ;;  %v5489_v22 = vld [vmem:[#allocation5 + $0x4c4] sm:$0xf] }
  0xc9   : > { %1831 = vmatmul.bf16.gmra.mxu2 %v6310_v33  ;;  %1912 = vmatmul.bf16.vlgmr.msrb.gmra.mxu0 %v6312_v34 }
  0xca   : > { %1955 = vmatmul.bf16.vlgmr.msrb.gmra.mxu1 %v6316_v36  ;;  %2079 = vmatpush.bf16.msra.mxu0 %v4397_v42  ;;  %v4490_v42 = vld [vmem:[#allocation5 + $0x250] sm:$0xf0]  ;;  %7410 = vst [vmem:[#allocation40_spill] sm:$0xff] %v6427_v61 }
  0xcb   : > { %2205 = vmatpush.bf16.msrb.mxu3 %v4829_v24  ;;  %v4493_v53 = vor.u32 %v5409_v27, %v4490_v42  ;;  %v466_v24 = vld [vmem:[%s6210_s10 + $0x290] sm:$0xff]  ;;  %v4330_v27 = vld [vmem:[#allocation5 + $0x110] sm:$0xf0]  ;;  %v6423_v42 = vpack.c.bf16 %v470_v10, %v470_v10 }
  0xcc   : > { %1874 = vmatmul.bf16.gmra.mxu3 %v6314_v35  ;;  %v5457_v10 = vld [vmem:[#allocation5 + $0x3c4] sm:$0xf] }
  0xcd   : > { %2124 = vmatpush.bf16.msra.mxu1 %v4493_v53 }
  0xce   : > { %2080 = vmatpush.bf16.msra.mxu0 %v4381_v6  ;;  %v5405_v6 = vld [vmem:[#allocation5 + $0x224] sm:$0xf] }
  0xcf   : > { %v4477_v25 = vor.u32 %v5405_v6, %v4474_v9 }
  0xd1   : > { %2125 = vmatpush.bf16.msra.mxu1 %v4477_v25 }
  0xd2   : > { %2081 = vmatpush.bf16.msra.mxu0 %v4365_v38 }
  0xd6   : > { %2082 = vmatpush.bf16.msra.mxu0 %v4349_v8 }
  0xd9   : > { %1836 = vmatmul.bf16.gmra.mxu2 %v6330_v48  ;;  %1917 = vmatmul.bf16.gmra.mxu0 %v6332_v49 }
  0xda   : > { %1960 = vmatmul.bf16.gmra.mxu1 %v6336_v51 }
  0xdc   : > { %1879 = vmatmul.bf16.gmra.mxu3 %v6334_v50 }
  0xe9   : > { %1841 = vmatmul.bf16.gmra.mxu2 %v6350_v11  ;;  %1922 = vmatmul.bf16.gmra.mxu0 %v6352_v12 }
  0xea   : > { %1965 = vmatmul.bf16.gmra.mxu1 %v6356_v14 }
  0xec   : > { %1884 = vmatmul.bf16.gmra.mxu3 %v6354_v13 }
  0xf9   : > { %1846 = vmatmul.bf16.gmra.mxu2 %v6370_v30  ;;  %1927 = vmatmul.bf16.gmra.mxu0 %v6372_v31 }
  0xfa   : > { %1970 = vmatmul.bf16.gmra.mxu1 %v6376_v37 }
  0xfc   : > { %1889 = vmatmul.bf16.gmra.mxu3 %v6374_v32 }
 0x106   : > { %v1741_v44 = vpop.f32.mrf.mxu0 }
 0x107   : > { %v1742_v47 = vadd.f32 %v1741_v44, %v6393_v39  ;;  %v1784_v52 = vpop.f32.mrf.mxu1 }
 0x109   : > { %v6404_v3 = vadd.f32 %v1784_v52, %v1742_v47  ;;  %1851 = vmatmul.bf16.gmra.mxu2 %v6395_v40  ;;  %1932 = vmatmul.bf16.gmra.mxu0 %v6397_v41 }
 0x10a   : > { %1975 = vmatmul.bf16.gmra.mxu1 %v6401_v46 }
 0x10c   : > { %1894 = vmatmul.bf16.gmra.mxu3 %v6399_v45  ;;  %v1761_v23 = vpop.f32.mrf.mxu2  ;;  %v4778_v45 = vld [vmem:[#allocation5 + $0x490] sm:$0xf0] }
 0x10d   : > { %v1762_v28 = vadd.f32 %v1761_v23, %v6393_v39  ;;  %v459_v23 = vld [vmem:[%s6210_s10 + $0x258] sm:$0xff] }
 0x10e   : > { %v1743_v43 = vpop.f32.mrf.mxu0  ;;  %v6429_v46 = vpack.c.bf16 %v466_v24, %v459_v23  ;;  %v4810_v23 = vld [vmem:[#allocation5 + $0x4d0] sm:$0xf0] }
 0x10f   : > { %v1804_v29 = vpop.f32.mrf.mxu3  ;;  %v1744_v47 = vadd.f32 %v1743_v43, %v6393_v39  ;;  %v1786_v52 = vpop.f32.mrf.mxu1  ;;  %v6425_v43 = vpack.c.bf16 %v465_v16, %v458_v15  ;;  %v4682_v15 = vld [vmem:[#allocation5 + $0x3d0] sm:$0xf0]  ;;  %v4813_v24 = vor.u32 %v5489_v22, %v4810_v23 }
 0x110   : > { %v6411_v44 = vadd.f32 %v1804_v29, %v1762_v28  ;;  %v5401_v28 = vld [vmem:[#allocation5 + $0x204] sm:$0xf]  ;;  %7411 = vst [vmem:[#allocation41_spill] sm:$0xff] %v6429_v46  ;;  %v4685_v16 = vor.u32 %v5457_v10, %v4682_v15  ;;  %v473_v10 = vld [vmem:[%s6210_s10 + $0x2c8] sm:$0xff] }
 0x111   : > { %v6414_v7 = vadd.f32 %v1786_v52, %v1744_v47  ;;  %7409 = vst [vmem:[#allocation39_spill] sm:$0xff] %v6425_v43  ;;  %v4333_v47 = vor.u32 %v5369_v17, %v4330_v27  ;;  %v4458_v52 = vld [vmem:[#allocation5 + $0x210] sm:$0xf0]  ;;  %2206 = vmatpush.bf16.msrb.mxu3 %v4813_v24 }
 0x112   : > { %v4461_v9 = vor.u32 %v5401_v28, %v4458_v52  ;;  %2163 = vmatpush.bf16.msrb.mxu2 %v4685_v16 }
 0x113   : > { %2083 = vmatpush.bf16.msra.mxu0 %v4333_v47 }
 0x114   : > { %v1763_v26 = vpop.f32.mrf.mxu2  ;;  %2126 = vmatpush.bf16.msra.mxu1 %v4461_v9 }
 0x115   : > { %v1764_v29 = vadd.f32 %v1763_v26, %v6393_v39 }
 0x116   : > { %v1746_v60 = vpop.f32.mrf.mxu0 }
 0x117   : > { %v1806_v38 = vpop.f32.mrf.mxu3  ;;  %v1747_v6 = vadd.f32 %v1746_v60, %v6393_v39  ;;  %v1789_v8 = vpop.f32.mrf.mxu1  ;;  %v472_v60 = vld [vmem:[%s6210_s10 + $0x2c0] sm:$0xff] }
 0x118   : > { %v6431_v53 = vadd.f32 %v1806_v38, %v1764_v29  ;;  %v6451_v22 = vpack.c.bf16 %v472_v60, %v472_v60  ;;  %v5485_v60 = vld [vmem:[#allocation5 + $0x4a4] sm:$0xf] }
 0x119   : > { %v6434_v26 = vadd.f32 %v1789_v8, %v1747_v6  ;;  %1856 = vmatmul.bf16.gmra.mxu2 %v6423_v42  ;;  %1937 = vmatmul.bf16.gmra.mxu0 %v6425_v43  ;;  %v390_v6 = vld [vmem:[%s6210_s10 + $0x30] sm:$0xff]  ;;  %v397_v8 = vld [vmem:[%s6210_s10 + $0x68] sm:$0xff]  ;;  %v411_v43 = vld [vmem:[%s6210_s10 + $0xd8] sm:$0xff] }
 0x11a   : > { %1980 = vmatmul.bf16.gmra.mxu1 %v6429_v46  ;;  %7412 = vst [vmem:[#allocation42_spill] sm:$0xff] %v6451_v22  ;;  %v6453_v23 = vpack.c.bf16 %v397_v8, %v390_v6  ;;  %v4794_v6 = vld [vmem:[#allocation5 + $0x4b0] sm:$0xf0] }
 0x11b   : > { %v4797_v8 = vor.u32 %v5485_v60, %v4794_v6 }
 0x11c   : > { %1899 = vmatmul.bf16.gmra.mxu3 %v6427_v61  ;;  %v1766_v25 = vpop.f32.mrf.mxu2 }
 0x11d   : > { %v1767_v17 = vadd.f32 %v1766_v25, %v6393_v39  ;;  %v6455_v25 = vpack.c.bf16 %v473_v10, %v473_v10  ;;  %2207 = vmatpush.bf16.msrb.mxu3 %v4797_v8 }
 0x11e   : > { %v1748_v28 = vpop.f32.mrf.mxu0 }
 0x11f   : > { %v1809_v27 = vpop.f32.mrf.mxu3  ;;  %v1749_v38 = vadd.f32 %v1748_v28, %v6393_v39  ;;  %v1791_v47 = vpop.f32.mrf.mxu1  ;;  %7413 = vst [vmem:[#allocation43_spill] sm:$0xff] %v6455_v25 }
 0x120   : > { %v6441_v29 = vadd.f32 %v1809_v27, %v1767_v17 }
 0x121   : > { %v6444_v52 = vadd.f32 %v1791_v47, %v1749_v38  ;;  %v5453_v38 = vld [vmem:[#allocation5 + $0x3a4] sm:$0xf]  ;;  %v4666_v47 = vld [vmem:[#allocation5 + $0x3b0] sm:$0xf0] }
 0x122   : > { %v4669_v46 = vor.u32 %v5453_v38, %v4666_v47  ;;  %v5449_v47 = vld [vmem:[#allocation5 + $0x384] sm:$0xf] }
 0x124   : > { %v1768_v9 = vpop.f32.mrf.mxu2  ;;  %2164 = vmatpush.bf16.msrb.mxu2 %v4669_v46 }
 0x125   : > { %v1769_v15 = vadd.f32 %v1768_v9, %v6393_v39 }
 0x126   : > { %v1751_v24 = vpop.f32.mrf.mxu0 }
 0x127   : > { %v1811_v16 = vpop.f32.mrf.mxu3  ;;  %v1752_v27 = vadd.f32 %v1751_v24, %v6393_v39  ;;  %v1794_v28 = vpop.f32.mrf.mxu1 }
 0x128   : > { %v6457_v17 = vadd.f32 %v1811_v16, %v1769_v15 }
 0x129   : > { %v6460_v61 = vadd.f32 %v1794_v28, %v1752_v27  ;;  %1942 = vmatmul.bf16.gmra.mxu0 %v6451_v22  ;;  %4982 = vmatmul.msk.bf16.vlgmr.msra.gmra.mxu2 %vm1710_vm0, %v6453_v23  ;;  %v404_v22 = vld [vmem:[%s6210_s10 + $0xa0] sm:$0xff] }
 0x12a   : > { %1985 = vmatmul.bf16.gmra.mxu1 %v6455_v25  ;;  %v4650_v25 = vld [vmem:[#allocation5 + $0x390] sm:$0xf0]  ;;  %v6475_v6 = vpack.c.bf16 %v411_v43, %v404_v22 }
 0x12c   : > { %2041 = vmatmul.bf16.vlgmr.msra.gmra.mxu3 %v6232_v63  ;;  %v1771_v10 = vpop.f32.mrf.mxu2  ;;  %v4653_v63 = vor.u32 %v5449_v47, %v4650_v25 }
 0x12d   : > { %v1772_v9 = vadd.f32 %v1771_v10, %v6393_v39 }
 0x12e   : > { %v1753_v16 = vpop.f32.mrf.mxu0  ;;  %2165 = vmatpush.bf16.msrb.mxu2 %v4653_v63 }
 0x12f   : > { %v1814_v15 = vpop.f32.mrf.mxu3  ;;  %v1754_v27 = vadd.f32 %v1753_v16, %v6393_v39  ;;  %v1796_v28 = vpop.f32.mrf.mxu1 }
 0x130   : > { %v6468_v24 = vadd.f32 %v1814_v15, %v1772_v9  ;;  %v5481_v15 = vld [vmem:[#allocation5 + $0x484] sm:$0xf] }
 0x131   : > { %v6471_v38 = vadd.f32 %v1796_v28, %v1754_v27  ;;  %v4781_v16 = vor.u32 %v5481_v15, %v4778_v45 }
 0x133   : > { %2208 = vmatpush.bf16.msrb.mxu3 %v4781_v16 }
 0x134   : > { %v1773_v60 = vpop.f32.mrf.mxu2 }
 0x135   : > { %v5445_v60 = vld [vmem:[#allocation5 + $0x364] sm:$0xf] }
 0x136   : > { %v1756_v8 = vpop.f32.mrf.mxu0 }
 0x137   : > { %v1816_v46 = vpop.f32.mrf.mxu3  ;;  %v1757_v10 = vadd.f32 %v1756_v8, %v6393_v39  ;;  %v1799_v9 = vpop.f32.mrf.mxu1  ;;  %v5477_v8 = vld [vmem:[#allocation5 + $0x464] sm:$0xf] }
 0x138   : > { %v4634_v46 = vld [vmem:[#allocation5 + $0x370] sm:$0xf0] }
 0x139   : > { %v6478_v41 = vadd.f32 %v1799_v9, %v1757_v10  ;;  %4983 = vmatmul.msk.bf16.gmra.mxu2 %vm1710_vm0, %v6475_v6  ;;  %2084 = vmatmul.bf16.vlgmr.msra.gmra.mxu0 %v6236_v4  ;;  %v418_v10 = vld [vmem:[%s6210_s10 + $0x110] sm:$0xff]  ;;  %v425_v9 = vld [vmem:[%s6210_s10 + $0x148] sm:$0xff]  ;;  %v4637_v15 = vor.u32 %v5445_v60, %v4634_v46 }
 0x13a   : > { %2127 = vmatmul.bf16.vlgmr.msra.gmra.mxu1 %v6292_v19  ;;  %v6492_v4 = vpack.c.bf16 %v425_v9, %v418_v10  ;;  %v5441_v10 = vld [vmem:[#allocation5 + $0x344] sm:$0xf]  ;;  %v4618_v9 = vld [vmem:[#allocation5 + $0x350] sm:$0xf0] }
 0x13b   : > { %2166 = vmatpush.bf16.msrb.mxu2 %v4637_v15  ;;  %v5473_v15 = vld [vmem:[#allocation5 + $0x444] sm:$0xf] }
 0x13c   : > { %2046 = vmatmul.bf16.gmra.mxu3 %v6252_v58  ;;  %v1827_v63 = vpop.f32.mrf.mxu2  ;;  %v4762_v58 = vld [vmem:[#allocation5 + $0x470] sm:$0xf0] }
 0x13d   : > { %v1828_v43 = vadd.f32 %v1827_v63, %v6404_v3  ;;  %v4765_v19 = vor.u32 %v5477_v8, %v4762_v58 }
 0x13e   : > { %v1758_v25 = vpop.f32.mrf.mxu0 }
 0x13f   : > { %v1870_v22 = vpop.f32.mrf.mxu3  ;;  %v1759_v27 = vadd.f32 %v1758_v25, %v6393_v39  ;;  %v1801_v28 = vpop.f32.mrf.mxu1  ;;  %2209 = vmatpush.bf16.msrb.mxu3 %v4765_v19 }
 0x140   : > { %v1871_v45 = vadd.f32 %v1870_v22, %v1828_v43 }
 0x141   : > { %v6487_v47 = vadd.f32 %v1801_v28, %v1759_v27 }
 0x144   : > { %v1829_v16 = vpop.f32.mrf.mxu2 }
 0x145   : > { %v1830_v3 = vadd.f32 %v1829_v16, %v6414_v7  ;;  %v432_v16 = vld [vmem:[%s6210_s10 + $0x180] sm:$0xff] }
 0x146   : > { %v1913_v39 = vpop.f32.mrf.mxu0 }
 0x147   : > { %v1872_v63 = vpop.f32.mrf.mxu3  ;;  %v1914_v22 = vadd.f32 %v1913_v39, %v1871_v45  ;;  %v1956_v25 = vpop.f32.mrf.mxu1  ;;  %v4746_v39 = vld [vmem:[#allocation5 + $0x450] sm:$0xf0] }
 0x148   : > { %v1873_v43 = vadd.f32 %v1872_v63, %v1830_v3  ;;  %v439_v3 = vld [vmem:[%s6210_s10 + $0x1b8] sm:$0xff]  ;;  %v4621_v63 = vor.u32 %v5441_v10, %v4618_v9 }
 0x149   : > { %v6494_v27 = vadd.f32 %v1956_v25, %v1914_v22  ;;  %4984 = vmatmul.msk.bf16.gmra.mxu2 %vm1710_vm0, %v6492_v4  ;;  %2089 = vmatmul.bf16.gmra.mxu0 %v6256_v1  ;;  %v4749_v22 = vor.u32 %v5473_v15, %v4746_v39 }
 0x14a   : > { %2132 = vmatmul.bf16.gmra.mxu1 %v6310_v33  ;;  %2167 = vmatpush.bf16.msrb.mxu2 %v4621_v63 }
 0x14b   : > { %2210 = vmatpush.bf16.msrb.mxu3 %v4749_v22  ;;  %v5469_v22 = vld [vmem:[#allocation5 + $0x424] sm:$0xf] }
 0x14c   : > { %2051 = vmatmul.bf16.gmra.mxu3 %v6270_v54  ;;  %v1832_v58 = vpop.f32.mrf.mxu2 }
 0x14d   : > { %v1833_v19 = vadd.f32 %v1832_v58, %v6434_v26  ;;  %v6507_v58 = vpack.c.bf16 %v439_v3, %v432_v16  ;;  %v5437_v16 = vld [vmem:[#allocation5 + $0x324] sm:$0xf]  ;;  %v4602_v3 = vld [vmem:[#allocation5 + $0x330] sm:$0xf0] }
 0x14e   : > { %v1915_v28 = vpop.f32.mrf.mxu0  ;;  %v4605_v63 = vor.u32 %v5437_v16, %v4602_v3  ;;  %v5525_v16 = vld [vmem:[#allocation5 + $0x5e4] sm:$0xf] }
 0x14f   : > { %v1875_v7 = vpop.f32.mrf.mxu3  ;;  %v1916_v60 = vadd.f32 %v1915_v28, %v1873_v43  ;;  %v1958_v46 = vpop.f32.mrf.mxu1  ;;  %7414 = vst [vmem:[#allocation44_spill] sm:$0xff] %v6507_v58 }
 0x150   : > { %v1876_v45 = vadd.f32 %v1875_v7, %v1833_v19  ;;  %2168 = vmatpush.bf16.msrb.mxu2 %v4605_v63  ;;  %v4586_v63 = vld [vmem:[#allocation5 + $0x310] sm:$0xf0] }
 0x151   : > { %v6502_v8 = vadd.f32 %v1958_v46, %v1916_v60 }
 0x154   : > { %v1834_v25 = vpop.f32.mrf.mxu2 }
 0x155   : > { %v1835_v33 = vadd.f32 %v1834_v25, %v6444_v52  ;;  %v4730_v25 = vld [vmem:[#allocation5 + $0x430] sm:$0xf0] }
 0x156   : > { %v1918_v43 = vpop.f32.mrf.mxu0 }
 0x157   : > { %v1877_v26 = vpop.f32.mrf.mxu3  ;;  %v1919_v7 = vadd.f32 %v1918_v43, %v1876_v45  ;;  %v1961_v28 = vpop.f32.mrf.mxu1  ;;  %v453_v43 = vld [vmem:[%s6210_s10 + $0x228] sm:$0xff] }
 0x158   : > { %v1878_v19 = vadd.f32 %v1877_v26, %v1835_v33  ;;  %v446_v26 = vld [vmem:[%s6210_s10 + $0x1f0] sm:$0xff] }
 0x159   : > { %v6509_v60 = vadd.f32 %v1961_v28, %v1919_v7  ;;  %4985 = vmatmul.msk.bf16.gmra.mxu2 %vm1710_vm0, %v6507_v58  ;;  %2094 = vmatmul.bf16.gmra.mxu0 %v6274_v56  ;;  %v4733_v7 = vor.u32 %v5469_v22, %v4730_v25  ;;  %v5521_v25 = vld [vmem:[#allocation5 + $0x5c4] sm:$0xf] }
 0x15a   : > { %2137 = vmatmul.bf16.gmra.mxu1 %v6330_v48  ;;  %v6522_v48 = vpack.c.bf16 %v453_v43, %v446_v26  ;;  %v4938_v26 = vld [vmem:[#allocation5 + $0x5d0] sm:$0xf0] }
 0x15b   : > { %2211 = vmatpush.bf16.msrb.mxu3 %v4733_v7 }
 0x15c   : > { %2056 = vmatmul.bf16.gmra.mxu3 %v6290_v18  ;;  %v1837_v52 = vpop.f32.mrf.mxu2  ;;  %7415 = vst [vmem:[#allocation45_spill] sm:$0xff] %v6522_v48 }
 0x15d   : > { %v1838_v46 = vadd.f32 %v1837_v52, %v6460_v61 }
 0x15e   : > { %v1920_v33 = vpop.f32.mrf.mxu0 }
 0x15f   : > { %v1880_v10 = vpop.f32.mrf.mxu3  ;;  %v1921_v9 = vadd.f32 %v1920_v33, %v1878_v19  ;;  %v1963_v15 = vpop.f32.mrf.mxu1 }
 0x160   : > { %v1881_v45 = vadd.f32 %v1880_v10, %v1838_v46 }
 0x161   : > { %v6517_v39 = vadd.f32 %v1963_v15, %v1921_v9  ;;  %v4954_v9 = vld [vmem:[#allocation5 + $0x5f0] sm:$0xf0] }
 0x162   : > { %v4957_v3 = vor.u32 %v5525_v16, %v4954_v9  ;;  %v4714_v16 = vld [vmem:[#allocation5 + $0x410] sm:$0xf0] }
 0x164   : > { %v1839_v28 = vpop.f32.mrf.mxu2  ;;  %2248 = vmatpush.bf16.msrb.mxu0 %v4957_v3  ;;  %v5517_v3 = vld [vmem:[#allocation5 + $0x5a4] sm:$0xf] }
 0x165   : > { %v1840_v61 = vadd.f32 %v1839_v28, %v6471_v38  ;;  %v5433_v38 = vld [vmem:[#allocation5 + $0x304] sm:$0xf]  ;;  %v4941_v28 = vor.u32 %v5521_v25, %v4938_v26  ;;  %v4906_v25 = vld [vmem:[#allocation5 + $0x590] sm:$0xf0] }
 0x166   : > { %v1923_v19 = vpop.f32.mrf.mxu0  ;;  %v4589_v22 = vor.u32 %v5433_v38, %v4586_v63  ;;  %v4922_v38 = vld [vmem:[#allocation5 + $0x5b0] sm:$0xf0] }
 0x167   : > { %v1882_v52 = vpop.f32.mrf.mxu3  ;;  %v1924_v10 = vadd.f32 %v1923_v19, %v1881_v45  ;;  %v1966_v33 = vpop.f32.mrf.mxu1 }
 0x168   : > { %v1883_v46 = vadd.f32 %v1882_v52, %v1840_v61  ;;  %2169 = vmatpush.bf16.msrb.mxu2 %v4589_v22  ;;  %2249 = vmatpush.bf16.msrb.mxu0 %v4941_v28  ;;  %v5513_v22 = vld [vmem:[#allocation5 + $0x584] sm:$0xf] }
 0x169   : > { %v6524_v15 = vadd.f32 %v1966_v33, %v1924_v10  ;;  %4986 = vmatmul.msk.bf16.gmra.mxu2 %vm1710_vm0, %v6522_v48  ;;  %2099 = vmatmul.bf16.gmra.mxu0 %v6294_v20  ;;  %v5465_v33 = vld [vmem:[#allocation5 + $0x404] sm:$0xf] }
 0x16a   : > { %2142 = vmatmul.bf16.gmra.mxu1 %v6350_v11  ;;  %v4717_v9 = vor.u32 %v5465_v33, %v4714_v16  ;;  %v4925_v11 = vor.u32 %v5517_v3, %v4922_v38  ;;  %v5400_v38 = vld [vmem:[#allocation5 + $0x1f4] sm:$0xf0] }
 0x16c   : > { %2061 = vmatmul.bf16.gmra.mxu3 %v6234_v0  ;;  %v1842_v45 = vpop.f32.mrf.mxu2  ;;  %v460_v0 = vld [vmem:[%s6210_s10 + $0x260] sm:$0xff]  ;;  %2250 = vmatpush.bf16.msrb.mxu0 %v4925_v11 }
 0x16d   : > { %v1843_v43 = vadd.f32 %v1842_v45, %v6478_v41  ;;  %v467_v41 = vld [vmem:[%s6210_s10 + $0x298] sm:$0xff]  ;;  %2212 = vmatpush.bf16.msrb.mxu3 %v4717_v9 }
 0x16e   : > { %v1925_v61 = vpop.f32.mrf.mxu0  ;;  %v4448_v9 = vld [vmem:[#allocation5 + $0x1e8] sm:$0xf] }
 0x16f   : > { %v1885_v7 = vpop.f32.mrf.mxu3  ;;  %v1926_v19 = vadd.f32 %v1925_v61, %v1883_v46  ;;  %v1968_v10 = vpop.f32.mrf.mxu1 }
 0x170   : > { %v1886_v52 = vadd.f32 %v1885_v7, %v1843_v43  ;;  %v6537_v43 = vpack.c.bf16 %v467_v41, %v460_v0  ;;  %v4909_v7 = vor.u32 %v5513_v22, %v4906_v25  ;;  %v4320_v0 = vld [vmem:[#allocation5 + $0xe8] sm:$0xf]  ;;  %v5505_v22 = vld [vmem:[#allocation5 + $0x544] sm:$0xf]  ;;  %v4874_v25 = vld [vmem:[#allocation5 + $0x550] sm:$0xf0] }
 0x171   : > { %v6532_v63 = vadd.f32 %v1968_v10, %v1926_v19  ;;  %v5509_v19 = vld [vmem:[#allocation5 + $0x564] sm:$0xf]  ;;  %v4890_v10 = vld [vmem:[#allocation5 + $0x570] sm:$0xf0] }
 0x172   : > { %2251 = vmatpush.bf16.msrb.mxu0 %v4909_v7  ;;  %v4893_v11 = vor.u32 %v5509_v19, %v4890_v10  ;;  %v4877_v7 = vor.u32 %v5505_v22, %v4874_v25  ;;  %v5529_v10 = vld [vmem:[#allocation5 + $0x604] sm:$0xf] }
 0x174   : > { %v1844_v45 = vpop.f32.mrf.mxu2 }
 0x175   : > { %v1845_v26 = vadd.f32 %v1844_v45, %v6487_v47  ;;  %v5368_v47 = vld [vmem:[#allocation5 + $0xf4] sm:$0xf0]  ;;  %v4449_v45 = vor.u32 %v5400_v38, %v4448_v9 }
 0x176   : > { %v1928_v28 = vpop.f32.mrf.mxu0  ;;  %2252 = vmatpush.bf16.msrb.mxu0 %v4893_v11 }
 0x177   : > { %v1887_v46 = vpop.f32.mrf.mxu3  ;;  %v1929_v33 = vadd.f32 %v1928_v28, %v1886_v52  ;;  %v1971_v16 = vpop.f32.mrf.mxu1  ;;  %v4321_v52 = vor.u32 %v5368_v47, %v4320_v0  ;;  %2377 = vmatpush.bf16.msra.mxu3 %v4449_v45  ;;  %v5501_v0 = vld [vmem:[#allocation5 + $0x524] sm:$0xf]  ;;  %v4858_v47 = vld [vmem:[#allocation5 + $0x530] sm:$0xf0] }
 0x178   : > { %v1888_v61 = vadd.f32 %v1887_v46, %v1845_v26  ;;  %v4861_v38 = vor.u32 %v5501_v0, %v4858_v47 }
 0x179   : > { %v6539_v3 = vadd.f32 %v1971_v16, %v1929_v33  ;;  %4987 = vmatmul.msk.bf16.gmra.mxu2 %vm1710_vm0, %v6537_v43  ;;  %2104 = vmatmul.bf16.gmra.mxu0 %v6238_v5 }
 0x17a   : > { %2147 = vmatmul.bf16.gmra.mxu1 %v6370_v30  ;;  %2334 = vmatpush.bf16.msra.mxu2 %v4321_v52  ;;  %v4970_v30 = vld [vmem:[#allocation5 + $0x610] sm:$0xf0]  ;;  %v5497_v52 = vld [vmem:[#allocation5 + $0x504] sm:$0xf] }
 0x17b   : > { %2253 = vmatpush.bf16.msrb.mxu0 %v4877_v7  ;;  %v4973_v11 = vor.u32 %v5529_v10, %v4970_v30  ;;  %v5396_v10 = vld [vmem:[#allocation5 + $0x1d4] sm:$0xf0] }
 0x17c   : > { %2066 = vmatmul.bf16.gmra.mxu3 %v6254_v59  ;;  %v1847_v41 = vpop.f32.mrf.mxu2  ;;  %v474_v59 = vld [vmem:[%s6210_s10 + $0x2d0] sm:$0xff] }
 0x17d   : > { %v1848_v26 = vadd.f32 %v1847_v41, %v6411_v44  ;;  %2298 = vmatpush.bf16.msrb.mxu1 %v4973_v11  ;;  %v4842_v41 = vld [vmem:[#allocation5 + $0x510] sm:$0xf0] }
 0x17e   : > { %v1930_v28 = vpop.f32.mrf.mxu0  ;;  %v4845_v25 = vor.u32 %v5497_v52, %v4842_v41 }
 0x17f   : > { %v1890_v46 = vpop.f32.mrf.mxu3  ;;  %v1931_v16 = vadd.f32 %v1930_v28, %v1888_v61  ;;  %v1973_v19 = vpop.f32.mrf.mxu1  ;;  %2254 = vmatpush.bf16.msrb.mxu0 %v4861_v38  ;;  %v6551_v61 = vpack.c.bf16 %v474_v59, %v474_v59 }
 0x180   : > { %v1891_v33 = vadd.f32 %v1890_v46, %v1848_v26 }
 0x181   : > { %v6547_v9 = vadd.f32 %v1973_v19, %v1931_v16  ;;  %7416 = vst [vmem:[#allocation46_spill] sm:$0xff] %v6551_v61  ;;  %v4304_v16 = vld [vmem:[#allocation5 + $0xc8] sm:$0xf]  ;;  %v5364_v19 = vld [vmem:[#allocation5 + $0xd4] sm:$0xf0] }
 0x182   : > { %v4305_v59 = vor.u32 %v5364_v19, %v4304_v16 }
 0x183   : > { %2255 = vmatpush.bf16.msrb.mxu0 %v4845_v25 }
 0x184   : > { %v1849_v44 = vpop.f32.mrf.mxu2  ;;  %2335 = vmatpush.bf16.msra.mxu2 %v4305_v59  ;;  %v5360_v59 = vld [vmem:[#allocation5 + $0xb4] sm:$0xf0] }
 0x185   : > { %v1850_v45 = vadd.f32 %v1849_v44, %v6431_v53  ;;  %v4432_v53 = vld [vmem:[#allocation5 + $0x1c8] sm:$0xf] }
 0x186   : > { %v1933_v26 = vpop.f32.mrf.mxu0  ;;  %v4433_v11 = vor.u32 %v5396_v10, %v4432_v53 }
 0x187   : > { %v1892_v22 = vpop.f32.mrf.mxu3  ;;  %v1934_v30 = vadd.f32 %v1933_v26, %v1891_v33  ;;  %v1976_v7 = vpop.f32.mrf.mxu1 }
 0x188   : > { %v1893_v46 = vadd.f32 %v1892_v22, %v1850_v45  ;;  %2378 = vmatpush.bf16.msra.mxu3 %v4433_v11 }
 0x189   : > { %v6553_v28 = vadd.f32 %v1976_v7, %v1934_v30  ;;  %4988 = vmatmul.msk.bf16.gmra.mxu2 %vm1710_vm0, %v6551_v61  ;;  %2109 = vmatmul.bf16.gmra.mxu0 %v6258_v2 }
 0x18a   : > { %2152 = vmatmul.bf16.gmra.mxu1 %v6395_v40 }
 0x18c   : > { %2071 = vmatmul.bf16.gmra.mxu3 %v6272_v55  ;;  %v1852_v33 = vpop.f32.mrf.mxu2 }
 0x18d   : > { %v1853_v0 = vadd.f32 %v1852_v33, %v6441_v29  ;;  %v4288_v29 = vld [vmem:[#allocation5 + $0xa8] sm:$0xf] }
 0x18e   : > { %v1935_v38 = vpop.f32.mrf.mxu0  ;;  %v4289_v10 = vor.u32 %v5360_v59, %v4288_v29 }
 0x18f   : > { %v1895_v47 = vpop.f32.mrf.mxu3  ;;  %v1936_v52 = vadd.f32 %v1935_v38, %v1893_v46  ;;  %v1978_v41 = vpop.f32.mrf.mxu1  ;;  %v4416_v46 = vld [vmem:[#allocation5 + $0x1a8] sm:$0xf] }
 0x190   : > { %v1896_v44 = vadd.f32 %v1895_v47, %v1853_v0  ;;  %2336 = vmatpush.bf16.msra.mxu2 %v4289_v10  ;;  %v4400_v10 = vld [vmem:[#allocation5 + $0x188] sm:$0xf] }
 0x191   : > { %v6561_v45 = vadd.f32 %v1978_v41, %v1936_v52 }
 0x194   : > { %v1854_v22 = vpop.f32.mrf.mxu2 }
 0x195   : > { %v1855_v25 = vadd.f32 %v1854_v22, %v6457_v17  ;;  %v5392_v17 = vld [vmem:[#allocation5 + $0x1b4] sm:$0xf0] }
 0x196   : > { %v1938_v30 = vpop.f32.mrf.mxu0  ;;  %v4417_v11 = vor.u32 %v5392_v17, %v4416_v46  ;;  %v5388_v17 = vld [vmem:[#allocation5 + $0x194] sm:$0xf0] }
 0x197   : > { %v1897_v26 = vpop.f32.mrf.mxu3  ;;  %v1939_v16 = vadd.f32 %v1938_v30, %v1896_v44  ;;  %v1981_v19 = vpop.f32.mrf.mxu1 }
 0x198   : > { %v1898_v7 = vadd.f32 %v1897_v26, %v1855_v25  ;;  %2379 = vmatpush.bf16.msra.mxu3 %v4417_v11  ;;  %v4272_v25 = vld [vmem:[#allocation5 + $0x88] sm:$0xf]  ;;  %v5356_v26 = vld [vmem:[#allocation5 + $0x94] sm:$0xf0] }
 0x199   : > { %v6564_v53 = vadd.f32 %v1981_v19, %v1939_v16  ;;  %2114 = vmatmul.bf16.gmra.mxu0 %v6276_v57  ;;  %2170 = vmatmul.bf16.vlgmr.msrb.gmra.mxu2 %v6296_v21  ;;  %v4273_v30 = vor.u32 %v5356_v26, %v4272_v25  ;;  %v4384_v25 = vld [vmem:[#allocation5 + $0x168] sm:$0xf] }
 0x19a   : > { %2157 = vmatmul.bf16.gmra.mxu1 %v6423_v42 }
 0x19b   : > { %2337 = vmatpush.bf16.msra.mxu2 %v4273_v30  ;;  %v5384_v30 = vld [vmem:[#allocation5 + $0x174] sm:$0xf0] }
 0x19c   : > { %2213 = vmatmul.bf16.vlgmr.msrb.gmra.mxu3 %v6312_v34  ;;  %v1857_v33 = vpop.f32.mrf.mxu2 }
 0x19d   : > { %v1858_v0 = vadd.f32 %v1857_v33, %v6468_v24  ;;  %v4401_v24 = vor.u32 %v5388_v17, %v4400_v10 }
 0x19e   : > { %v1940_v38 = vpop.f32.mrf.mxu0 }
 0x19f   : > { %v1900_v47 = vpop.f32.mrf.mxu3  ;;  %v1941_v52 = vadd.f32 %v1940_v38, %v1898_v7  ;;  %v1983_v41 = vpop.f32.mrf.mxu1  ;;  %2380 = vmatpush.bf16.msra.mxu3 %v4401_v24 }
 0x1a0   : > { %v1901_v44 = vadd.f32 %v1900_v47, %v1858_v0 }
 0x1a1   : > { %v6571_v22 = vadd.f32 %v1983_v41, %v1941_v52  ;;  %v4256_v52 = vld [vmem:[#allocation5 + $0x68] sm:$0xf]  ;;  %v5352_v41 = vld [vmem:[#allocation5 + $0x74] sm:$0xf0] }
 0x1a2   : > { %v4257_v26 = vor.u32 %v5352_v41, %v4256_v52 }
 0x1a4   : > { %v1859_v16 = vpop.f32.mrf.mxu2  ;;  %2338 = vmatpush.bf16.msra.mxu2 %v4257_v26 }
 0x1a5   : > { %v4385_v16 = vor.u32 %v5384_v30, %v4384_v25  ;;  %v4240_v30 = vld [vmem:[#allocation5 + $0x48] sm:$0xf] }
 0x1a6   : > { %v1943_v29 = vpop.f32.mrf.mxu0 }
 0x1a7   : > { %v1902_v19 = vpop.f32.mrf.mxu3  ;;  %v1944_v59 = vadd.f32 %v1943_v29, %v1901_v44  ;;  %v1986_v46 = vpop.f32.mrf.mxu1  ;;  %v6582_v44 = vperm.slane %v6382_v62, 1  ;;  %2381 = vmatpush.bf16.msra.mxu3 %v4385_v16  ;;  %v5348_v16 = vld [vmem:[#allocation5 + $0x54] sm:$0xf0] }
 0x1a9   : > { %v6573_v33 = vadd.f32 %v1986_v46, %v1944_v59  ;;  %2175 = vmatmul.bf16.gmra.mxu2 %v6314_v35  ;;  %2256 = vmatmul.bf16.vlgmr.msrb.gmra.mxu0 %v6316_v36 }
 0x1aa   : > { %4989 = vmatmul.msk.bf16.vlgmr.msrb.gmra.mxu1 %vm1710_vm0, %v6453_v23 }
 0x1ac   : > { %2218 = vmatmul.bf16.gmra.mxu3 %v6332_v49  ;;  %v1999_v7 = vpop.f32.mrf.mxu2 }
 0x1ad   : > { %v2000_v11 = vadd.f32 %v1999_v7, %v6494_v27 }
 0x1ae   : > { %v1945_v47 = vpop.f32.mrf.mxu0 }
 0x1af   : > { %v2042_v0 = vpop.f32.mrf.mxu3  ;;  %v1988_v38 = vpop.f32.mrf.mxu1  ;;  %v2936_v10 = vmax.f32 %v2000_v11, 0.0 }
 0x1b0   : > { %v2043_v29 = vadd.f32 %v2042_v0, %v6582_v44 }
 0x1b4   : > { %v2001_v19 = vpop.f32.mrf.mxu2 }
 0x1b5   : > { %v2002_v59 = vadd.f32 %v2001_v19, %v6502_v8  ;;  %v4368_v19 = vld [vmem:[#allocation5 + $0x148] sm:$0xf] }
 0x1b6   : > { %v2085_v27 = vpop.f32.mrf.mxu0 }
 0x1b7   : > { %v2044_v46 = vpop.f32.mrf.mxu3  ;;  %v2940_v17 = vmax.f32 %v2002_v59, 0.0  ;;  %v2086_v24 = vadd.f32 %v2085_v27, %v2043_v29  ;;  %v2128_v62 = vpop.f32.mrf.mxu1  ;;  %v4241_v29 = vor.u32 %v5348_v16, %v4240_v30  ;;  %v5380_v59 = vld [vmem:[#allocation5 + $0x154] sm:$0xf0] }
 0x1b8   : > { %v2045_v0 = vadd.f32 %v2044_v46, %v6582_v44  ;;  %v4369_v27 = vor.u32 %v5380_v59, %v4368_v19  ;;  %v4224_v59 = vld [vmem:[#allocation5 + $0x28] sm:$0xf] }
 0x1b9   : > { %v6586_v7 = vpack.c.bf16 %v2940_v17, %v2936_v10  ;;  %v6588_v47 = vadd.f32 %v2128_v62, %v2086_v24  ;;  %2180 = vmatmul.bf16.gmra.mxu2 %v6334_v50  ;;  %2261 = vmatmul.bf16.gmra.mxu0 %v6336_v51 }
 0x1ba   : > { %4990 = vmatmul.msk.bf16.gmra.mxu1 %vm1710_vm0, %v6475_v6  ;;  %2339 = vmatpush.bf16.msra.mxu2 %v4241_v29 }
 0x1bb   : > { %7417 = vst [vmem:[#allocation47_spill] sm:$0xff] %v6586_v7  ;;  %2382 = vmatpush.bf16.msra.mxu3 %v4369_v27  ;;  %v5344_v27 = vld [vmem:[#allocation5 + $0x34] sm:$0xf0]  ;;  %v4576_v7 = vld [vmem:[#allocation5 + $0x2e8] sm:$0xf] }
 0x1bc   : > { %2223 = vmatmul.bf16.gmra.mxu3 %v6352_v12  ;;  %v2004_v8 = vpop.f32.mrf.mxu2 }
 0x1bd   : > { %v2005_v11 = vadd.f32 %v2004_v8, %v6509_v60 }
 0x1be   : > { %v2087_v52 = vpop.f32.mrf.mxu0 }
 0x1bf   : > { %v2047_v38 = vpop.f32.mrf.mxu3  ;;  %v2088_v41 = vadd.f32 %v2087_v52, %v2045_v0  ;;  %v2130_v25 = vpop.f32.mrf.mxu1  ;;  %v2944_v62 = vmax.f32 %v2005_v11, 0.0 }
 0x1c0   : > { %v2048_v17 = vadd.f32 %v2047_v38, %v6582_v44 }
 0x1c1   : > { %v6597_v26 = vadd.f32 %v2130_v25, %v2088_v41 }
 0x1c4   : > { %v2006_v10 = vpop.f32.mrf.mxu2 }
 0x1c5   : > { %v2007_v46 = vadd.f32 %v2006_v10, %v6517_v39  ;;  %v4225_v10 = vor.u32 %v5344_v27, %v4224_v59  ;;  %v5432_v59 = vld [vmem:[#allocation5 + $0x2f4] sm:$0xf0] }
 0x1c6   : > { %v2090_v60 = vpop.f32.mrf.mxu0  ;;  %v4577_v27 = vor.u32 %v5432_v59, %v4576_v7 }
 0x1c7   : > { %v2049_v24 = vpop.f32.mrf.mxu3  ;;  %v2948_v8 = vmax.f32 %v2007_v46, 0.0  ;;  %v2091_v0 = vadd.f32 %v2090_v60, %v2048_v17  ;;  %v2133_v52 = vpop.f32.mrf.mxu1  ;;  %v4352_v46 = vld [vmem:[#allocation5 + $0x128] sm:$0xf]  ;;  %v5376_v60 = vld [vmem:[#allocation5 + $0x134] sm:$0xf0]  ;;  %2340 = vmatpush.bf16.msra.mxu2 %v4225_v10 }
 0x1c8   : > { %v2050_v38 = vadd.f32 %v2049_v24, %v6582_v44  ;;  %v5464_v10 = vld [vmem:[#allocation5 + $0x3f4] sm:$0xf0]  ;;  %2420 = vmatpush.bf16.msra.mxu0 %v4577_v27 }
 0x1c9   : > { %v6601_v41 = vadd.f32 %v2133_v52, %v2091_v0  ;;  %2185 = vmatmul.bf16.gmra.mxu2 %v6354_v13  ;;  %2266 = vmatmul.bf16.gmra.mxu0 %v6356_v14  ;;  %v6605_v25 = vpack.c.bf16 %v2948_v8, %v2944_v62  ;;  %v4353_v62 = vor.u32 %v5376_v60, %v4352_v46  ;;  %v4208_v46 = vld [vmem:[#allocation5 + $0x8] sm:$0xf]  ;;  %v5340_v60 = vld [vmem:[#allocation5 + $0x14] sm:$0xf0] }
 0x1ca   : > { %4991 = vmatmul.msk.bf16.gmra.mxu1 %vm1710_vm0, %v6492_v4  ;;  %v5372_v27 = vld [vmem:[#allocation5 + $0x114] sm:$0xf0] }
 0x1cb   : > { %7418 = vst [vmem:[#allocation48_spill] sm:$0xff] %v6605_v25  ;;  %2383 = vmatpush.bf16.msra.mxu3 %v4353_v62  ;;  %v4209_v62 = vor.u32 %v5340_v60, %v4208_v46  ;;  %v5424_v60 = vld [vmem:[#allocation5 + $0x2b4] sm:$0xf0] }
 0x1cc   : > { %2228 = vmatmul.bf16.gmra.mxu3 %v6372_v31  ;;  %v2009_v39 = vpop.f32.mrf.mxu2 }
 0x1cd   : > { %v2010_v11 = vadd.f32 %v2009_v39, %v6524_v15  ;;  %2341 = vmatpush.bf16.msra.mxu2 %v4209_v62 }
 0x1ce   : > { %v2092_v16 = vpop.f32.mrf.mxu0 }
 0x1cf   : > { %v2052_v30 = vpop.f32.mrf.mxu3  ;;  %v2093_v19 = vadd.f32 %v2092_v16, %v2050_v38  ;;  %v2135_v29 = vpop.f32.mrf.mxu1  ;;  %v2952_v39 = vmax.f32 %v2010_v11, 0.0 }
 0x1d0   : > { %v2053_v0 = vadd.f32 %v2052_v30, %v6582_v44 }
 0x1d1   : > { %v6612_v17 = vadd.f32 %v2135_v29, %v2093_v19  ;;  %v4704_v19 = vld [vmem:[#allocation5 + $0x3e8] sm:$0xf] }
 0x1d2   : > { %v4705_v11 = vor.u32 %v5464_v10, %v4704_v19 }
 0x1d4   : > { %v2011_v8 = vpop.f32.mrf.mxu2  ;;  %2463 = vmatpush.bf16.msra.mxu1 %v4705_v11  ;;  %v4544_v11 = vld [vmem:[#allocation5 + $0x2a8] sm:$0xf] }
 0x1d5   : > { %v2012_v24 = vadd.f32 %v2011_v8, %v6532_v63  ;;  %v7420_v63 = vld [vmem:[#allocation36_spill] sm:$0xff]  ;;  %v4560_v8 = vld [vmem:[#allocation5 + $0x2c8] sm:$0xf] }
 0x1d6   : > { %v2095_v52 = vpop.f32.mrf.mxu0 }
 0x1d7   : > { %v2054_v15 = vpop.f32.mrf.mxu3  ;;  %v2956_v38 = vmax.f32 %v2012_v24, 0.0  ;;  %v2096_v16 = vadd.f32 %v2095_v52, %v2053_v0  ;;  %v2138_v25 = vpop.f32.mrf.mxu1  ;;  %v5428_v0 = vld [vmem:[#allocation5 + $0x2d4] sm:$0xf0]  ;;  %v4688_v24 = vld [vmem:[#allocation5 + $0x3c8] sm:$0xf] }
 0x1d8   : > { %v2055_v7 = vadd.f32 %v2054_v15, %v6582_v44  ;;  %v4545_v15 = vor.u32 %v5424_v60, %v4544_v11  ;;  %v5416_v60 = vld [vmem:[#allocation5 + $0x274] sm:$0xf0] }
 0x1d9   : > { %v6616_v29 = vadd.f32 %v2138_v25, %v2096_v16  ;;  %2190 = vmatmul.bf16.gmra.mxu2 %v6374_v32  ;;  %2271 = vmatmul.bf16.gmra.mxu0 %v6376_v37  ;;  %v6620_v30 = vpack.c.bf16 %v2956_v38, %v2952_v39  ;;  %v4561_v38 = vor.u32 %v5428_v0, %v4560_v8  ;;  %v5460_v16 = vld [vmem:[#allocation5 + $0x3d4] sm:$0xf0]  ;;  %v4528_v8 = vld [vmem:[#allocation5 + $0x288] sm:$0xf] }
 0x1da   : > { %4992 = vmatmul.msk.bf16.gmra.mxu1 %vm1710_vm0, %v6507_v58  ;;  %v4336_v58 = vld [vmem:[#allocation5 + $0x108] sm:$0xf]  ;;  %v5420_v0 = vld [vmem:[#allocation5 + $0x294] sm:$0xf0] }
 0x1db   : > { %7419 = vst [vmem:[#allocation49_spill] sm:$0xff] %v6620_v30  ;;  %v4689_v30 = vor.u32 %v5460_v16, %v4688_v24  ;;  %2421 = vmatpush.bf16.msra.mxu0 %v4561_v38  ;;  %v4337_v46 = vor.u32 %v5372_v27, %v4336_v58  ;;  %v4656_v24 = vld [vmem:[#allocation5 + $0x388] sm:$0xf]  ;;  %v4529_v38 = vor.u32 %v5420_v0, %v4528_v8  ;;  %v5452_v16 = vld [vmem:[#allocation5 + $0x394] sm:$0xf0] }
 0x1dc   : > { %2233 = vmatmul.bf16.gmra.mxu3 %v7420_v63  ;;  %v2014_v25 = vpop.f32.mrf.mxu2  ;;  %v4672_v63 = vld [vmem:[#allocation5 + $0x3a8] sm:$0xf] }
 0x1dd   : > { %v2015_v52 = vadd.f32 %v2014_v25, %v6539_v3  ;;  %2464 = vmatpush.bf16.msra.mxu1 %v4689_v30  ;;  %v5456_v3 = vld [vmem:[#allocation5 + $0x3b4] sm:$0xf0]  ;;  %2384 = vmatpush.bf16.msra.mxu3 %v4337_v46  ;;  %v7424_v0 = vld [vmem:[#allocation39_spill] sm:$0xff] }
 0x1de   : > { %v2097_v59 = vpop.f32.mrf.mxu0  ;;  %v4673_v62 = vor.u32 %v5456_v3, %v4672_v63  ;;  %v4512_v63 = vld [vmem:[#allocation5 + $0x268] sm:$0xf] }
 0x1df   : > { %v2057_v39 = vpop.f32.mrf.mxu3  ;;  %v2098_v19 = vadd.f32 %v2097_v59, %v2055_v7  ;;  %v2140_v10 = vpop.f32.mrf.mxu1  ;;  %2422 = vmatpush.bf16.msra.mxu0 %v4545_v15  ;;  %v4640_v15 = vld [vmem:[#allocation5 + $0x368] sm:$0xf] }
 0x1e0   : > { %v2058_v7 = vadd.f32 %v2057_v39, %v6582_v44  ;;  %v7422_v39 = vld [vmem:[#allocation38_spill] sm:$0xff] }
 0x1e1   : > { %v6627_v37 = vadd.f32 %v2140_v10, %v2098_v19  ;;  %2465 = vmatpush.bf16.msra.mxu1 %v4673_v62  ;;  %v4657_v19 = vor.u32 %v5452_v16, %v4656_v24  ;;  %v2960_v10 = vmax.f32 %v2015_v52, 0.0  ;;  %v7421_v62 = vld [vmem:[#allocation37_spill] sm:$0xff]  ;;  %v4832_v52 = vld [vmem:[#allocation5 + $0x4e8] sm:$0xf] }
 0x1e2   : > { %v5496_v24 = vld [vmem:[#allocation5 + $0x4f4] sm:$0xf0] }
 0x1e3   : > { %2423 = vmatpush.bf16.msra.mxu0 %v4529_v38  ;;  %v4833_v38 = vor.u32 %v5496_v24, %v4832_v52  ;;  %v5528_v16 = vld [vmem:[#allocation5 + $0x5f4] sm:$0xf0]  ;;  %v4480_v52 = vld [vmem:[#allocation5 + $0x228] sm:$0xf] }
 0x1e4   : > { %v2016_v25 = vpop.f32.mrf.mxu2  ;;  %v5408_v24 = vld [vmem:[#allocation5 + $0x234] sm:$0xf0] }
 0x1e5   : > { %v2017_v58 = vadd.f32 %v2016_v25, %v6547_v9  ;;  %2466 = vmatpush.bf16.msra.mxu1 %v4657_v19  ;;  %v4513_v9 = vor.u32 %v5416_v60, %v4512_v63  ;;  %v5448_v25 = vld [vmem:[#allocation5 + $0x374] sm:$0xf0]  ;;  %v4624_v63 = vld [vmem:[#allocation5 + $0x348] sm:$0xf]  ;;  %2506 = vmatpush.bf16.msrb.mxu2 %v4833_v38 }
 0x1e6   : > { %v2100_v59 = vpop.f32.mrf.mxu0  ;;  %v4464_v38 = vld [vmem:[#allocation5 + $0x208] sm:$0xf] }
 0x1e7   : > { %v2059_v30 = vpop.f32.mrf.mxu3  ;;  %v2964_v27 = vmax.f32 %v2017_v58, 0.0  ;;  %v2101_v11 = vadd.f32 %v2100_v59, %v2058_v7  ;;  %v2143_v46 = vpop.f32.mrf.mxu1  ;;  %v4641_v7 = vor.u32 %v5448_v25, %v4640_v15  ;;  %v4960_v58 = vld [vmem:[#allocation5 + $0x5e8] sm:$0xf]  ;;  %2424 = vmatpush.bf16.msra.mxu0 %v4513_v9 }
 0x1e8   : > { %v4961_v19 = vor.u32 %v5528_v16, %v4960_v58  ;;  %v4481_v16 = vor.u32 %v5408_v24, %v4480_v52 }
 0x1e9   : > { %v6631_v3 = vadd.f32 %v2143_v46, %v2101_v11  ;;  %2195 = vmatmul.bf16.gmra.mxu2 %v7421_v62  ;;  %2276 = vmatmul.bf16.gmra.mxu0 %v7422_v39  ;;  %v6635_v8 = vpack.c.bf16 %v2964_v27, %v2960_v10  ;;  %v4496_v11 = vld [vmem:[#allocation5 + $0x248] sm:$0xf]  ;;  %v5412_v46 = vld [vmem:[#allocation5 + $0x254] sm:$0xf0]  ;;  %v2060_v10 = vadd.f32 %v2059_v30, %v6582_v44 }
 0x1ea   : > { %4993 = vmatmul.msk.bf16.gmra.mxu1 %vm1710_vm0, %v6522_v48  ;;  %v5444_v48 = vld [vmem:[#allocation5 + $0x354] sm:$0xf0]  ;;  %2549 = vmatpush.bf16.msrb.mxu3 %v4961_v19 }
 0x1eb   : > { %7423 = vst [vmem:[#allocation37_spill] sm:$0xff] %v6635_v8  ;;  %2467 = vmatpush.bf16.msra.mxu1 %v4641_v7  ;;  %v4497_v8 = vor.u32 %v5412_v46, %v4496_v11  ;;  %v4625_v15 = vor.u32 %v5444_v48, %v4624_v63  ;;  %v4608_v7 = vld [vmem:[#allocation5 + $0x328] sm:$0xf]  ;;  %v5440_v30 = vld [vmem:[#allocation5 + $0x334] sm:$0xf0] }
 0x1ec   : > { %2238 = vmatmul.bf16.gmra.mxu3 %v7424_v0  ;;  %v2019_v59 = vpop.f32.mrf.mxu2  ;;  %v4609_v39 = vor.u32 %v5440_v30, %v4608_v7  ;;  %v4592_v11 = vld [vmem:[#allocation5 + $0x308] sm:$0xf]  ;;  %v5436_v46 = vld [vmem:[#allocation5 + $0x314] sm:$0xf0]  ;;  %v7428_v30 = vld [vmem:[#allocation42_spill] sm:$0xff] }
 0x1ed   : > { %v2020_v27 = vadd.f32 %v2019_v59, %v6553_v28  ;;  %2425 = vmatpush.bf16.msra.mxu0 %v4497_v8  ;;  %v5404_v59 = vld [vmem:[#allocation5 + $0x214] sm:$0xf0] }
 0x1ee   : > { %v2102_v0 = vpop.f32.mrf.mxu0  ;;  %v4465_v19 = vor.u32 %v5404_v59, %v4464_v38  ;;  %v7426_v7 = vld [vmem:[#allocation41_spill] sm:$0xff] }
 0x1ef   : > { %v2062_v60 = vpop.f32.mrf.mxu3  ;;  %v2103_v25 = vadd.f32 %v2102_v0, %v2060_v10  ;;  %v2145_v9 = vpop.f32.mrf.mxu1  ;;  %2468 = vmatpush.bf16.msra.mxu1 %v4625_v15  ;;  %v4593_v10 = vor.u32 %v5436_v46, %v4592_v11  ;;  %v2968_v15 = vmax.f32 %v2020_v27, 0.0  ;;  %v5524_v38 = vld [vmem:[#allocation5 + $0x5d4] sm:$0xf0] }
 0x1f0   : > { %v2063_v48 = vadd.f32 %v2062_v60, %v6582_v44  ;;  %v4816_v60 = vld [vmem:[#allocation5 + $0x4c8] sm:$0xf] }
 0x1f1   : > { %v6642_v58 = vadd.f32 %v2145_v9, %v2103_v25  ;;  %2426 = vmatpush.bf16.msra.mxu0 %v4481_v16  ;;  %v5492_v16 = vld [vmem:[#allocation5 + $0x4d4] sm:$0xf0] }
 0x1f2   : > { %v4817_v27 = vor.u32 %v5492_v16, %v4816_v60 }
 0x1f3   : > { %2469 = vmatpush.bf16.msra.mxu1 %v4609_v39  ;;  %v7425_v39 = vld [vmem:[#allocation40_spill] sm:$0xff] }
 0x1f4   : > { %v2021_v28 = vpop.f32.mrf.mxu2  ;;  %2507 = vmatpush.bf16.msrb.mxu2 %v4817_v27 }
 0x1f5   : > { %v2022_v0 = vadd.f32 %v2021_v28, %v6561_v45  ;;  %2427 = vmatpush.bf16.msra.mxu0 %v4465_v19  ;;  %v4944_v28 = vld [vmem:[#allocation5 + $0x5c8] sm:$0xf] }
 0x1f6   : > { %v2105_v63 = vpop.f32.mrf.mxu0  ;;  %v4945_v59 = vor.u32 %v5524_v38, %v4944_v28 }
 0x1f7   : > { %v2064_v8 = vpop.f32.mrf.mxu3  ;;  %v2972_v25 = vmax.f32 %v2022_v0, 0.0  ;;  %v2106_v9 = vadd.f32 %v2105_v63, %v2063_v48  ;;  %v2148_v52 = vpop.f32.mrf.mxu1  ;;  %2470 = vmatpush.bf16.msra.mxu1 %v4593_v10 }
 0x1f8   : > { %v2065_v48 = vadd.f32 %v2064_v8, %v6582_v44  ;;  %2550 = vmatpush.bf16.msrb.mxu3 %v4945_v59 }
 0x1f9   : > { %v6646_v24 = vadd.f32 %v2148_v52, %v2106_v9  ;;  %2200 = vmatmul.bf16.gmra.mxu2 %v7425_v39  ;;  %2281 = vmatmul.bf16.gmra.mxu0 %v7426_v7  ;;  %v6650_v45 = vpack.c.bf16 %v2972_v25, %v2968_v15 }
 0x1fa   : > { %4994 = vmatmul.msk.bf16.gmra.mxu1 %vm1710_vm0, %v6537_v43 }
 0x1fb   : > { %7427 = vst [vmem:[#allocation40_spill] sm:$0xff] %v6650_v45  ;;  %v4800_v45 = vld [vmem:[#allocation5 + $0x4a8] sm:$0xf] }
 0x1fc   : > { %2243 = vmatmul.bf16.gmra.mxu3 %v7428_v30  ;;  %v2024_v11 = vpop.f32.mrf.mxu2 }
 0x1fd   : > { %v2025_v0 = vadd.f32 %v2024_v11, %v6564_v53  ;;  %v5488_v53 = vld [vmem:[#allocation5 + $0x4b4] sm:$0xf0] }
 0x1fe   : > { %v2107_v46 = vpop.f32.mrf.mxu0  ;;  %v4801_v11 = vor.u32 %v5488_v53, %v4800_v45 }
 0x1ff   : > { %v2067_v19 = vpop.f32.mrf.mxu3  ;;  %v2108_v63 = vadd.f32 %v2107_v46, %v2065_v48  ;;  %v2150_v10 = vpop.f32.mrf.mxu1  ;;  %v2976_v28 = vmax.f32 %v2025_v0, 0.0  ;;  %v7429_v48 = vld [vmem:[#allocation43_spill] sm:$0xff]  ;;  %v7430_v46 = vld [vmem:[#allocation20_spill] sm:$0xff] }
 0x200   : > { %v2068_v9 = vadd.f32 %v2067_v19, %v6582_v44  ;;  %2508 = vmatpush.bf16.msrb.mxu2 %v4801_v11  ;;  %v4928_v0 = vld [vmem:[#allocation5 + $0x5a8] sm:$0xf]  ;;  %v5520_v19 = vld [vmem:[#allocation5 + $0x5b4] sm:$0xf0] }
 0x201   : > { %v6657_v15 = vadd.f32 %v2150_v10, %v2108_v63 }
 0x204   : > { %v2026_v25 = vpop.f32.mrf.mxu2 }
 0x205   : > { %v2027_v52 = vadd.f32 %v2026_v25, %v6571_v22  ;;  %v7432_v22 = vld [vmem:[#allocation22_spill] sm:$0xff]  ;;  %v4929_v25 = vor.u32 %v5520_v19, %v4928_v0 }
 0x206   : > { %v2110_v16 = vpop.f32.mrf.mxu0 }
 0x207   : > { %v2069_v60 = vpop.f32.mrf.mxu3  ;;  %v2980_v27 = vmax.f32 %v2027_v52, 0.0  ;;  %v2111_v38 = vadd.f32 %v2110_v16, %v2068_v9  ;;  %v2153_v8 = vpop.f32.mrf.mxu1  ;;  %2551 = vmatpush.bf16.msrb.mxu3 %v4929_v25  ;;  %v7434_v25 = vld [vmem:[#allocation23_spill] sm:$0xff] }
 0x208   : > { %v2070_v45 = vadd.f32 %v2069_v60, %v6582_v44 }
 0x209   : > { %v6661_v59 = vadd.f32 %v2153_v8, %v2111_v38  ;;  %2286 = vmatmul.bf16.gmra.mxu0 %v7429_v48  ;;  %2342 = vmatmul.bf16.vlgmr.msra.gmra.mxu2 %v7430_v46  ;;  %v6665_v63 = vpack.c.bf16 %v2980_v27, %v2976_v28  ;;  %v4912_v48 = vld [vmem:[#allocation5 + $0x588] sm:$0xf] }
 0x20a   : > { %4995 = vmatmul.msk.bf16.gmra.mxu1 %vm1710_vm0, %v6551_v61 }
 0x20b   : > { %7431 = vst [vmem:[#allocation42_spill] sm:$0xff] %v6665_v63  ;;  %v4784_v63 = vld [vmem:[#allocation5 + $0x488] sm:$0xf] }
 0x20c   : > { %2385 = vmatmul.bf16.vlgmr.msra.gmra.mxu3 %v7432_v22  ;;  %v2029_v10 = vpop.f32.mrf.mxu2  ;;  %v5484_v22 = vld [vmem:[#allocation5 + $0x494] sm:$0xf0] }
 0x20d   : > { %v6672_v9 = vadd.f32 %v2029_v10, %v6573_v33  ;;  %v4785_v0 = vor.u32 %v5484_v22, %v4784_v63  ;;  %v5516_v33 = vld [vmem:[#allocation5 + $0x594] sm:$0xf0] }
 0x20e   : > { %v2112_v16 = vpop.f32.mrf.mxu0  ;;  %v4913_v10 = vor.u32 %v5516_v33, %v4912_v48  ;;  %v5480_v48 = vld [vmem:[#allocation5 + $0x474] sm:$0xf0] }
 0x20f   : > { %7433 = vst [vmem:[#allocation20_spill] sm:$0xff] %v6672_v9  ;;  %v2072_v52 = vpop.f32.mrf.mxu3  ;;  %v2113_v28 = vadd.f32 %v2112_v16, %v2070_v45  ;;  %v2155_v27 = vpop.f32.mrf.mxu1  ;;  %2509 = vmatpush.bf16.msrb.mxu2 %v4785_v0  ;;  %v7435_v45 = vld [vmem:[#allocation27_spill] sm:$0xff] }
 0x210   : > { %v2073_v53 = vadd.f32 %v2072_v52, %v6582_v44  ;;  %2552 = vmatpush.bf16.msrb.mxu3 %v4913_v10 }
 0x211   : > { %v6674_v38 = vadd.f32 %v2155_v27, %v2113_v28  ;;  %v4768_v28 = vld [vmem:[#allocation5 + $0x468] sm:$0xf] }
 0x212   : > { %v4896_v27 = vld [vmem:[#allocation5 + $0x568] sm:$0xf] }
 0x214   : > { %v2031_v8 = vpop.f32.mrf.mxu2 }
 0x216   : > { %v2115_v61 = vpop.f32.mrf.mxu0 }
 0x217   : > { %v2074_v11 = vpop.f32.mrf.mxu3  ;;  %v2116_v19 = vadd.f32 %v2115_v61, %v2073_v53  ;;  %v2158_v60 = vpop.f32.mrf.mxu1  ;;  %v4769_v53 = vor.u32 %v5480_v48, %v4768_v28 }
 0x218   : > { %v5512_v11 = vld [vmem:[#allocation5 + $0x574] sm:$0xf0] }
 0x219   : > { %v6677_v9 = vadd.f32 %v2158_v60, %v2116_v19  ;;  %2347 = vmatmul.bf16.gmra.mxu2 %v7434_v25  ;;  %2428 = vmatmul.bf16.vlgmr.msra.gmra.mxu0 %v7435_v45  ;;  %v4897_v60 = vor.u32 %v5512_v11, %v4896_v27 }
 0x21a   : > { %2471 = vmatmul.bf16.vlgmr.msra.gmra.mxu1 %v6296_v21  ;;  %2510 = vmatpush.bf16.msrb.mxu2 %v4769_v53 }
 0x21b   : > { %2553 = vmatpush.bf16.msrb.mxu3 %v4897_v60 }
 0x21c   : > { %2390 = vmatmul.bf16.gmra.mxu3 %v6256_v1  ;;  %v2171_v44 = vpop.f32.mrf.mxu2 }
 0x21d   : > { %v2172_v63 = vadd.f32 %v2171_v44, %v6588_v47  ;;  %v7436_v44 = vld [vmem:[#allocation29_spill] sm:$0xff] }
 0x21e   : > { %v2117_v22 = vpop.f32.mrf.mxu0 }
 0x21f   : > { %v2214_v61 = vpop.f32.mrf.mxu3  ;;  %v2160_v16 = vpop.f32.mrf.mxu1 }
 0x220   : > { %v2215_v52 = vadd.f32 %v2214_v61, %v2172_v63 }
 0x224   : > { %v2173_v8 = vpop.f32.mrf.mxu2 }
 0x225   : > { %v2174_v0 = vadd.f32 %v2173_v8, %v6597_v26 }
 0x226   : > { %v2257_v33 = vpop.f32.mrf.mxu0 }
 0x227   : > { %v2216_v19 = vpop.f32.mrf.mxu3  ;;  %v2258_v21 = vadd.f32 %v2257_v33, %v2215_v52  ;;  %v2300_v1 = vpop.f32.mrf.mxu1 }
 0x228   : > { %v2217_v10 = vadd.f32 %v2216_v19, %v2174_v0  ;;  %v4880_v0 = vld [vmem:[#allocation5 + $0x548] sm:$0xf]  ;;  %v5508_v19 = vld [vmem:[#allocation5 + $0x554] sm:$0xf0] }
 0x229   : > { %v2301_v47 = vadd.f32 %v2300_v1, %v2258_v21  ;;  %2352 = vmatmul.bf16.gmra.mxu2 %v6270_v54  ;;  %2433 = vmatmul.bf16.gmra.mxu0 %v7436_v44  ;;  %v4752_v1 = vld [vmem:[#allocation5 + $0x448] sm:$0xf]  ;;  %v5476_v21 = vld [vmem:[#allocation5 + $0x454] sm:$0xf0] }
 0x22a   : > { %2476 = vmatmul.bf16.gmra.mxu1 %v6314_v35  ;;  %v4753_v11 = vor.u32 %v5476_v21, %v4752_v1  ;;  %v5472_v1 = vld [vmem:[#allocation5 + $0x434] sm:$0xf0] }
 0x22b   : > { %v2937_v27 = vmax.f32 %v2301_v47, 0.0 }
 0x22c   : > { %2395 = vmatmul.bf16.gmra.mxu3 %v6274_v56  ;;  %v2176_v63 = vpop.f32.mrf.mxu2  ;;  %2511 = vmatpush.bf16.msrb.mxu2 %v4753_v11 }
 0x22d   : > { %v2177_v26 = vadd.f32 %v2176_v63, %v6601_v41  ;;  %v4881_v41 = vor.u32 %v5508_v19, %v4880_v0  ;;  %v4864_v19 = vld [vmem:[#allocation5 + $0x528] sm:$0xf] }
 0x22e   : > { %v2259_v22 = vpop.f32.mrf.mxu0 }
 0x22f   : > { %v2219_v61 = vpop.f32.mrf.mxu3  ;;  %v2260_v28 = vadd.f32 %v2259_v22, %v2217_v10  ;;  %v2302_v48 = vpop.f32.mrf.mxu1  ;;  %2554 = vmatpush.bf16.msrb.mxu3 %v4881_v41  ;;  %v7438_v22 = vld [vmem:[#allocation31_spill] sm:$0xff] }
 0x230   : > { %v2220_v16 = vadd.f32 %v2219_v61, %v2177_v26 }
 0x231   : > { %v2303_v52 = vadd.f32 %v2302_v48, %v2260_v28 }
 0x233   : > { %v2941_v8 = vmax.f32 %v2303_v52, 0.0 }
 0x234   : > { %v2178_v53 = vpop.f32.mrf.mxu2 }
 0x235   : > { %v6690_v60 = vpack.c.bf16 %v2941_v8, %v2937_v27  ;;  %v2179_v33 = vadd.f32 %v2178_v53, %v6612_v17 }
 0x236   : > { %v2262_v63 = vpop.f32.mrf.mxu0 }
 0x237   : > { %7437 = vst [vmem:[#allocation23_spill] sm:$0xff] %v6690_v60  ;;  %v2221_v35 = vpop.f32.mrf.mxu3  ;;  %v2263_v10 = vadd.f32 %v2262_v63, %v2220_v16  ;;  %v2305_v61 = vpop.f32.mrf.mxu1  ;;  %v4736_v16 = vld [vmem:[#allocation5 + $0x428] sm:$0xf] }
 0x238   : > { %v2222_v26 = vadd.f32 %v2221_v35, %v2179_v33  ;;  %v4737_v21 = vor.u32 %v5472_v1, %v4736_v16  ;;  %v5504_v33 = vld [vmem:[#allocation5 + $0x534] sm:$0xf0]  ;;  %v4322_v16 = vld [vmem:[#allocation5 + $0xf8] sm:$0xf0] }
 0x239   : > { %v2306_v47 = vadd.f32 %v2305_v61, %v2263_v10  ;;  %2357 = vmatmul.bf16.gmra.mxu2 %v6290_v18  ;;  %2438 = vmatmul.bf16.gmra.mxu0 %v7438_v22  ;;  %v4865_v63 = vor.u32 %v5504_v33, %v4864_v19 }
 0x23a   : > { %2481 = vmatmul.bf16.gmra.mxu1 %v6334_v50  ;;  %2512 = vmatpush.bf16.msrb.mxu2 %v4737_v21  ;;  %v5468_v21 = vld [vmem:[#allocation5 + $0x414] sm:$0xf0] }
 0x23b   : > { %v2945_v11 = vmax.f32 %v2306_v47, 0.0  ;;  %2555 = vmatpush.bf16.msrb.mxu3 %v4865_v63  ;;  %v7441_v47 = vld [vmem:[#allocation32_spill] sm:$0xff] }
 0x23c   : > { %2400 = vmatmul.bf16.gmra.mxu3 %v6294_v20  ;;  %v2181_v28 = vpop.f32.mrf.mxu2 }
 0x23d   : > { %v2182_v17 = vadd.f32 %v2181_v28, %v6616_v29 }
 0x23e   : > { %v2264_v52 = vpop.f32.mrf.mxu0 }
 0x23f   : > { %v2224_v48 = vpop.f32.mrf.mxu3  ;;  %v2265_v8 = vadd.f32 %v2264_v52, %v2222_v26  ;;  %v2307_v35 = vpop.f32.mrf.mxu1  ;;  %v5366_v52 = vld [vmem:[#allocation5 + $0xec] sm:$0xf] }
 0x240   : > { %v2225_v27 = vadd.f32 %v2224_v48, %v2182_v17  ;;  %v4325_v1 = vor.u32 %v5366_v52, %v4322_v16  ;;  %v5358_v16 = vld [vmem:[#allocation5 + $0xac] sm:$0xf] }
 0x241   : > { %v2308_v53 = vadd.f32 %v2307_v35, %v2265_v8  ;;  %v7440_v35 = vld [vmem:[#allocation21_spill] sm:$0xff] }
 0x242   : > { %2635 = vmatpush.bf16.msrb.mxu1 %v4325_v1  ;;  %v4290_v1 = vld [vmem:[#allocation5 + $0xb8] sm:$0xf0] }
 0x243   : > { %v2949_v0 = vmax.f32 %v2308_v53, 0.0  ;;  %v4293_v60 = vor.u32 %v5358_v16, %v4290_v1 }
 0x244   : > { %v2183_v41 = vpop.f32.mrf.mxu2 }
 0x245   : > { %v2184_v10 = vadd.f32 %v2183_v41, %v6627_v37  ;;  %v6699_v29 = vpack.c.bf16 %v2949_v0, %v2945_v11  ;;  %v4720_v37 = vld [vmem:[#allocation5 + $0x408] sm:$0xf]  ;;  %v5362_v0 = vld [vmem:[#allocation5 + $0xcc] sm:$0xf] }
 0x246   : > { %v2267_v28 = vpop.f32.mrf.mxu0  ;;  %v4721_v11 = vor.u32 %v5468_v21, %v4720_v37 }
 0x247   : > { %v2226_v61 = vpop.f32.mrf.mxu3  ;;  %7439 = vst [vmem:[#allocation27_spill] sm:$0xff] %v6699_v29  ;;  %v2268_v17 = vadd.f32 %v2267_v28, %v2225_v27  ;;  %v2310_v48 = vpop.f32.mrf.mxu1  ;;  %v4306_v27 = vld [vmem:[#allocation5 + $0xd8] sm:$0xf0] }
 0x248   : > { %v2227_v26 = vadd.f32 %v2226_v61, %v2184_v10  ;;  %v4309_v41 = vor.u32 %v5362_v0, %v4306_v27  ;;  %2513 = vmatpush.bf16.msrb.mxu2 %v4721_v11  ;;  %v4274_v0 = vld [vmem:[#allocation5 + $0x98] sm:$0xf0] }
 0x249   : > { %v2311_v8 = vadd.f32 %v2310_v48, %v2268_v17  ;;  %2362 = vmatmul.bf16.gmra.mxu2 %v7440_v35  ;;  %2443 = vmatmul.bf16.gmra.mxu0 %v7441_v47  ;;  %v4848_v17 = vld [vmem:[#allocation5 + $0x508] sm:$0xf]  ;;  %v5500_v48 = vld [vmem:[#allocation5 + $0x514] sm:$0xf0] }
 0x24a   : > { %2486 = vmatmul.bf16.gmra.mxu1 %v6354_v13  ;;  %v4849_v52 = vor.u32 %v5500_v48, %v4848_v17 }
 0x24b   : > { %2636 = vmatpush.bf16.msrb.mxu1 %v4309_v41  ;;  %v2953_v37 = vmax.f32 %v2311_v8, 0.0  ;;  %v7443_v8 = vld [vmem:[#allocation24_spill] sm:$0xff] }
 0x24c   : > { %2405 = vmatmul.bf16.gmra.mxu3 %v6238_v5  ;;  %v2186_v53 = vpop.f32.mrf.mxu2 }
 0x24d   : > { %v2187_v19 = vadd.f32 %v2186_v53, %v6631_v3  ;;  %2556 = vmatpush.bf16.msrb.mxu3 %v4849_v52  ;;  %v5354_v53 = vld [vmem:[#allocation5 + $0x8c] sm:$0xf]  ;;  %v4450_v52 = vld [vmem:[#allocation5 + $0x1f8] sm:$0xf0] }
 0x24e   : > { %v2269_v63 = vpop.f32.mrf.mxu0 }
 0x24f   : > { %v2229_v33 = vpop.f32.mrf.mxu3  ;;  %v2270_v61 = vadd.f32 %v2269_v63, %v2227_v26  ;;  %v2312_v28 = vpop.f32.mrf.mxu1  ;;  %2637 = vmatpush.bf16.msrb.mxu1 %v4293_v60  ;;  %v4277_v26 = vor.u32 %v5354_v53, %v4274_v0  ;;  %v7444_v60 = vld [vmem:[#allocation33_spill] sm:$0xff] }
 0x250   : > { %v2230_v10 = vadd.f32 %v2229_v33, %v2187_v19 }
 0x251   : > { %v2313_v29 = vadd.f32 %v2312_v28, %v2270_v61  ;;  %v5350_v61 = vld [vmem:[#allocation5 + $0x6c] sm:$0xf]  ;;  %v4258_v28 = vld [vmem:[#allocation5 + $0x78] sm:$0xf0] }
 0x253   : > { %v2957_v21 = vmax.f32 %v2313_v29, 0.0  ;;  %2638 = vmatpush.bf16.msrb.mxu1 %v4277_v26  ;;  %v4261_v29 = vor.u32 %v5350_v61, %v4258_v28  ;;  %v4242_v26 = vld [vmem:[#allocation5 + $0x58] sm:$0xf0] }
 0x254   : > { %v2188_v3 = vpop.f32.mrf.mxu2 }
 0x255   : > { %v2189_v11 = vadd.f32 %v2188_v3, %v6642_v58  ;;  %v6707_v19 = vpack.c.bf16 %v2957_v21, %v2953_v37  ;;  %v5398_v58 = vld [vmem:[#allocation5 + $0x1ec] sm:$0xf]  ;;  %v5532_v37 = vld [vmem:[#allocation5 + $0x614] sm:$0xf0] }
 0x256   : > { %v2272_v33 = vpop.f32.mrf.mxu0  ;;  %v4453_v1 = vor.u32 %v5398_v58, %v4450_v52  ;;  %v5430_v21 = vld [vmem:[#allocation5 + $0x2ec] sm:$0xf]  ;;  %v4226_v58 = vld [vmem:[#allocation5 + $0x38] sm:$0xf0] }
 0x257   : > { %v2231_v27 = vpop.f32.mrf.mxu3  ;;  %7442 = vst [vmem:[#allocation29_spill] sm:$0xff] %v6707_v19  ;;  %v2273_v63 = vadd.f32 %v2272_v33, %v2230_v10  ;;  %v2315_v17 = vpop.f32.mrf.mxu1  ;;  %2639 = vmatpush.bf16.msrb.mxu1 %v4261_v29  ;;  %v4976_v10 = vld [vmem:[#allocation5 + $0x608] sm:$0xf]  ;;  %v5342_v29 = vld [vmem:[#allocation5 + $0x2c] sm:$0xf] }
 0x258   : > { %v2232_v41 = vadd.f32 %v2231_v27, %v2189_v11  ;;  %v4977_v0 = vor.u32 %v5532_v37, %v4976_v10  ;;  %v4578_v11 = vld [vmem:[#allocation5 + $0x2f8] sm:$0xf0]  ;;  %v5346_v27 = vld [vmem:[#allocation5 + $0x4c] sm:$0xf]  ;;  %2678 = vmatpush.bf16.msra.mxu2 %v4453_v1 }
 0x259   : > { %v2316_v48 = vadd.f32 %v2315_v17, %v2273_v63  ;;  %2367 = vmatmul.bf16.gmra.mxu2 %v7443_v8  ;;  %2448 = vmatmul.bf16.gmra.mxu0 %v7444_v60  ;;  %v4581_v63 = vor.u32 %v5430_v21, %v4578_v11  ;;  %v4245_v17 = vor.u32 %v5346_v27, %v4242_v26  ;;  %v5338_v37 = vld [vmem:[#allocation5 + $0xc] sm:$0xf] }
 0x25a   : > { %2491 = vmatmul.bf16.gmra.mxu1 %v6374_v32  ;;  %2599 = vmatpush.bf16.msrb.mxu0 %v4977_v0  ;;  %v4229_v32 = vor.u32 %v5342_v29, %v4226_v58 }
 0x25b   : > { %2721 = vmatpush.bf16.msra.mxu3 %v4581_v63  ;;  %2640 = vmatpush.bf16.msrb.mxu1 %v4245_v17 }
 0x25c   : > { %2410 = vmatmul.bf16.gmra.mxu3 %v6258_v2  ;;  %v2191_v16 = vpop.f32.mrf.mxu2  ;;  %v4210_v2 = vld [vmem:[#allocation5 + $0x18] sm:$0xf0] }
 0x25d   : > { %v2192_v3 = vadd.f32 %v2191_v16, %v6646_v24  ;;  %v2961_v24 = vmax.f32 %v2316_v48, 0.0  ;;  %v4213_v11 = vor.u32 %v5338_v37, %v4210_v2  ;;  %v4434_v48 = vld [vmem:[#allocation5 + $0x1d8] sm:$0xf0] }
 0x25e   : > { %v2274_v33 = vpop.f32.mrf.mxu0 }
 0x25f   : > { %v2234_v53 = vpop.f32.mrf.mxu3  ;;  %v2275_v28 = vadd.f32 %v2274_v33, %v2232_v41  ;;  %v2317_v19 = vpop.f32.mrf.mxu1  ;;  %2641 = vmatpush.bf16.msrb.mxu1 %v4229_v32  ;;  %v5426_v33 = vld [vmem:[#allocation5 + $0x2cc] sm:$0xf] }
 0x260   : > { %v2235_v61 = vadd.f32 %v2234_v53, %v2192_v3 }
 0x261   : > { %v2318_v52 = vadd.f32 %v2317_v19, %v2275_v28  ;;  %v5394_v19 = vld [vmem:[#allocation5 + $0x1cc] sm:$0xf] }
 0x262   : > { %v4437_v17 = vor.u32 %v5394_v19, %v4434_v48  ;;  %v4546_v19 = vld [vmem:[#allocation5 + $0x2b8] sm:$0xf0] }
 0x263   : > { %v2965_v16 = vmax.f32 %v2318_v52, 0.0  ;;  %2642 = vmatpush.bf16.msrb.mxu1 %v4213_v11 }
 0x264   : > { %v2193_v10 = vpop.f32.mrf.mxu2  ;;  %2679 = vmatpush.bf16.msra.mxu2 %v4437_v17 }
 0x265   : > { %v2194_v1 = vadd.f32 %v2193_v10, %v6657_v15  ;;  %v6715_v3 = vpack.c.bf16 %v2965_v16, %v2961_v24 }
 0x266   : > { %v2277_v41 = vpop.f32.mrf.mxu0 }
 0x267   : > { %v2236_v21 = vpop.f32.mrf.mxu3  ;;  %7445 = vst [vmem:[#allocation31_spill] sm:$0xff] %v6715_v3  ;;  %v2278_v0 = vadd.f32 %v2277_v41, %v2235_v61  ;;  %v2320_v27 = vpop.f32.mrf.mxu1  ;;  %v4562_v61 = vld [vmem:[#allocation5 + $0x2d8] sm:$0xf0] }
 0x268   : > { %v2237_v53 = vadd.f32 %v2236_v21, %v2194_v1  ;;  %v4565_v52 = vor.u32 %v5426_v33, %v4562_v61 }
 0x269   : > { %v2321_v26 = vadd.f32 %v2320_v27, %v2278_v0  ;;  %2372 = vmatmul.bf16.gmra.mxu2 %v6272_v55  ;;  %2453 = vmatmul.bf16.gmra.mxu0 %v6395_v40 }
 0x26a   : > { %2496 = vmatmul.bf16.gmra.mxu1 %v7421_v62  ;;  %2722 = vmatpush.bf16.msra.mxu3 %v4565_v52  ;;  %v5386_v52 = vld [vmem:[#allocation5 + $0x18c] sm:$0xf] }
 0x26b   : > { %v2969_v16 = vmax.f32 %v2321_v26, 0.0  ;;  %v5422_v26 = vld [vmem:[#allocation5 + $0x2ac] sm:$0xf] }
 0x26c   : > { %2415 = vmatmul.bf16.gmra.mxu3 %v6276_v57  ;;  %v2196_v32 = vpop.f32.mrf.mxu2 }
 0x26d   : > { %v2197_v15 = vadd.f32 %v2196_v32, %v6661_v59  ;;  %v5390_v32 = vld [vmem:[#allocation5 + $0x1ac] sm:$0xf] }
 0x26e   : > { %v2279_v63 = vpop.f32.mrf.mxu0 }
 0x26f   : > { %v2239_v2 = vpop.f32.mrf.mxu3  ;;  %v2280_v29 = vadd.f32 %v2279_v63, %v2237_v53  ;;  %v2322_v58 = vpop.f32.mrf.mxu1 }
 0x270   : > { %v2240_v28 = vadd.f32 %v2239_v2, %v2197_v15  ;;  %v4418_v15 = vld [vmem:[#allocation5 + $0x1b8] sm:$0xf0] }
 0x271   : > { %v2323_v24 = vadd.f32 %v2322_v58, %v2280_v29  ;;  %v4421_v53 = vor.u32 %v5390_v32, %v4418_v15  ;;  %v4530_v15 = vld [vmem:[#allocation5 + $0x298] sm:$0xf0] }
 0x273   : > { %v2973_v10 = vmax.f32 %v2323_v24, 0.0  ;;  %2680 = vmatpush.bf16.msra.mxu2 %v4421_v53  ;;  %v4402_v24 = vld [vmem:[#allocation5 + $0x198] sm:$0xf0] }
 0x274   : > { %v2198_v37 = vpop.f32.mrf.mxu2 }
 0x275   : > { %v2199_v1 = vadd.f32 %v2198_v37, %v6674_v38  ;;  %v6723_v21 = vpack.c.bf16 %v2973_v10, %v2969_v16  ;;  %v4549_v38 = vor.u32 %v5422_v26, %v4546_v19  ;;  %v4405_v16 = vor.u32 %v5386_v52, %v4402_v24  ;;  %v4514_v52 = vld [vmem:[#allocation5 + $0x278] sm:$0xf0] }
 0x276   : > { %v2282_v11 = vpop.f32.mrf.mxu0 }
 0x277   : > { %v2241_v59 = vpop.f32.mrf.mxu3  ;;  %7446 = vst [vmem:[#allocation21_spill] sm:$0xff] %v6723_v21  ;;  %v2283_v0 = vadd.f32 %v2282_v11, %v2240_v28  ;;  %v2325_v27 = vpop.f32.mrf.mxu1  ;;  %2723 = vmatpush.bf16.msra.mxu3 %v4549_v38  ;;  %2681 = vmatpush.bf16.msra.mxu2 %v4405_v16  ;;  %v4466_v21 = vld [vmem:[#allocation5 + $0x218] sm:$0xf0] }
 0x278   : > { %v2242_v41 = vadd.f32 %v2241_v59, %v2199_v1 }
 0x279   : > { %v2326_v2 = vadd.f32 %v2325_v27, %v2283_v0  ;;  %2458 = vmatmul.bf16.gmra.mxu0 %v6423_v42  ;;  %2514 = vmatmul.bf16.vlgmr.msrb.gmra.mxu2 %v6312_v34 }
 0x27a   : > { %2501 = vmatmul.bf16.gmra.mxu1 %v7425_v39 }
 0x27b   : > { %v2977_v10 = vmax.f32 %v2326_v2, 0.0 }
 0x27c   : > { %2557 = vmatmul.bf16.vlgmr.msrb.gmra.mxu3 %v6316_v36  ;;  %v2201_v48 = vpop.f32.mrf.mxu2 }
 0x27d   : > { %v2202_v33 = vadd.f32 %v2201_v48, %v6677_v9  ;;  %v5418_v9 = vld [vmem:[#allocation5 + $0x28c] sm:$0xf] }
 0x27e   : > { %v2284_v17 = vpop.f32.mrf.mxu0  ;;  %v4533_v53 = vor.u32 %v5418_v9, %v4530_v15 }
 0x27f   : > { %v2244_v63 = vpop.f32.mrf.mxu3  ;;  %v2285_v28 = vadd.f32 %v2284_v17, %v2242_v41  ;;  %v2327_v29 = vpop.f32.mrf.mxu1  ;;  %v6737_v41 = vld [vmem:[#allocation7] sm:$0xf] }
 0x280   : > { %v2245_v61 = vadd.f32 %v2244_v63, %v2202_v33  ;;  %v6740_v2 = vperm.slane %v6737_v41, 2  ;;  %2724 = vmatpush.bf16.msra.mxu3 %v4533_v53 }
 0x281   : > { %v2328_v58 = vadd.f32 %v2327_v29, %v2285_v28  ;;  %v4386_v28 = vld [vmem:[#allocation5 + $0x178] sm:$0xf0]  ;;  %v5414_v29 = vld [vmem:[#allocation5 + $0x26c] sm:$0xf] }
 0x282   : > { %v4517_v24 = vor.u32 %v5414_v29, %v4514_v52  ;;  %v4498_v29 = vld [vmem:[#allocation5 + $0x258] sm:$0xf0] }
 0x283   : > { %v2981_v37 = vmax.f32 %v2328_v58, 0.0 }
 0x284   : > { %v2203_v1 = vpop.f32.mrf.mxu2  ;;  %2725 = vmatpush.bf16.msra.mxu3 %v4517_v24 }
 0x285   : > { %v6730_v11 = vpack.c.bf16 %v2981_v37, %v2977_v10 }
 0x286   : > { %v2287_v0 = vpop.f32.mrf.mxu0 }
 0x287   : > { %v2246_v59 = vpop.f32.mrf.mxu3  ;;  %7447 = vst [vmem:[#allocation32_spill] sm:$0xff] %v6730_v11  ;;  %v2288_v27 = vadd.f32 %v2287_v0, %v2245_v61  ;;  %v2330_v32 = vpop.f32.mrf.mxu1  ;;  %v5382_v61 = vld [vmem:[#allocation5 + $0x16c] sm:$0xf] }
 0x288   : > { %v4389_v58 = vor.u32 %v5382_v61, %v4386_v28  ;;  %v5410_v61 = vld [vmem:[#allocation5 + $0x24c] sm:$0xf] }
 0x289   : > { %v6732_v26 = vadd.f32 %v2330_v32, %v2288_v27  ;;  %2519 = vmatmul.bf16.gmra.mxu2 %v6332_v49  ;;  %4996 = vmatmul.msk.bf16.vlgmr.msrb.gmra.mxu0 %vm1710_vm0, %v6453_v23 }
 0x28a   : > { %2643 = vmatmul.bf16.vlgmr.msrb.gmra.mxu1 %v7430_v46  ;;  %2682 = vmatpush.bf16.msra.mxu2 %v4389_v58  ;;  %v4501_v58 = vor.u32 %v5410_v61, %v4498_v29  ;;  %v4482_v29 = vld [vmem:[#allocation5 + $0x238] sm:$0xf0] }
 0x28b   : > { %7448 = vst [vmem:[#allocation24_spill] sm:$0xff] %v6732_v26 }
 0x28c   : > { %2562 = vmatmul.bf16.gmra.mxu3 %v6336_v51  ;;  %v2343_v19 = vpop.f32.mrf.mxu2 }
 0x28d   : > { %v2344_v38 = vadd.f32 %v2343_v19, %v6740_v2  ;;  %2726 = vmatpush.bf16.msra.mxu3 %v4501_v58 }
 0x28e   : > { %v2289_v33 = vpop.f32.mrf.mxu0 }
 0x28f   : > { %v2386_v48 = vpop.f32.mrf.mxu3  ;;  %v2332_v17 = vpop.f32.mrf.mxu1 }
 0x290   : > { %v2387_v63 = vadd.f32 %v2386_v48, %v2344_v38  ;;  %v4370_v17 = vld [vmem:[#allocation5 + $0x158] sm:$0xf0] }
 0x294   : > { %v2345_v16 = vpop.f32.mrf.mxu2 }
 0x295   : > { %v2346_v10 = vadd.f32 %v2345_v16, %v6740_v2 }
 0x296   : > { %v2429_v46 = vpop.f32.mrf.mxu0 }
 0x297   : > { %v2388_v37 = vpop.f32.mrf.mxu3  ;;  %v2430_v59 = vadd.f32 %v2429_v46, %v2387_v63  ;;  %v2472_v0 = vpop.f32.mrf.mxu1  ;;  %v5378_v63 = vld [vmem:[#allocation5 + $0x14c] sm:$0xf] }
 0x298   : > { %v2389_v1 = vadd.f32 %v2388_v37, %v2346_v10  ;;  %v4373_v28 = vor.u32 %v5378_v63, %v4370_v17  ;;  %v4354_v63 = vld [vmem:[#allocation5 + $0x138] sm:$0xf0] }
 0x299   : > { %v6746_v27 = vadd.f32 %v2472_v0, %v2430_v59  ;;  %2524 = vmatmul.bf16.gmra.mxu2 %v6352_v12  ;;  %4997 = vmatmul.msk.bf16.gmra.mxu0 %vm1710_vm0, %v6475_v6  ;;  %v7449_v59 = vld [vmem:[#allocation35_spill] sm:$0xff] }
 0x29a   : > { %2648 = vmatmul.bf16.gmra.mxu1 %v7434_v25  ;;  %2683 = vmatpush.bf16.msra.mxu2 %v4373_v28  ;;  %v5406_v28 = vld [vmem:[#allocation5 + $0x22c] sm:$0xf] }
 0x29b   : > { %v4485_v58 = vor.u32 %v5406_v28, %v4482_v29  ;;  %v5370_v28 = vld [vmem:[#allocation5 + $0x10c] sm:$0xf] }
 0x29c   : > { %2567 = vmatmul.bf16.gmra.mxu3 %v6356_v14  ;;  %v2348_v32 = vpop.f32.mrf.mxu2 }
 0x29d   : > { %v2349_v9 = vadd.f32 %v2348_v32, %v6740_v2  ;;  %2727 = vmatpush.bf16.msra.mxu3 %v4485_v58 }
 0x29e   : > { %v2431_v53 = vpop.f32.mrf.mxu0 }
 0x29f   : > { %v2391_v15 = vpop.f32.mrf.mxu3  ;;  %v2432_v38 = vadd.f32 %v2431_v53, %v2389_v1  ;;  %v2474_v48 = vpop.f32.mrf.mxu1 }
 0x2a0   : > { %v2392_v19 = vadd.f32 %v2391_v15, %v2349_v9 }
 0x2a1   : > { %v6754_v33 = vadd.f32 %v2474_v48, %v2432_v38  ;;  %v5374_v48 = vld [vmem:[#allocation5 + $0x12c] sm:$0xf] }
 0x2a2   : > { %v4357_v17 = vor.u32 %v5374_v48, %v4354_v63  ;;  %v4834_v48 = vld [vmem:[#allocation5 + $0x4f8] sm:$0xf0] }
 0x2a3   : > { %v7452_v63 = vld [vmem:[#allocation38_spill] sm:$0xff] }
 0x2a4   : > { %v2350_v52 = vpop.f32.mrf.mxu2  ;;  %2684 = vmatpush.bf16.msra.mxu2 %v4357_v17 }
 0x2a5   : > { %v2351_v25 = vadd.f32 %v2350_v52, %v6740_v2 }
 0x2a6   : > { %v2434_v16 = vpop.f32.mrf.mxu0 }
 0x2a7   : > { %v2393_v24 = vpop.f32.mrf.mxu3  ;;  %v2435_v37 = vadd.f32 %v2434_v16, %v2392_v19  ;;  %v2477_v46 = vpop.f32.mrf.mxu1 }
 0x2a8   : > { %v2394_v10 = vadd.f32 %v2393_v24, %v2351_v25 }
 0x2a9   : > { %v6757_v1 = vadd.f32 %v2477_v46, %v2435_v37  ;;  %2529 = vmatmul.bf16.gmra.mxu2 %v6372_v31  ;;  %4998 = vmatmul.msk.bf16.gmra.mxu0 %vm1710_vm0, %v6492_v4 }
 0x2aa   : > { %2653 = vmatmul.bf16.gmra.mxu1 %v6270_v54 }
 0x2ac   : > { %2572 = vmatmul.bf16.gmra.mxu3 %v7449_v59  ;;  %v2353_v0 = vpop.f32.mrf.mxu2 }
 0x2ad   : > { %v2354_v32 = vadd.f32 %v2353_v0, %v6740_v2  ;;  %v4706_v0 = vld [vmem:[#allocation5 + $0x3f8] sm:$0xf0] }
 0x2ae   : > { %v2436_v15 = vpop.f32.mrf.mxu0 }
 0x2af   : > { %v2396_v9 = vpop.f32.mrf.mxu3  ;;  %v2437_v38 = vadd.f32 %v2436_v15, %v2394_v10  ;;  %v2479_v19 = vpop.f32.mrf.mxu1  ;;  %v5462_v10 = vld [vmem:[#allocation5 + $0x3ec] sm:$0xf] }
 0x2b0   : > { %v2397_v53 = vadd.f32 %v2396_v9, %v2354_v32  ;;  %v5494_v32 = vld [vmem:[#allocation5 + $0x4ec] sm:$0xf] }
 0x2b1   : > { %v6765_v61 = vadd.f32 %v2479_v19, %v2437_v38  ;;  %v7450_v15 = vld [vmem:[#allocation36_spill] sm:$0xff]  ;;  %v4709_v19 = vor.u32 %v5462_v10, %v4706_v0  ;;  %v4837_v17 = vor.u32 %v5494_v32, %v4834_v48  ;;  %v4818_v10 = vld [vmem:[#allocation5 + $0x4d8] sm:$0xf0] }
 0x2b2   : > { %v7451_v38 = vld [vmem:[#allocation44_spill] sm:$0xff] }
 0x2b3   : > { %2764 = vmatpush.bf16.msra.mxu0 %v4709_v19  ;;  %2807 = vmatpush.bf16.msra.mxu1 %v4837_v17  ;;  %v5402_v48 = vld [vmem:[#allocation5 + $0x20c] sm:$0xf] }
 0x2b4   : > { %v2355_v52 = vpop.f32.mrf.mxu2  ;;  %v4469_v19 = vor.u32 %v5402_v48, %v4466_v21  ;;  %v5454_v17 = vld [vmem:[#allocation5 + $0x3ac] sm:$0xf] }
 0x2b5   : > { %v2356_v54 = vadd.f32 %v2355_v52, %v6740_v2  ;;  %v5458_v52 = vld [vmem:[#allocation5 + $0x3cc] sm:$0xf] }
 0x2b6   : > { %v2439_v24 = vpop.f32.mrf.mxu0  ;;  %2728 = vmatpush.bf16.msra.mxu3 %v4469_v19  ;;  %v5446_v48 = vld [vmem:[#allocation5 + $0x36c] sm:$0xf] }
 0x2b7   : > { %v2398_v25 = vpop.f32.mrf.mxu3  ;;  %v2440_v37 = vadd.f32 %v2439_v24, %v2397_v53  ;;  %v2482_v46 = vpop.f32.mrf.mxu1  ;;  %v4338_v53 = vld [vmem:[#allocation5 + $0x118] sm:$0xf0]  ;;  %v5478_v19 = vld [vmem:[#allocation5 + $0x46c] sm:$0xf] }
 0x2b8   : > { %v2399_v16 = vadd.f32 %v2398_v25, %v2356_v54  ;;  %v4341_v29 = vor.u32 %v5370_v28, %v4338_v53  ;;  %v4690_v54 = vld [vmem:[#allocation5 + $0x3d8] sm:$0xf0]  ;;  %v5490_v25 = vld [vmem:[#allocation5 + $0x4cc] sm:$0xf] }
 0x2b9   : > { %v6768_v9 = vadd.f32 %v2482_v46, %v2440_v37  ;;  %2534 = vmatmul.bf16.gmra.mxu2 %v7450_v15  ;;  %4999 = vmatmul.msk.bf16.gmra.mxu0 %vm1710_vm0, %v7451_v38  ;;  %v4693_v46 = vor.u32 %v5458_v52, %v4690_v54  ;;  %v4821_v26 = vor.u32 %v5490_v25, %v4818_v10  ;;  %v4674_v28 = vld [vmem:[#allocation5 + $0x3b8] sm:$0xf0]  ;;  %v5486_v53 = vld [vmem:[#allocation5 + $0x4ac] sm:$0xf] }
 0x2ba   : > { %2658 = vmatmul.bf16.gmra.mxu1 %v6290_v18  ;;  %2685 = vmatpush.bf16.msra.mxu2 %v4341_v29  ;;  %v5450_v54 = vld [vmem:[#allocation5 + $0x38c] sm:$0xf] }
 0x2bb   : > { %2765 = vmatpush.bf16.msra.mxu0 %v4693_v46  ;;  %2808 = vmatpush.bf16.msra.mxu1 %v4821_v26  ;;  %v5482_v25 = vld [vmem:[#allocation5 + $0x48c] sm:$0xf]  ;;  %v4786_v26 = vld [vmem:[#allocation5 + $0x498] sm:$0xf0] }
 0x2bc   : > { %2577 = vmatmul.bf16.gmra.mxu3 %v7452_v63  ;;  %v2358_v58 = vpop.f32.mrf.mxu2  ;;  %v4802_v63 = vld [vmem:[#allocation5 + $0x4b8] sm:$0xf0]  ;;  %v4789_v10 = vor.u32 %v5482_v25, %v4786_v26  ;;  %v5442_v26 = vld [vmem:[#allocation5 + $0x34c] sm:$0xf] }
 0x2bd   : > { %v2359_v24 = vadd.f32 %v2358_v58, %v6740_v2  ;;  %v4677_v58 = vor.u32 %v5454_v17, %v4674_v28  ;;  %v4805_v29 = vor.u32 %v5486_v53, %v4802_v63  ;;  %v4642_v63 = vld [vmem:[#allocation5 + $0x378] sm:$0xf0]  ;;  %v7453_v28 = vld [vmem:[#allocation39_spill] sm:$0xff]  ;;  %v7454_v53 = vld [vmem:[#allocation45_spill] sm:$0xff] }
 0x2be   : > { %v2441_v0 = vpop.f32.mrf.mxu0 }
 0x2bf   : > { %v2401_v37 = vpop.f32.mrf.mxu3  ;;  %v2442_v18 = vadd.f32 %v2441_v0, %v2399_v16  ;;  %v2484_v32 = vpop.f32.mrf.mxu1  ;;  %2766 = vmatpush.bf16.msra.mxu0 %v4677_v58  ;;  %2809 = vmatpush.bf16.msra.mxu1 %v4805_v29  ;;  %v4658_v16 = vld [vmem:[#allocation5 + $0x398] sm:$0xf0]  ;;  %v4645_v58 = vor.u32 %v5446_v48, %v4642_v63 }
 0x2c0   : > { %v2402_v11 = vadd.f32 %v2401_v37, %v2359_v24  ;;  %v4661_v21 = vor.u32 %v5450_v54, %v4658_v16  ;;  %v4770_v29 = vld [vmem:[#allocation5 + $0x478] sm:$0xf0]  ;;  %v5530_v16 = vld [vmem:[#allocation5 + $0x60c] sm:$0xf] }
 0x2c1   : > { %v6776_v3 = vadd.f32 %v2484_v32, %v2442_v18  ;;  %v4773_v54 = vor.u32 %v5478_v19, %v4770_v29  ;;  %v4754_v63 = vld [vmem:[#allocation5 + $0x458] sm:$0xf0] }
 0x2c3   : > { %2767 = vmatpush.bf16.msra.mxu0 %v4661_v21  ;;  %2810 = vmatpush.bf16.msra.mxu1 %v4789_v10  ;;  %v5474_v10 = vld [vmem:[#allocation5 + $0x44c] sm:$0xf] }
 0x2c4   : > { %v2360_v52 = vpop.f32.mrf.mxu2 }
 0x2c5   : > { %v2361_v24 = vadd.f32 %v2360_v52, %v6740_v2  ;;  %v4962_v52 = vld [vmem:[#allocation5 + $0x5f8] sm:$0xf0] }
 0x2c6   : > { %v2444_v46 = vpop.f32.mrf.mxu0 }
 0x2c7   : > { %v2403_v37 = vpop.f32.mrf.mxu3  ;;  %v2445_v18 = vadd.f32 %v2444_v46, %v2402_v11  ;;  %v2487_v32 = vpop.f32.mrf.mxu1  ;;  %v5526_v11 = vld [vmem:[#allocation5 + $0x5ec] sm:$0xf]  ;;  %2768 = vmatpush.bf16.msra.mxu0 %v4645_v58  ;;  %2811 = vmatpush.bf16.msra.mxu1 %v4773_v54  ;;  %v4626_v46 = vld [vmem:[#allocation5 + $0x358] sm:$0xf0] }
 0x2c8   : > { %v2404_v0 = vadd.f32 %v2403_v37, %v2361_v24  ;;  %v4965_v25 = vor.u32 %v5526_v11, %v4962_v52  ;;  %v4978_v24 = vld [vmem:[#allocation5 + $0x618] sm:$0xf0]  ;;  %v4629_v48 = vor.u32 %v5442_v26, %v4626_v46  ;;  %v5438_v58 = vld [vmem:[#allocation5 + $0x32c] sm:$0xf] }
 0x2c9   : > { %v6779_v17 = vadd.f32 %v2487_v32, %v2445_v18  ;;  %2539 = vmatmul.bf16.gmra.mxu2 %v7453_v28  ;;  %5000 = vmatmul.msk.bf16.gmra.mxu0 %vm1710_vm0, %v7454_v53  ;;  %v4981_v21 = vor.u32 %v5530_v16, %v4978_v24  ;;  %v4610_v52 = vld [vmem:[#allocation5 + $0x338] sm:$0xf0]  ;;  %v5470_v54 = vld [vmem:[#allocation5 + $0x42c] sm:$0xf] }
 0x2ca   : > { %2663 = vmatmul.bf16.gmra.mxu1 %v7440_v35  ;;  %2850 = vmatpush.bf16.msrb.mxu2 %v4965_v25  ;;  %v4613_v24 = vor.u32 %v5438_v58, %v4610_v52  ;;  %v4738_v53 = vld [vmem:[#allocation5 + $0x438] sm:$0xf0]  ;;  %v5434_v26 = vld [vmem:[#allocation5 + $0x30c] sm:$0xf]  ;;  %v7455_v52 = vld [vmem:[#allocation43_spill] sm:$0xff] }
 0x2cb   : > { %2900 = vmatpush.bf16.msrb.mxu3 %v4981_v21  ;;  %2769 = vmatpush.bf16.msra.mxu0 %v4629_v48  ;;  %v4594_v46 = vld [vmem:[#allocation5 + $0x318] sm:$0xf0]  ;;  %v5466_v21 = vld [vmem:[#allocation5 + $0x40c] sm:$0xf] }
 0x2cc   : > { %2582 = vmatmul.bf16.gmra.mxu3 %v7426_v7  ;;  %v2363_v37 = vpop.f32.mrf.mxu2  ;;  %v4757_v7 = vor.u32 %v5474_v10, %v4754_v63  ;;  %v4946_v58 = vld [vmem:[#allocation5 + $0x5d8] sm:$0xf0] }
 0x2cd   : > { %v2364_v18 = vadd.f32 %v2363_v37, %v6740_v2  ;;  %v4741_v37 = vor.u32 %v5470_v54, %v4738_v53  ;;  %v5522_v53 = vld [vmem:[#allocation5 + $0x5cc] sm:$0xf] }
 0x2ce   : > { %v2446_v35 = vpop.f32.mrf.mxu0  ;;  %2812 = vmatpush.bf16.msra.mxu1 %v4757_v7  ;;  %v4949_v54 = vor.u32 %v5522_v53, %v4946_v58  ;;  %v4930_v53 = vld [vmem:[#allocation5 + $0x5b8] sm:$0xf0] }
 0x2cf   : > { %v2406_v32 = vpop.f32.mrf.mxu3  ;;  %v2447_v29 = vadd.f32 %v2446_v35, %v2404_v0  ;;  %v2489_v11 = vpop.f32.mrf.mxu1  ;;  %2770 = vmatpush.bf16.msra.mxu0 %v4613_v24 }
 0x2d0   : > { %v2407_v19 = vadd.f32 %v2406_v32, %v2364_v18  ;;  %v4597_v18 = vor.u32 %v5434_v26, %v4594_v46  ;;  %v4722_v32 = vld [vmem:[#allocation5 + $0x418] sm:$0xf0]  ;;  %2851 = vmatpush.bf16.msrb.mxu2 %v4949_v54 }
 0x2d1   : > { %v6787_v16 = vadd.f32 %v2489_v11, %v2447_v29  ;;  %v4725_v48 = vor.u32 %v5466_v21, %v4722_v32 }
 0x2d2   : > { %2813 = vmatpush.bf16.msra.mxu1 %v4741_v37 }
 0x2d3   : > { %2771 = vmatpush.bf16.msra.mxu0 %v4597_v18 }
 0x2d4   : > { %v2365_v25 = vpop.f32.mrf.mxu2 }
 0x2d5   : > { %v2366_v10 = vadd.f32 %v2365_v25, %v6740_v2 }
 0x2d6   : > { %v2449_v7 = vpop.f32.mrf.mxu0  ;;  %2814 = vmatpush.bf16.msra.mxu1 %v4725_v48 }
 0x2d7   : > { %v2408_v0 = vpop.f32.mrf.mxu3  ;;  %v2450_v35 = vadd.f32 %v2449_v7, %v2407_v19  ;;  %v2492_v29 = vpop.f32.mrf.mxu1 }
 0x2d8   : > { %v2409_v63 = vadd.f32 %v2408_v0, %v2366_v10 }
 0x2d9   : > { %v6790_v11 = vadd.f32 %v2492_v29, %v2450_v35  ;;  %2544 = vmatmul.bf16.gmra.mxu2 %v7428_v30  ;;  %5001 = vmatmul.msk.bf16.gmra.mxu0 %vm1710_vm0, %v6537_v43  ;;  %v5518_v29 = vld [vmem:[#allocation5 + $0x5ac] sm:$0xf] }
 0x2da   : > { %2668 = vmatmul.bf16.gmra.mxu1 %v7443_v8  ;;  %v4933_v58 = vor.u32 %v5518_v29, %v4930_v53 }
 0x2dc   : > { %2587 = vmatmul.bf16.gmra.mxu3 %v7455_v52  ;;  %v2368_v24 = vpop.f32.mrf.mxu2  ;;  %2852 = vmatpush.bf16.msrb.mxu2 %v4933_v58 }
 0x2dd   : > { %v2369_v19 = vadd.f32 %v2368_v24, %v6740_v2  ;;  %v7456_v24 = vld [vmem:[#allocation46_spill] sm:$0xff] }
 0x2de   : > { %v2451_v25 = vpop.f32.mrf.mxu0 }
 0x2df   : > { %v2411_v37 = vpop.f32.mrf.mxu3  ;;  %v2452_v46 = vadd.f32 %v2451_v25, %v2409_v63  ;;  %v2494_v21 = vpop.f32.mrf.mxu1  ;;  %v7457_v63 = vld [vmem:[#allocation22_spill] sm:$0xff] }
 0x2e0   : > { %v2412_v26 = vadd.f32 %v2411_v37, %v2369_v19 }
 0x2e1   : > { %v6798_v10 = vadd.f32 %v2494_v21, %v2452_v46 }
 0x2e4   : > { %v2370_v0 = vpop.f32.mrf.mxu2 }
 0x2e5   : > { %v2371_v18 = vadd.f32 %v2370_v0, %v6740_v2 }
 0x2e6   : > { %v2454_v7 = vpop.f32.mrf.mxu0 }
 0x2e7   : > { %v2413_v32 = vpop.f32.mrf.mxu3  ;;  %v2455_v35 = vadd.f32 %v2454_v7, %v2412_v26  ;;  %v2497_v8 = vpop.f32.mrf.mxu1  ;;  %v4914_v7 = vld [vmem:[#allocation5 + $0x598] sm:$0xf0] }
 0x2e8   : > { %v2414_v48 = vadd.f32 %v2413_v32, %v2371_v18  ;;  %v5514_v32 = vld [vmem:[#allocation5 + $0x58c] sm:$0xf] }
 0x2e9   : > { %v6801_v54 = vadd.f32 %v2497_v8, %v2455_v35  ;;  %5002 = vmatmul.msk.bf16.gmra.mxu0 %vm1710_vm0, %v7456_v24  ;;  %2686 = vmatmul.bf16.vlgmr.msra.gmra.mxu2 %v7457_v63  ;;  %v4917_v8 = vor.u32 %v5514_v32, %v4914_v7  ;;  %v7458_v63 = vld [vmem:[#allocation25_spill] sm:$0xff] }
 0x2ea   : > { %2673 = vmatmul.bf16.gmra.mxu1 %v6272_v55 }
 0x2eb   : > { %2853 = vmatpush.bf16.msrb.mxu2 %v4917_v8 }
 0x2ec   : > { %2729 = vmatmul.bf16.vlgmr.msra.gmra.mxu3 %v7435_v45  ;;  %v2373_v19 = vpop.f32.mrf.mxu2 }
 0x2ed   : > { %v2374_v37 = vadd.f32 %v2373_v19, %v6740_v2  ;;  %v7459_v2 = vld [vmem:[#allocation28_spill] sm:$0xff] }
 0x2ee   : > { %v2456_v26 = vpop.f32.mrf.mxu0 }
 0x2ef   : > { %v2416_v25 = vpop.f32.mrf.mxu3  ;;  %v2457_v21 = vadd.f32 %v2456_v26, %v2414_v48  ;;  %v2499_v0 = vpop.f32.mrf.mxu1 }
 0x2f0   : > { %v2417_v46 = vadd.f32 %v2416_v25, %v2374_v37 }
 0x2f1   : > { %v6809_v18 = vadd.f32 %v2499_v0, %v2457_v21  ;;  %v5510_v0 = vld [vmem:[#allocation5 + $0x56c] sm:$0xf] }
 0x2f4   : > { %v2375_v35 = vpop.f32.mrf.mxu2 }
 0x2f6   : > { %v2459_v53 = vpop.f32.mrf.mxu0 }
 0x2f7   : > { %v2418_v29 = vpop.f32.mrf.mxu3  ;;  %v2460_v55 = vadd.f32 %v2459_v53, %v2417_v46  ;;  %v2502_v45 = vpop.f32.mrf.mxu1  ;;  %v4898_v46 = vld [vmem:[#allocation5 + $0x578] sm:$0xf0] }
 0x2f8   : > { %v4901_v32 = vor.u32 %v5510_v0, %v4898_v46 }
 0x2f9   : > { %v6811_v58 = vadd.f32 %v2502_v45, %v2460_v55  ;;  %2691 = vmatmul.bf16.gmra.mxu2 %v7458_v63  ;;  %2772 = vmatmul.bf16.vlgmr.msra.gmra.mxu0 %v7459_v2 }
 0x2fa   : > { %2815 = vmatmul.bf16.vlgmr.msra.gmra.mxu1 %v6312_v34  ;;  %2854 = vmatpush.bf16.msrb.mxu2 %v4901_v32  ;;  %v7460_v34 = vld [vmem:[#allocation30_spill] sm:$0xff] }
 0x2fc   : > { %2734 = vmatmul.bf16.gmra.mxu3 %v7436_v44  ;;  %v2515_v48 = vpop.f32.mrf.mxu2 }
 0x2fd   : > { %v2516_v19 = vadd.f32 %v2515_v48, %v6746_v27 }
 0x2fe   : > { %v2461_v25 = vpop.f32.mrf.mxu0 }
 0x2ff   : > { %v2558_v37 = vpop.f32.mrf.mxu3  ;;  %v2504_v21 = vpop.f32.mrf.mxu1 }
 0x300   : > { %v2559_v26 = vadd.f32 %v2558_v37, %v2516_v19  ;;  %v4882_v21 = vld [vmem:[#allocation5 + $0x558] sm:$0xf0] }
 0x304   : > { %v2517_v7 = vpop.f32.mrf.mxu2 }
 0x305   : > { %v2518_v35 = vadd.f32 %v2517_v7, %v6754_v33 }
 0x306   : > { %v2601_v29 = vpop.f32.mrf.mxu0 }
 0x307   : > { %v2560_v8 = vpop.f32.mrf.mxu3  ;;  %v2602_v44 = vadd.f32 %v2601_v29, %v2559_v26  ;;  %v6819_v55 = vpop.f32.mrf.mxu1  ;;  %v5506_v26 = vld [vmem:[#allocation5 + $0x54c] sm:$0xf] }
 0x308   : > { %v2561_v53 = vadd.f32 %v2560_v8, %v2518_v35 }
 0x309   : > { %2696 = vmatmul.bf16.gmra.mxu2 %v6274_v56  ;;  %2777 = vmatmul.bf16.gmra.mxu0 %v7460_v34  ;;  %v2938_v37 = vmax.f32 %v2602_v44, 0.0  ;;  %v4885_v56 = vor.u32 %v5506_v26, %v4882_v21  ;;  %v5068_v21 = vld [vmem:[#allocation8 + $0x70] sm:$0xf] }
 0x30a   : > { %2820 = vmatmul.bf16.gmra.mxu1 %v6332_v49 }
 0x30b   : > { %2855 = vmatpush.bf16.msrb.mxu2 %v4885_v56  ;;  %v5548_v56 = vld [vmem:[#allocation8 + $0x74] sm:$0xf0] }
 0x30c   : > { %2739 = vmatmul.bf16.gmra.mxu3 %v7438_v22  ;;  %v2520_v27 = vpop.f32.mrf.mxu2 }
 0x30d   : > { %v2521_v45 = vadd.f32 %v2520_v27, %v6757_v1 }
 0x30e   : > { %v2603_v2 = vpop.f32.mrf.mxu0 }
 0x30f   : > { %v2563_v63 = vpop.f32.mrf.mxu3  ;;  %v2604_v48 = vadd.f32 %v2603_v2, %v2561_v53  ;;  %v6826_v19 = vpop.f32.mrf.mxu1 }
 0x310   : > { %v2564_v33 = vadd.f32 %v2563_v63, %v2521_v45  ;;  %v5502_v45 = vld [vmem:[#allocation5 + $0x52c] sm:$0xf]  ;;  %v4866_v63 = vld [vmem:[#allocation5 + $0x538] sm:$0xf0] }
 0x311   : > { %v2942_v25 = vmax.f32 %v2604_v48, 0.0  ;;  %v4869_v2 = vor.u32 %v5502_v45, %v4866_v63 }
 0x313   : > { %v6828_v0 = vpack.c.bf16 %v2942_v25, %v2938_v37  ;;  %2856 = vmatpush.bf16.msrb.mxu2 %v4869_v2 }
 0x314   : > { %v2522_v46 = vpop.f32.mrf.mxu2 }
 0x315   : > { %v2523_v49 = vadd.f32 %v2522_v46, %v6765_v61  ;;  %v5132_v46 = vld [vmem:[#allocation8 + $0xf0] sm:$0xf] }
 0x316   : > { %v2606_v32 = vpop.f32.mrf.mxu0 }
 0x317   : > { %v2565_v22 = vpop.f32.mrf.mxu3  ;;  %v2607_v7 = vadd.f32 %v2606_v32, %v2564_v33  ;;  %v6831_v35 = vpop.f32.mrf.mxu1  ;;  %v5498_v32 = vld [vmem:[#allocation5 + $0x50c] sm:$0xf] }
 0x318   : > { %v2566_v1 = vadd.f32 %v2565_v22, %v2523_v49  ;;  %v5069_v49 = vor.u32 %v5548_v56, %v5068_v21  ;;  %v5564_v22 = vld [vmem:[#allocation8 + $0xf4] sm:$0xf0] }
 0x319   : > { %2701 = vmatmul.bf16.gmra.mxu2 %v6294_v20  ;;  %2782 = vmatmul.bf16.gmra.mxu0 %v6334_v50  ;;  %v2946_v33 = vmax.f32 %v2607_v7, 0.0  ;;  %v5560_v21 = vld [vmem:[#allocation8 + $0xd4] sm:$0xf0] }
 0x31a   : > { %2825 = vmatmul.bf16.gmra.mxu1 %v6352_v12  ;;  %3406 = vmatpush.bf16.msrb.mxu0 %v5069_v49  ;;  %v5044_v49 = vld [vmem:[#allocation8 + $0x40] sm:$0xf] }
 0x31c   : > { %2744 = vmatmul.bf16.gmra.mxu3 %v7441_v47  ;;  %v2525_v8 = vpop.f32.mrf.mxu2 }
 0x31d   : > { %v2526_v29 = vadd.f32 %v2525_v8, %v6768_v9 }
 0x31e   : > { %v2608_v44 = vpop.f32.mrf.mxu0 }
 0x31f   : > { %v2568_v53 = vpop.f32.mrf.mxu3  ;;  %v2609_v34 = vadd.f32 %v2608_v44, %v2566_v1  ;;  %v6838_v27 = vpop.f32.mrf.mxu1  ;;  %v4850_v1 = vld [vmem:[#allocation5 + $0x518] sm:$0xf0]  ;;  %v5124_v44 = vld [vmem:[#allocation8 + $0xe0] sm:$0xf] }
 0x320   : > { %v2569_v61 = vadd.f32 %v2568_v53, %v2526_v29  ;;  %v4853_v7 = vor.u32 %v5498_v32, %v4850_v1  ;;  %v5060_v29 = vld [vmem:[#allocation8 + $0x60] sm:$0xf]  ;;  %v5546_v53 = vld [vmem:[#allocation8 + $0x64] sm:$0xf0] }
 0x321   : > { %v2950_v20 = vmax.f32 %v2609_v34, 0.0  ;;  %v5562_v34 = vld [vmem:[#allocation8 + $0xe4] sm:$0xf0] }
 0x322   : > { %2857 = vmatpush.bf16.msrb.mxu2 %v4853_v7  ;;  %v5558_v7 = vld [vmem:[#allocation8 + $0xc4] sm:$0xf0] }
 0x323   : > { %v6840_v50 = vpack.c.bf16 %v2950_v20, %v2946_v33  ;;  %v5052_v33 = vld [vmem:[#allocation8 + $0x50] sm:$0xf]  ;;  %v5544_v20 = vld [vmem:[#allocation8 + $0x54] sm:$0xf0] }
 0x324   : > { %v2527_v47 = vpop.f32.mrf.mxu2 }
 0x325   : > { %v2528_v12 = vadd.f32 %v2527_v47, %v6776_v3  ;;  %v5133_v3 = vor.u32 %v5564_v22, %v5132_v46  ;;  %v5116_v47 = vld [vmem:[#allocation8 + $0xd0] sm:$0xf]  ;;  %v5542_v22 = vld [vmem:[#allocation8 + $0x44] sm:$0xf0] }
 0x326   : > { %v2611_v37 = vpop.f32.mrf.mxu0  ;;  %v5045_v1 = vor.u32 %v5542_v22, %v5044_v49 }
 0x327   : > { %v2570_v48 = vpop.f32.mrf.mxu3  ;;  %v2612_v25 = vadd.f32 %v2611_v37, %v2569_v61  ;;  %v6843_v26 = vpop.f32.mrf.mxu1  ;;  %3449 = vmatpush.bf16.msrb.mxu1 %v5133_v3  ;;  %v5053_v37 = vor.u32 %v5544_v20, %v5052_v33  ;;  %v5028_v33 = vld [vmem:[#allocation8 + $0x20] sm:$0xf]  ;;  %v5538_v20 = vld [vmem:[#allocation8 + $0x24] sm:$0xf0] }
 0x328   : > { %v2571_v9 = vadd.f32 %v2570_v48, %v2528_v12 }
 0x329   : > { %2706 = vmatmul.bf16.gmra.mxu2 %v6238_v5  ;;  %2787 = vmatmul.bf16.gmra.mxu0 %v6354_v13  ;;  %v5061_v13 = vor.u32 %v5546_v53, %v5060_v29  ;;  %v2954_v12 = vmax.f32 %v2612_v25, 0.0 }
 0x32a   : > { %2830 = vmatmul.bf16.gmra.mxu1 %v6372_v31 }
 0x32b   : > { %3407 = vmatpush.bf16.msrb.mxu0 %v5061_v13  ;;  %v5100_v13 = vld [vmem:[#allocation8 + $0xb0] sm:$0xf] }
 0x32c   : > { %2749 = vmatmul.bf16.gmra.mxu3 %v7444_v60  ;;  %v2530_v8 = vpop.f32.mrf.mxu2  ;;  %v5125_v60 = vor.u32 %v5562_v34, %v5124_v44  ;;  %v7461_v34 = vld [vmem:[#allocation26_spill] sm:$0xff] }
 0x32d   : > { %v2531_v5 = vadd.f32 %v2530_v8, %v6779_v17  ;;  %v5117_v17 = vor.u32 %v5560_v21, %v5116_v47  ;;  %v5092_v47 = vld [vmem:[#allocation8 + $0xa0] sm:$0xf]  ;;  %v5554_v21 = vld [vmem:[#allocation8 + $0xa4] sm:$0xf0] }
 0x32e   : > { %v2613_v45 = vpop.f32.mrf.mxu0  ;;  %3450 = vmatpush.bf16.msrb.mxu1 %v5125_v60 }
 0x32f   : > { %v2573_v61 = vpop.f32.mrf.mxu3  ;;  %v2614_v31 = vadd.f32 %v2613_v45, %v2571_v9  ;;  %v6850_v2 = vpop.f32.mrf.mxu1  ;;  %3408 = vmatpush.bf16.msrb.mxu0 %v5053_v37  ;;  %v5108_v9 = vld [vmem:[#allocation8 + $0xc0] sm:$0xf]  ;;  %v7462_v45 = vld [vmem:[#allocation34_spill] sm:$0xff]  ;;  %v5029_v37 = vor.u32 %v5538_v20, %v5028_v33 }
 0x330   : > { %v2574_v63 = vadd.f32 %v2573_v61, %v2531_v5  ;;  %v5109_v29 = vor.u32 %v5558_v7, %v5108_v9  ;;  %v5036_v5 = vld [vmem:[#allocation8 + $0x30] sm:$0xf]  ;;  %v5540_v61 = vld [vmem:[#allocation8 + $0x34] sm:$0xf0] }
 0x331   : > { %v2958_v48 = vmax.f32 %v2614_v31, 0.0  ;;  %v5037_v60 = vor.u32 %v5540_v61, %v5036_v5  ;;  %v5012_v61 = vld [vmem:[#allocation8] sm:$0xf] }
 0x332   : > { %3451 = vmatpush.bf16.msrb.mxu1 %v5117_v17 }
 0x333   : > { %v6852_v56 = vpack.c.bf16 %v2958_v48, %v2954_v12  ;;  %3409 = vmatpush.bf16.msrb.mxu0 %v5045_v1 }
 0x334   : > { %v2532_v46 = vpop.f32.mrf.mxu2 }
 0x335   : > { %v2533_v3 = vadd.f32 %v2532_v46, %v6787_v16  ;;  %v5556_v16 = vld [vmem:[#allocation8 + $0xb4] sm:$0xf0]  ;;  %v5093_v46 = vor.u32 %v5554_v21, %v5092_v47 }
 0x336   : > { %v2616_v8 = vpop.f32.mrf.mxu0  ;;  %3452 = vmatpush.bf16.msrb.mxu1 %v5109_v29  ;;  %v5101_v31 = vor.u32 %v5556_v16, %v5100_v13  ;;  %v5534_v13 = vld [vmem:[#allocation8 + $0x4] sm:$0xf0] }
 0x337   : > { %v2575_v32 = vpop.f32.mrf.mxu3  ;;  %v2617_v53 = vadd.f32 %v2616_v8, %v2574_v63  ;;  %v6855_v44 = vpop.f32.mrf.mxu1  ;;  %3410 = vmatpush.bf16.msrb.mxu0 %v5037_v60  ;;  %v5552_v8 = vld [vmem:[#allocation8 + $0x94] sm:$0xf0]  ;;  %v5013_v60 = vor.u32 %v5534_v13, %v5012_v61  ;;  %v5550_v16 = vld [vmem:[#allocation8 + $0x84] sm:$0xf0] }
 0x338   : > { %v2576_v25 = vadd.f32 %v2575_v32, %v2533_v3  ;;  %v5084_v3 = vld [vmem:[#allocation8 + $0x90] sm:$0xf] }
 0x339   : > { %2711 = vmatmul.bf16.gmra.mxu2 %v7461_v34  ;;  %2792 = vmatmul.bf16.gmra.mxu0 %v7462_v45  ;;  %v2962_v32 = vmax.f32 %v2617_v53, 0.0  ;;  %v5085_v29 = vor.u32 %v5552_v8, %v5084_v3 }
 0x33a   : > { %2835 = vmatmul.bf16.gmra.mxu1 %v7450_v15  ;;  %v5536_v15 = vld [vmem:[#allocation8 + $0x14] sm:$0xf0] }
 0x33b   : > { %3453 = vmatpush.bf16.msrb.mxu1 %v5101_v31  ;;  %3411 = vmatpush.bf16.msrb.mxu0 %v5029_v37 }
 0x33c   : > { %2754 = vmatmul.bf16.gmra.mxu3 %v6395_v40  ;;  %v2535_v63 = vpop.f32.mrf.mxu2  ;;  %v5020_v40 = vld [vmem:[#allocation8 + $0x10] sm:$0xf] }
 0x33d   : > { %v2536_v12 = vadd.f32 %v2535_v63, %v6790_v11  ;;  %v5021_v7 = vor.u32 %v5536_v15, %v5020_v40 }
 0x33e   : > { %v2618_v17 = vpop.f32.mrf.mxu0 }
 0x33f   : > { %v2578_v48 = vpop.f32.mrf.mxu3  ;;  %v2619_v22 = vadd.f32 %v2618_v17, %v2576_v25  ;;  %v6862_v9 = vpop.f32.mrf.mxu1  ;;  %3454 = vmatpush.bf16.msrb.mxu1 %v5093_v46  ;;  %3412 = vmatpush.bf16.msrb.mxu0 %v5021_v7  ;;  %v5076_v25 = vld [vmem:[#allocation8 + $0x80] sm:$0xf] }
 0x340   : > { %v2579_v49 = vadd.f32 %v2578_v48, %v2536_v12  ;;  %v5077_v63 = vor.u32 %v5550_v16, %v5076_v25 }
 0x341   : > { %v2966_v1 = vmax.f32 %v2619_v22, 0.0 }
 0x343   : > { %v6864_v11 = vpack.c.bf16 %v2966_v1, %v2962_v32  ;;  %3455 = vmatpush.bf16.msrb.mxu1 %v5085_v29  ;;  %3413 = vmatpush.bf16.msrb.mxu0 %v5013_v60  ;;  %v5580_v32 = vld [vmem:[#allocation8 + $0x174] sm:$0xf0]  ;;  %v6892_v60 = vperm.slane %v6737_v41, 3  ;;  %v5188_v41 = vld [vmem:[#allocation8 + $0x160] sm:$0xf] }
 0x344   : > { %v2537_v5 = vpop.f32.mrf.mxu2 }
 0x345   : > { %v2538_v34 = vadd.f32 %v2537_v5, %v6798_v10 }
 0x346   : > { %v2621_v31 = vpop.f32.mrf.mxu0 }
 0x347   : > { %v2580_v45 = vpop.f32.mrf.mxu3  ;;  %v2622_v33 = vadd.f32 %v2621_v31, %v2579_v49  ;;  %v6867_v20 = vpop.f32.mrf.mxu1  ;;  %3456 = vmatpush.bf16.msrb.mxu1 %v5077_v63 }
 0x348   : > { %v2581_v53 = vadd.f32 %v2580_v45, %v2538_v34 }
 0x349   : > { %2716 = vmatmul.bf16.gmra.mxu2 %v6276_v57  ;;  %2797 = vmatmul.bf16.gmra.mxu0 %v7421_v62  ;;  %v2970_v46 = vmax.f32 %v2622_v33, 0.0  ;;  %v7463_v33 = vld [vmem:[#allocation47_spill] sm:$0xff] }
 0x34a   : > { %2840 = vmatmul.bf16.gmra.mxu1 %v7453_v28 }
 0x34c   : > { %2759 = vmatmul.bf16.gmra.mxu3 %v6423_v42  ;;  %v2540_v10 = vpop.f32.mrf.mxu2 }
 0x34d   : > { %v2541_v47 = vadd.f32 %v2540_v10, %v6801_v54  ;;  %v5196_v54 = vld [vmem:[#allocation8 + $0x170] sm:$0xf]  ;;  %v7464_v10 = vld [vmem:[#allocation23_spill] sm:$0xff] }
 0x34e   : > { %v2623_v48 = vpop.f32.mrf.mxu0  ;;  %v5197_v1 = vor.u32 %v5580_v32, %v5196_v54 }
 0x34f   : > { %v2583_v12 = vpop.f32.mrf.mxu3  ;;  %v2624_v21 = vadd.f32 %v2623_v48, %v2581_v53  ;;  %v6874_v17 = vpop.f32.mrf.mxu1  ;;  %v2645_v53 = vadd.f32 %v6819_v55, %v6892_v60 }
 0x350   : > { %v2584_v37 = vadd.f32 %v2583_v12, %v2541_v47  ;;  %3492 = vmatpush.bf16.msra.mxu2 %v5197_v1  ;;  %v5578_v47 = vld [vmem:[#allocation8 + $0x164] sm:$0xf0]  ;;  %v5252_v12 = vld [vmem:[#allocation8 + $0x1e0] sm:$0xf] }
 0x351   : > { %v2974_v49 = vmax.f32 %v2624_v21, 0.0  ;;  %v5189_v48 = vor.u32 %v5578_v47, %v5188_v41 }
 0x353   : > { %v6876_v22 = vpack.c.bf16 %v2974_v49, %v2970_v46 }
 0x354   : > { %v2542_v57 = vpop.f32.mrf.mxu2  ;;  %3493 = vmatpush.bf16.msra.mxu2 %v5189_v48 }
 0x355   : > { %v2543_v62 = vadd.f32 %v2542_v57, %v6809_v18 }
 0x356   : > { %v2626_v42 = vpop.f32.mrf.mxu0 }
 0x357   : > { %v2585_v40 = vpop.f32.mrf.mxu3  ;;  %v2627_v28 = vadd.f32 %v2626_v42, %v2584_v37  ;;  %v6879_v3 = vpop.f32.mrf.mxu1  ;;  %v5594_v37 = vld [vmem:[#allocation8 + $0x1e4] sm:$0xf0] }
 0x358   : > { %v2586_v15 = vadd.f32 %v2585_v40, %v2543_v62  ;;  %v5253_v46 = vor.u32 %v5594_v37, %v5252_v12  ;;  %v2647_v40 = vadd.f32 %v6826_v19, %v6892_v60  ;;  %v7466_v19 = vld [vmem:[#allocation27_spill] sm:$0xff] }
 0x359   : > { %2802 = vmatmul.bf16.gmra.mxu0 %v7425_v39  ;;  %2858 = vmatmul.bf16.vlgmr.msrb.gmra.mxu2 %v6316_v36  ;;  %v5260_v39 = vld [vmem:[#allocation8 + $0x1f0] sm:$0xf]  ;;  %v5596_v36 = vld [vmem:[#allocation8 + $0x1f4] sm:$0xf0] }
 0x35a   : > { %2845 = vmatmul.bf16.gmra.mxu1 %v7428_v30  ;;  %v5261_v25 = vor.u32 %v5596_v36, %v5260_v39  ;;  %v2978_v30 = vmax.f32 %v2627_v28, 0.0  ;;  %v5244_v39 = vld [vmem:[#allocation8 + $0x1d0] sm:$0xf]  ;;  %v5592_v36 = vld [vmem:[#allocation8 + $0x1d4] sm:$0xf0] }
 0x35c   : > { %5003 = vmatmul.msk.bf16.vlgmr.msrb.gmra.mxu3 %vm1710_vm0, %v6453_v23  ;;  %v2545_v7 = vpop.f32.mrf.mxu2 }
 0x35d   : > { %v2546_v18 = vadd.f32 %v2545_v7, %v6811_v58  ;;  %3535 = vmatpush.bf16.msra.mxu3 %v5261_v25  ;;  %v2650_v7 = vadd.f32 %v6831_v35, %v6892_v60  ;;  %v5245_v25 = vor.u32 %v5592_v36, %v5244_v39 }
 0x35e   : > { %v2628_v29 = vpop.f32.mrf.mxu0 }
 0x35f   : > { %v2588_v8 = vpop.f32.mrf.mxu3  ;;  %v2629_v61 = vadd.f32 %v2628_v29, %v2586_v15  ;;  %v6887_v13 = vpop.f32.mrf.mxu1  ;;  %v5180_v29 = vld [vmem:[#allocation8 + $0x150] sm:$0xf] }
 0x360   : > { %v2589_v5 = vadd.f32 %v2588_v8, %v2546_v18  ;;  %v7465_v8 = vld [vmem:[#allocation48_spill] sm:$0xff] }
 0x361   : > { %v2982_v34 = vmax.f32 %v2629_v61, 0.0  ;;  %3536 = vmatpush.bf16.msra.mxu3 %v5253_v46 }
 0x363   : > { %v6889_v23 = vpack.c.bf16 %v2982_v34, %v2978_v30 }
 0x364   : > { %v2547_v45 = vpop.f32.mrf.mxu2 }
 0x365   : > { %3537 = vmatpush.bf16.msra.mxu3 %v5245_v25 }
 0x366   : > { %v2631_v16 = vpop.f32.mrf.mxu0 }
 0x367   : > { %v2590_v58 = vpop.f32.mrf.mxu3  ;;  %v6894_v31 = vadd.f32 %v2631_v16, %v2589_v5  ;;  %v6896_v63 = vpop.f32.mrf.mxu1  ;;  %v5576_v5 = vld [vmem:[#allocation8 + $0x154] sm:$0xf0] }
 0x368   : > { %v5181_v61 = vor.u32 %v5576_v5, %v5180_v29  ;;  %v5164_v5 = vld [vmem:[#allocation8 + $0x130] sm:$0xf] }
 0x369   : > { %2863 = vmatmul.bf16.gmra.mxu2 %v6336_v51  ;;  %3414 = vmatmul.bf16.vlgmr.msrb.gmra.mxu0 %v7463_v33 }
 0x36a   : > { %3457 = vmatmul.bf16.vlgmr.msrb.gmra.mxu1 %v7464_v10  ;;  %3494 = vmatpush.bf16.msra.mxu2 %v5181_v61  ;;  %v5572_v61 = vld [vmem:[#allocation8 + $0x134] sm:$0xf0] }
 0x36b   : > { %v5165_v39 = vor.u32 %v5572_v61, %v5164_v5 }
 0x36c   : > { %5004 = vmatmul.msk.bf16.gmra.mxu3 %vm1710_vm0, %v6475_v6  ;;  %v2687_v21 = vpop.f32.mrf.mxu2 }
 0x36d   : > { %v2688_v49 = vadd.f32 %v2687_v21, %v2645_v53 }
 0x36e   : > { %v2633_v55 = vpop.f32.mrf.mxu0 }
 0x36f   : > { %v2730_v57 = vpop.f32.mrf.mxu3  ;;  %v2676_v62 = vpop.f32.mrf.mxu1 }
 0x370   : > { %v2731_v51 = vadd.f32 %v2730_v57, %v2688_v49  ;;  %v5172_v49 = vld [vmem:[#allocation8 + $0x140] sm:$0xf]  ;;  %v5574_v57 = vld [vmem:[#allocation8 + $0x144] sm:$0xf0] }
 0x371   : > { %v5173_v55 = vor.u32 %v5574_v57, %v5172_v49  ;;  %v7471_v49 = vld [vmem:[#allocation45_spill] sm:$0xff]  ;;  %v7472_v57 = vld [vmem:[#allocation31_spill] sm:$0xff] }
 0x373   : > { %3495 = vmatpush.bf16.msra.mxu2 %v5173_v55 }
 0x374   : > { %v2689_v6 = vpop.f32.mrf.mxu2 }
 0x375   : > { %v2690_v42 = vadd.f32 %v2689_v6, %v2647_v40  ;;  %v7467_v40 = vld [vmem:[#allocation49_spill] sm:$0xff]  ;;  %v5590_v6 = vld [vmem:[#allocation8 + $0x1c4] sm:$0xf0] }
 0x376   : > { %v2773_v28 = vpop.f32.mrf.mxu0 }
 0x377   : > { %v2732_v15 = vpop.f32.mrf.mxu3  ;;  %v2774_v32 = vadd.f32 %v2773_v28, %v2731_v51  ;;  %v2816_v1 = vpop.f32.mrf.mxu1  ;;  %v2655_v51 = vadd.f32 %v6843_v26, %v6892_v60  ;;  %3496 = vmatpush.bf16.msra.mxu2 %v5165_v39 }
 0x378   : > { %v2733_v54 = vadd.f32 %v2732_v15, %v2690_v42  ;;  %v7468_v42 = vld [vmem:[#allocation29_spill] sm:$0xff] }
 0x379   : > { %v6909_v18 = vadd.f32 %v2816_v1, %v2774_v32  ;;  %2868 = vmatmul.bf16.gmra.mxu2 %v6356_v14  ;;  %3419 = vmatmul.bf16.gmra.mxu0 %v7465_v8 }
 0x37a   : > { %3462 = vmatmul.bf16.gmra.mxu1 %v7466_v19 }
 0x37c   : > { %5005 = vmatmul.msk.bf16.gmra.mxu3 %vm1710_vm0, %v6492_v4  ;;  %v2692_v30 = vpop.f32.mrf.mxu2  ;;  %v2652_v4 = vadd.f32 %v6838_v27, %v6892_v60  ;;  %v5236_v27 = vld [vmem:[#allocation8 + $0x1c0] sm:$0xf] }
 0x37d   : > { %v2693_v35 = vadd.f32 %v2692_v30, %v2650_v7  ;;  %v5237_v15 = vor.u32 %v5590_v6, %v5236_v27  ;;  %v5156_v27 = vld [vmem:[#allocation8 + $0x120] sm:$0xf]  ;;  %v5545_v6 = vld [vmem:[#allocation8 + $0x64] sm:$0xf] }
 0x37e   : > { %v2775_v45 = vpop.f32.mrf.mxu0 }
 0x37f   : > { %v2735_v34 = vpop.f32.mrf.mxu3  ;;  %v2776_v58 = vadd.f32 %v2775_v45, %v2733_v54  ;;  %v2818_v16 = vpop.f32.mrf.mxu1  ;;  %3538 = vmatpush.bf16.msra.mxu3 %v5237_v15 }
 0x380   : > { %v2736_v14 = vadd.f32 %v2735_v34, %v2693_v35 }
 0x381   : > { %v6916_v53 = vadd.f32 %v2818_v16, %v2776_v58  ;;  %v5588_v58 = vld [vmem:[#allocation8 + $0x1b4] sm:$0xf0] }
 0x384   : > { %v2694_v41 = vpop.f32.mrf.mxu2 }
 0x385   : > { %v2695_v47 = vadd.f32 %v2694_v41, %v2652_v4  ;;  %v5547_v4 = vld [vmem:[#allocation8 + $0x74] sm:$0xf]  ;;  %v5070_v41 = vld [vmem:[#allocation8 + $0x78] sm:$0xf0] }
 0x386   : > { %v2778_v48 = vpop.f32.mrf.mxu0 }
 0x387   : > { %v2737_v12 = vpop.f32.mrf.mxu3  ;;  %v2779_v21 = vadd.f32 %v2778_v48, %v2736_v14  ;;  %v2821_v46 = vpop.f32.mrf.mxu1  ;;  %v5228_v14 = vld [vmem:[#allocation8 + $0x1b0] sm:$0xf] }
 0x388   : > { %v2738_v37 = vadd.f32 %v2737_v12, %v2695_v47  ;;  %v5229_v16 = vor.u32 %v5588_v58, %v5228_v14  ;;  %v5563_v47 = vld [vmem:[#allocation8 + $0xf4] sm:$0xf]  ;;  %v2660_v12 = vadd.f32 %v6855_v44, %v6892_v60  ;;  %v5570_v44 = vld [vmem:[#allocation8 + $0x124] sm:$0xf0] }
 0x389   : > { %v6922_v62 = vadd.f32 %v2821_v46, %v2779_v21  ;;  %2873 = vmatmul.bf16.gmra.mxu2 %v7449_v59  ;;  %3424 = vmatmul.bf16.gmra.mxu0 %v7467_v40  ;;  %v5073_v21 = vor.u32 %v5547_v4, %v5070_v41  ;;  %v5134_v46 = vld [vmem:[#allocation8 + $0xf8] sm:$0xf0]  ;;  %v5559_v58 = vld [vmem:[#allocation8 + $0xd4] sm:$0xf] }
 0x38a   : > { %3467 = vmatmul.bf16.gmra.mxu1 %v7468_v42  ;;  %v5137_v55 = vor.u32 %v5563_v47, %v5134_v46  ;;  %3539 = vmatpush.bf16.msra.mxu3 %v5229_v16  ;;  %v5118_v16 = vld [vmem:[#allocation8 + $0xd8] sm:$0xf0]  ;;  %v5220_v47 = vld [vmem:[#allocation8 + $0x1a0] sm:$0xf] }
 0x38b   : > { %3578 = vmatpush.bf16.msra.mxu0 %v5073_v21  ;;  %v5121_v41 = vor.u32 %v5559_v58, %v5118_v16  ;;  %v5537_v16 = vld [vmem:[#allocation8 + $0x24] sm:$0xf] }
 0x38c   : > { %5006 = vmatmul.msk.bf16.gmra.mxu3 %vm1710_vm0, %v7451_v38  ;;  %v2697_v28 = vpop.f32.mrf.mxu2  ;;  %v2657_v38 = vadd.f32 %v6850_v2, %v6892_v60  ;;  %v7470_v2 = vld [vmem:[#allocation37_spill] sm:$0xff]  ;;  %3621 = vmatpush.bf16.msra.mxu1 %v5137_v55  ;;  %v5566_v55 = vld [vmem:[#allocation8 + $0x104] sm:$0xf0] }
 0x38d   : > { %v2698_v54 = vadd.f32 %v2697_v28, %v2655_v51 }
 0x38e   : > { %v2780_v26 = vpop.f32.mrf.mxu0 }
 0x38f   : > { %v2740_v32 = vpop.f32.mrf.mxu3  ;;  %v2781_v7 = vadd.f32 %v2780_v26, %v2738_v37  ;;  %v2823_v29 = vpop.f32.mrf.mxu1  ;;  %v7469_v37 = vld [vmem:[#allocation38_spill] sm:$0xff]  ;;  %v5062_v26 = vld [vmem:[#allocation8 + $0x68] sm:$0xf0] }
 0x390   : > { %v2741_v1 = vadd.f32 %v2740_v32, %v2698_v54  ;;  %v5157_v32 = vor.u32 %v5570_v44, %v5156_v27  ;;  %v5065_v5 = vor.u32 %v5545_v6, %v5062_v26 }
 0x391   : > { %v6929_v59 = vadd.f32 %v2823_v29, %v2781_v7  ;;  %v5126_v7 = vld [vmem:[#allocation8 + $0xe8] sm:$0xf0] }
 0x392   : > { %3497 = vmatpush.bf16.msra.mxu2 %v5157_v32  ;;  %3579 = vmatpush.bf16.msra.mxu0 %v5065_v5  ;;  %v5038_v5 = vld [vmem:[#allocation8 + $0x38] sm:$0xf0] }
 0x394   : > { %v2699_v36 = vpop.f32.mrf.mxu2 }
 0x395   : > { %v2700_v25 = vadd.f32 %v2699_v36, %v2657_v38 }
 0x396   : > { %v2783_v35 = vpop.f32.mrf.mxu0 }
 0x397   : > { %v2742_v30 = vpop.f32.mrf.mxu3  ;;  %v2784_v34 = vadd.f32 %v2783_v35, %v2741_v1  ;;  %v2826_v45 = vpop.f32.mrf.mxu1  ;;  %v5561_v1 = vld [vmem:[#allocation8 + $0xe4] sm:$0xf]  ;;  %v5148_v35 = vld [vmem:[#allocation8 + $0x110] sm:$0xf] }
 0x398   : > { %v2743_v15 = vadd.f32 %v2742_v30, %v2700_v25  ;;  %v5129_v61 = vor.u32 %v5561_v1, %v5126_v7  ;;  %v5054_v30 = vld [vmem:[#allocation8 + $0x58] sm:$0xf0] }
 0x399   : > { %v6935_v48 = vadd.f32 %v2826_v45, %v2784_v34  ;;  %2878 = vmatmul.bf16.gmra.mxu2 %v7469_v37  ;;  %3429 = vmatmul.bf16.gmra.mxu0 %v7470_v2  ;;  %v5568_v34 = vld [vmem:[#allocation8 + $0x114] sm:$0xf0]  ;;  %v5543_v45 = vld [vmem:[#allocation8 + $0x54] sm:$0xf]  ;;  %v2662_v37 = vadd.f32 %v6862_v9, %v6892_v60 }
 0x39a   : > { %3472 = vmatmul.bf16.gmra.mxu1 %v7472_v57  ;;  %v5149_v25 = vor.u32 %v5568_v34, %v5148_v35  ;;  %v5057_v4 = vor.u32 %v5543_v45, %v5054_v30  ;;  %v7473_v35 = vld [vmem:[#allocation41_spill] sm:$0xff]  ;;  %v7474_v34 = vld [vmem:[#allocation40_spill] sm:$0xff] }
 0x39b   : > { %3622 = vmatpush.bf16.msra.mxu1 %v5129_v61  ;;  %v5555_v61 = vld [vmem:[#allocation8 + $0xb4] sm:$0xf] }
 0x39c   : > { %5007 = vmatmul.msk.bf16.gmra.mxu3 %vm1710_vm0, %v7471_v49  ;;  %v2702_v51 = vpop.f32.mrf.mxu2  ;;  %3498 = vmatpush.bf16.msra.mxu2 %v5149_v25  ;;  %v5140_v49 = vld [vmem:[#allocation8 + $0x100] sm:$0xf]  ;;  %v5102_v25 = vld [vmem:[#allocation8 + $0xb8] sm:$0xf0] }
 0x39d   : > { %v2703_v28 = vadd.f32 %v2702_v51, %v2660_v12  ;;  %v5586_v12 = vld [vmem:[#allocation8 + $0x1a4] sm:$0xf0]  ;;  %3580 = vmatpush.bf16.msra.mxu0 %v5057_v4  ;;  %v5541_v51 = vld [vmem:[#allocation8 + $0x44] sm:$0xf]  ;;  %v5141_v6 = vor.u32 %v5566_v55, %v5140_v49  ;;  %v5105_v30 = vor.u32 %v5555_v61, %v5102_v25  ;;  %v5030_v4 = vld [vmem:[#allocation8 + $0x28] sm:$0xf0] }
 0x39e   : > { %v2785_v29 = vpop.f32.mrf.mxu0  ;;  %v5221_v21 = vor.u32 %v5586_v12, %v5220_v47  ;;  %v5014_v61 = vld [vmem:[#allocation8 + $0x8] sm:$0xf0] }
 0x39f   : > { %v2745_v54 = vpop.f32.mrf.mxu3  ;;  %v2786_v38 = vadd.f32 %v2785_v29, %v2743_v15  ;;  %v2828_v36 = vpop.f32.mrf.mxu1  ;;  %3623 = vmatpush.bf16.msra.mxu1 %v5121_v41  ;;  %v5046_v15 = vld [vmem:[#allocation8 + $0x48] sm:$0xf0]  ;;  %v5539_v29 = vld [vmem:[#allocation8 + $0x34] sm:$0xf] }
 0x3a0   : > { %v2746_v39 = vadd.f32 %v2745_v54, %v2703_v28  ;;  %3540 = vmatpush.bf16.msra.mxu3 %v5221_v21  ;;  %v5557_v28 = vld [vmem:[#allocation8 + $0xc4] sm:$0xf]  ;;  %v5110_v54 = vld [vmem:[#allocation8 + $0xc8] sm:$0xf0]  ;;  %v5049_v26 = vor.u32 %v5541_v51, %v5046_v15  ;;  %3499 = vmatpush.bf16.msra.mxu2 %v5141_v6  ;;  %v5041_v45 = vor.u32 %v5539_v29, %v5038_v5  ;;  %v5022_v15 = vld [vmem:[#allocation8 + $0x18] sm:$0xf0] }
 0x3a1   : > { %v6942_v14 = vadd.f32 %v2828_v36, %v2786_v38  ;;  %v5113_v1 = vor.u32 %v5557_v28, %v5110_v54  ;;  %v2665_v38 = vadd.f32 %v6867_v20, %v6892_v60  ;;  %v5553_v20 = vld [vmem:[#allocation8 + $0xa4] sm:$0xf]  ;;  %v5094_v21 = vld [vmem:[#allocation8 + $0xa8] sm:$0xf0]  ;;  %v5551_v28 = vld [vmem:[#allocation8 + $0x94] sm:$0xf] }
 0x3a2   : > { %3581 = vmatpush.bf16.msra.mxu0 %v5049_v26  ;;  %v5097_v49 = vor.u32 %v5553_v20, %v5094_v21  ;;  %v5584_v26 = vld [vmem:[#allocation8 + $0x194] sm:$0xf0]  ;;  %v5533_v5 = vld [vmem:[#allocation8 + $0x4] sm:$0xf] }
 0x3a3   : > { %3624 = vmatpush.bf16.msra.mxu1 %v5113_v1  ;;  %v5017_v25 = vor.u32 %v5533_v5, %v5014_v61 }
 0x3a4   : > { %v2704_v46 = vpop.f32.mrf.mxu2 }
 0x3a5   : > { %v2705_v27 = vadd.f32 %v2704_v46, %v2662_v37  ;;  %v5033_v37 = vor.u32 %v5537_v16, %v5030_v4 }
 0x3a6   : > { %v2788_v32 = vpop.f32.mrf.mxu0  ;;  %3582 = vmatpush.bf16.msra.mxu0 %v5041_v45 }
 0x3a7   : > { %v2747_v44 = vpop.f32.mrf.mxu3  ;;  %v2789_v7 = vadd.f32 %v2788_v32, %v2746_v39  ;;  %v2831_v9 = vpop.f32.mrf.mxu1  ;;  %v7475_v39 = vld [vmem:[#allocation21_spill] sm:$0xff]  ;;  %3625 = vmatpush.bf16.msra.mxu1 %v5105_v30  ;;  %v5078_v30 = vld [vmem:[#allocation8 + $0x88] sm:$0xf0] }
 0x3a8   : > { %v2748_v41 = vadd.f32 %v2747_v44, %v2705_v27  ;;  %v5212_v32 = vld [vmem:[#allocation8 + $0x190] sm:$0xf]  ;;  %v5086_v27 = vld [vmem:[#allocation8 + $0x98] sm:$0xf0] }
 0x3a9   : > { %v6948_v36 = vadd.f32 %v2831_v9, %v2789_v7  ;;  %2883 = vmatmul.bf16.gmra.mxu2 %v7473_v35  ;;  %3434 = vmatmul.bf16.gmra.mxu0 %v7474_v34  ;;  %v5213_v44 = vor.u32 %v5584_v26, %v5212_v32  ;;  %v5089_v7 = vor.u32 %v5551_v28, %v5086_v27  ;;  %v7478_v32 = vld [vmem:[#allocation20_spill] sm:$0xff] }
 0x3aa   : > { %3477 = vmatmul.bf16.gmra.mxu1 %v7475_v39  ;;  %3583 = vmatpush.bf16.msra.mxu0 %v5033_v37  ;;  %v2667_v9 = vadd.f32 %v6874_v17, %v6892_v60  ;;  %v2984_v26 = vmax.f32 %v7478_v32, 0.0 }
 0x3ab   : > { %3626 = vmatpush.bf16.msra.mxu1 %v5097_v49  ;;  %3541 = vmatpush.bf16.msra.mxu3 %v5213_v44 }
 0x3ac   : > { %5008 = vmatmul.msk.bf16.gmra.mxu3 %vm1710_vm0, %v6537_v43  ;;  %v2707_v58 = vpop.f32.mrf.mxu2  ;;  %v5535_v43 = vld [vmem:[#allocation8 + $0x14] sm:$0xf]  ;;  %v6974_v5 = vpack.c.bf16 %v2984_v26, %v2984_v26  ;;  %v5577_v26 = vld [vmem:[#allocation8 + $0x164] sm:$0xf] }
 0x3ad   : > { %v2708_v47 = vadd.f32 %v2707_v58, %v2665_v38  ;;  %v5025_v1 = vor.u32 %v5535_v43, %v5022_v15  ;;  %v5549_v38 = vld [vmem:[#allocation8 + $0x84] sm:$0xf]  ;;  %v5204_v15 = vld [vmem:[#allocation8 + $0x180] sm:$0xf] }
 0x3ae   : > { %v2790_v46 = vpop.f32.mrf.mxu0  ;;  %v5081_v20 = vor.u32 %v5549_v38, %v5078_v30  ;;  %v5198_v30 = vld [vmem:[#allocation8 + $0x178] sm:$0xf0] }
 0x3af   : > { %v2750_v12 = vpop.f32.mrf.mxu3  ;;  %v2791_v51 = vadd.f32 %v2790_v46, %v2748_v41  ;;  %v2833_v6 = vpop.f32.mrf.mxu1  ;;  %3584 = vmatpush.bf16.msra.mxu0 %v5025_v1  ;;  %3627 = vmatpush.bf16.msra.mxu1 %v5089_v7  ;;  %v2670_v41 = vadd.f32 %v6879_v3, %v6892_v60  ;;  %v2672_v1 = vadd.f32 %v6887_v13, %v6892_v60  ;;  %v5579_v13 = vld [vmem:[#allocation8 + $0x174] sm:$0xf] }
 0x3b0   : > { %v2751_v55 = vadd.f32 %v2750_v12, %v2708_v47  ;;  %v7476_v47 = vld [vmem:[#allocation42_spill] sm:$0xff]  ;;  %v7477_v12 = vld [vmem:[#allocation32_spill] sm:$0xff] }
 0x3b1   : > { %v6955_v54 = vadd.f32 %v2833_v6, %v2791_v51 }
 0x3b3   : > { %3585 = vmatpush.bf16.msra.mxu0 %v5017_v25  ;;  %3628 = vmatpush.bf16.msra.mxu1 %v5081_v20 }
 0x3b4   : > { %v2709_v29 = vpop.f32.mrf.mxu2 }
 0x3b5   : > { %v2710_v35 = vadd.f32 %v2709_v29, %v2667_v9 }
 0x3b6   : > { %v2793_v58 = vpop.f32.mrf.mxu0 }
 0x3b7   : > { %v2752_v45 = vpop.f32.mrf.mxu3  ;;  %v2794_v16 = vadd.f32 %v2793_v58, %v2751_v55  ;;  %v2836_v4 = vpop.f32.mrf.mxu1 }
 0x3b8   : > { %v2753_v21 = vadd.f32 %v2752_v45, %v2710_v35  ;;  %v2675_v45 = vadd.f32 %v6896_v63, %v6892_v60 }
 0x3b9   : > { %v6961_v17 = vadd.f32 %v2836_v4, %v2794_v16  ;;  %2888 = vmatmul.bf16.gmra.mxu2 %v7455_v52  ;;  %3439 = vmatmul.bf16.gmra.mxu0 %v7476_v47  ;;  %v5582_v52 = vld [vmem:[#allocation8 + $0x184] sm:$0xf0]  ;;  %v5201_v16 = vor.u32 %v5579_v13, %v5198_v30 }
 0x3ba   : > { %3482 = vmatmul.bf16.gmra.mxu1 %v7477_v12  ;;  %v5205_v28 = vor.u32 %v5582_v52, %v5204_v15 }
 0x3bb   : > { %3664 = vmatpush.bf16.msrb.mxu2 %v5201_v16 }
 0x3bc   : > { %5009 = vmatmul.msk.bf16.gmra.mxu3 %vm1710_vm0, %v7456_v24  ;;  %v2712_v37 = vpop.f32.mrf.mxu2  ;;  %v7479_v24 = vld [vmem:[#allocation24_spill] sm:$0xff] }
 0x3bd   : > { %v2713_v46 = vadd.f32 %v2712_v37, %v2670_v41  ;;  %v2985_v27 = vmax.f32 %v7479_v24, 0.0  ;;  %3542 = vmatpush.bf16.msra.mxu3 %v5205_v28  ;;  %v5593_v24 = vld [vmem:[#allocation8 + $0x1e4] sm:$0xf] }
 0x3be   : > { %v2795_v55 = vpop.f32.mrf.mxu0 }
 0x3bf   : > { %v2755_v49 = vpop.f32.mrf.mxu3  ;;  %v2796_v6 = vadd.f32 %v2795_v55, %v2753_v21  ;;  %v2838_v3 = vpop.f32.mrf.mxu1  ;;  %v6976_v35 = vpack.c.bf16 %v2985_v27, %v2985_v27  ;;  %v5262_v55 = vld [vmem:[#allocation8 + $0x1f8] sm:$0xf0] }
 0x3c0   : > { %v2756_v51 = vadd.f32 %v2755_v49, %v2713_v46  ;;  %v5595_v49 = vld [vmem:[#allocation8 + $0x1f4] sm:$0xf] }
 0x3c1   : > { %v6968_v43 = vadd.f32 %v2838_v3, %v2796_v6 }
 0x3c4   : > { %v2714_v44 = vpop.f32.mrf.mxu2 }
 0x3c5   : > { %v2715_v7 = vadd.f32 %v2714_v44, %v2672_v1  ;;  %v5190_v1 = vld [vmem:[#allocation8 + $0x168] sm:$0xf0] }
 0x3c6   : > { %v2798_v29 = vpop.f32.mrf.mxu0  ;;  %v5193_v27 = vor.u32 %v5577_v26, %v5190_v1  ;;  %v5254_v44 = vld [vmem:[#allocation8 + $0x1e8] sm:$0xf0] }
 0x3c7   : > { %v2757_v9 = vpop.f32.mrf.mxu3  ;;  %v2799_v61 = vadd.f32 %v2798_v29, %v2756_v51  ;;  %v2841_v38 = vpop.f32.mrf.mxu1  ;;  %v5265_v51 = vor.u32 %v5595_v49, %v5262_v55  ;;  %v5182_v49 = vld [vmem:[#allocation8 + $0x158] sm:$0xf0] }
 0x3c8   : > { %v2758_v4 = vadd.f32 %v2757_v9, %v2715_v7  ;;  %v5257_v9 = vor.u32 %v5593_v24, %v5254_v44  ;;  %3665 = vmatpush.bf16.msrb.mxu2 %v5193_v27 }
 0x3c9   : > { %v6980_v25 = vadd.f32 %v2841_v38, %v2799_v61  ;;  %3444 = vmatmul.bf16.gmra.mxu0 %v6974_v5  ;;  %3500 = vmatmul.bf16.vlgmr.msra.gmra.mxu2 %v6828_v0 }
 0x3ca   : > { %3487 = vmatmul.bf16.gmra.mxu1 %v6976_v35  ;;  %3707 = vmatpush.bf16.msrb.mxu3 %v5265_v51  ;;  %v5246_v51 = vld [vmem:[#allocation8 + $0x1d8] sm:$0xf0] }
 0x3cc   : > { %v2717_v58 = vpop.f32.mrf.mxu2 }
 0x3cd   : > { %v2718_v20 = vadd.f32 %v2717_v58, %v2675_v45  ;;  %v6995_v45 = vld [vmem:[%s7297_s4] sm:$0x3] }
 0x3ce   : > { %v2800_v37 = vpop.f32.mrf.mxu0  ;;  %3708 = vmatpush.bf16.msrb.mxu3 %v5257_v9 }
 0x3cf   : > { %v2760_v41 = vpop.f32.mrf.mxu3  ;;  %v2801_v46 = vadd.f32 %v2800_v37, %v2758_v4  ;;  %v2843_v60 = vpop.f32.mrf.mxu1 }
 0x3d0   : > { %v2761_v21 = vadd.f32 %v2760_v41, %v2718_v20 }
 0x3d1   : > { %v6985_v63 = vadd.f32 %v2843_v60, %v2801_v46 }
 0x3d4   : > { %v2719_v6 = vpop.f32.mrf.mxu2 }
 0x3d6   : > { %v2803_v15 = vpop.f32.mrf.mxu0 }
 0x3d7   : > { %v2762_v3 = vpop.f32.mrf.mxu3  ;;  %v2804_v52 = vadd.f32 %v2803_v15, %v2761_v21  ;;  %v2846_v28 = vpop.f32.mrf.mxu1 }
 0x3d9   : > { %v6987_v32 = vadd.f32 %v2846_v28, %v2804_v52  ;;  %3505 = vmatmul.bf16.gmra.mxu2 %v6840_v50  ;;  %3586 = vmatmul.bf16.vlgmr.msra.gmra.mxu0 %v7463_v33 }
 0x3da   : > { %3629 = vmatmul.bf16.vlgmr.msra.gmra.mxu1 %v7464_v10  ;;  %v6999_v10 = vperm.slane %v6995_v45, 0 }
 0x3dc   : > { %v2859_v7 = vpop.f32.mrf.mxu2 }
 0x3dd   : > { %v2860_v33 = vadd.f32 %v2859_v7, %v6909_v18  ;;  %v5575_v18 = vld [vmem:[#allocation8 + $0x154] sm:$0xf] }
 0x3de   : > { %v2805_v61 = vpop.f32.mrf.mxu0  ;;  %v5185_v55 = vor.u32 %v5575_v18, %v5182_v49 }
 0x3df   : > { %v2902_v29 = vpop.f32.mrf.mxu3  ;;  %v2848_v38 = vpop.f32.mrf.mxu1 }
 0x3e0   : > { %v2903_v30 = vadd.f32 %v2902_v29, %v2860_v33  ;;  %3666 = vmatpush.bf16.msrb.mxu2 %v5185_v55 }
 0x3e2   : > { %v2939_v21 = vmax.f32 %v2903_v30, 0.0 }
 0x3e4   : > { %v2861_v13 = vpop.f32.mrf.mxu2 }
 0x3e5   : > { %v2862_v58 = vadd.f32 %v2861_v13, %v6916_v53  ;;  %v5591_v53 = vld [vmem:[#allocation8 + $0x1d4] sm:$0xf] }
 0x3e6   : > { %v3415_v4 = vpop.f32.mrf.mxu0  ;;  %v5249_v3 = vor.u32 %v5591_v53, %v5246_v51  ;;  %v5166_v53 = vld [vmem:[#allocation8 + $0x138] sm:$0xf0] }
 0x3e7   : > { %v2904_v16 = vpop.f32.mrf.mxu3  ;;  %v3416_v41 = vadd.f32 %v3415_v4, %v6999_v10  ;;  %v3458_v37 = vpop.f32.mrf.mxu1  ;;  %v5238_v4 = vld [vmem:[#allocation8 + $0x1c8] sm:$0xf0] }
 0x3e8   : > { %v2905_v20 = vadd.f32 %v2904_v16, %v2862_v58  ;;  %3709 = vmatpush.bf16.msrb.mxu3 %v5249_v3  ;;  %v5174_v58 = vld [vmem:[#allocation8 + $0x148] sm:$0xf0] }
 0x3e9   : > { %v7003_v60 = vadd.f32 %v3458_v37, %v3416_v41  ;;  %3510 = vmatmul.bf16.gmra.mxu2 %v6852_v56  ;;  %3591 = vmatmul.bf16.gmra.mxu0 %v7465_v8 }
 0x3ea   : > { %v2943_v46 = vmax.f32 %v2905_v20, 0.0  ;;  %3634 = vmatmul.bf16.gmra.mxu1 %v7466_v19 }
 0x3ec   : > { %v7008_v6 = vpack.c.bf16 %v2943_v46, %v2939_v21  ;;  %v2864_v15 = vpop.f32.mrf.mxu2 }
 0x3ed   : > { %v2865_v1 = vadd.f32 %v2864_v15, %v6922_v62  ;;  %v5573_v62 = vld [vmem:[#allocation8 + $0x144] sm:$0xf] }
 0x3ee   : > { %3543 = vmatmul.bf16.vlgmr.msra.gmra.mxu3 %v7008_v6  ;;  %v3417_v28 = vpop.f32.mrf.mxu0  ;;  %v5177_v16 = vor.u32 %v5573_v62, %v5174_v58 }
 0x3ef   : > { %v2907_v52 = vpop.f32.mrf.mxu3  ;;  %v3418_v26 = vadd.f32 %v3417_v28, %v6999_v10  ;;  %v3460_v8 = vpop.f32.mrf.mxu1 }
 0x3f0   : > { %v2908_v27 = vadd.f32 %v2907_v52, %v2865_v1  ;;  %3667 = vmatpush.bf16.msrb.mxu2 %v5177_v16 }
 0x3f1   : > { %v7013_v24 = vadd.f32 %v3460_v8, %v3418_v26 }
 0x3f2   : > { %v2947_v33 = vmax.f32 %v2908_v27, 0.0 }
 0x3f4   : > { %v2866_v19 = vpop.f32.mrf.mxu2 }
 0x3f5   : > { %v2867_v44 = vadd.f32 %v2866_v19, %v6929_v59  ;;  %v5589_v59 = vld [vmem:[#allocation8 + $0x1c4] sm:$0xf] }
 0x3f6   : > { %v3420_v9 = vpop.f32.mrf.mxu0  ;;  %v5241_v41 = vor.u32 %v5589_v59, %v5238_v4  ;;  %v5150_v59 = vld [vmem:[#allocation8 + $0x118] sm:$0xf0] }
 0x3f7   : > { %v2909_v7 = vpop.f32.mrf.mxu3  ;;  %v3421_v61 = vadd.f32 %v3420_v9, %v6999_v10  ;;  %v3463_v38 = vpop.f32.mrf.mxu1  ;;  %v5230_v9 = vld [vmem:[#allocation8 + $0x1b8] sm:$0xf0] }
 0x3f8   : > { %v2910_v29 = vadd.f32 %v2909_v7, %v2867_v44  ;;  %3710 = vmatpush.bf16.msrb.mxu3 %v5241_v41  ;;  %v5585_v41 = vld [vmem:[#allocation8 + $0x1a4] sm:$0xf] }
 0x3f9   : > { %v7017_v30 = vadd.f32 %v3463_v38, %v3421_v61  ;;  %3515 = vmatmul.bf16.gmra.mxu2 %v6864_v11  ;;  %3596 = vmatmul.bf16.gmra.mxu0 %v7467_v40  ;;  %v5569_v38 = vld [vmem:[#allocation8 + $0x124] sm:$0xf] }
 0x3fa   : > { %v2951_v13 = vmax.f32 %v2910_v29, 0.0  ;;  %3639 = vmatmul.bf16.gmra.mxu1 %v7468_v42  ;;  %v5571_v42 = vld [vmem:[#allocation8 + $0x134] sm:$0xf] }
 0x3fb   : > { %v5169_v51 = vor.u32 %v5571_v42, %v5166_v53 }
 0x3fc   : > { %v7022_v20 = vpack.c.bf16 %v2951_v13, %v2947_v33  ;;  %v2869_v37 = vpop.f32.mrf.mxu2  ;;  %v5158_v33 = vld [vmem:[#allocation8 + $0x128] sm:$0xf0] }
 0x3fd   : > { %v2870_v49 = vadd.f32 %v2869_v37, %v6935_v48  ;;  %3668 = vmatpush.bf16.msrb.mxu2 %v5169_v51  ;;  %v5587_v48 = vld [vmem:[#allocation8 + $0x1b4] sm:$0xf]  ;;  %v5161_v62 = vor.u32 %v5569_v38, %v5158_v33  ;;  %v5222_v37 = vld [vmem:[#allocation8 + $0x1a8] sm:$0xf0] }
 0x3fe   : > { %3548 = vmatmul.bf16.gmra.mxu3 %v7022_v20  ;;  %v3422_v46 = vpop.f32.mrf.mxu0  ;;  %v5233_v29 = vor.u32 %v5587_v48, %v5230_v9  ;;  %v2986_v9 = vmax.f32 %v6894_v31, 0.0 }
 0x3ff   : > { %v2912_v21 = vpop.f32.mrf.mxu3  ;;  %v3423_v18 = vadd.f32 %v3422_v46, %v6999_v10  ;;  %v3465_v40 = vpop.f32.mrf.mxu1 }
 0x400   : > { %v2913_v15 = vadd.f32 %v2912_v21, %v2870_v49  ;;  %3711 = vmatpush.bf16.msrb.mxu3 %v5233_v29  ;;  %v5225_v21 = vor.u32 %v5585_v41, %v5222_v37  ;;  %v5583_v29 = vld [vmem:[#allocation8 + $0x194] sm:$0xf] }
 0x401   : > { %v7027_v55 = vadd.f32 %v3465_v40, %v3423_v18  ;;  %3669 = vmatpush.bf16.msrb.mxu2 %v5161_v62  ;;  %v5565_v18 = vld [vmem:[#allocation8 + $0x104] sm:$0xf]  ;;  %v5142_v40 = vld [vmem:[#allocation8 + $0x108] sm:$0xf0] }
 0x402   : > { %v2955_v27 = vmax.f32 %v2913_v15, 0.0  ;;  %v5145_v51 = vor.u32 %v5565_v18, %v5142_v40  ;;  %v5581_v40 = vld [vmem:[#allocation8 + $0x184] sm:$0xf] }
 0x404   : > { %v2871_v3 = vpop.f32.mrf.mxu2  ;;  %3712 = vmatpush.bf16.msrb.mxu3 %v5225_v21 }
 0x405   : > { %v2872_v52 = vadd.f32 %v2871_v3, %v6942_v14 }
 0x406   : > { %v3425_v26 = vpop.f32.mrf.mxu0 }
 0x407   : > { %v2914_v28 = vpop.f32.mrf.mxu3  ;;  %v3426_v1 = vadd.f32 %v3425_v26, %v6999_v10  ;;  %v3468_v19 = vpop.f32.mrf.mxu1 }
 0x408   : > { %v2915_v8 = vadd.f32 %v2914_v28, %v2872_v52 }
 0x409   : > { %v7031_v7 = vadd.f32 %v3468_v19, %v3426_v1  ;;  %3520 = vmatmul.bf16.gmra.mxu2 %v6876_v22  ;;  %3601 = vmatmul.bf16.gmra.mxu0 %v7470_v2  ;;  %v5567_v2 = vld [vmem:[#allocation8 + $0x114] sm:$0xf] }
 0x40a   : > { %v2959_v44 = vmax.f32 %v2915_v8, 0.0  ;;  %3644 = vmatmul.bf16.gmra.mxu1 %v7472_v57  ;;  %v5153_v4 = vor.u32 %v5567_v2, %v5150_v59  ;;  %v7061_v2 = vpack.c.bf16 %v2986_v9, %v2986_v9 }
 0x40c   : > { %v7036_v14 = vpack.c.bf16 %v2959_v44, %v2955_v27  ;;  %v2874_v61 = vpop.f32.mrf.mxu2  ;;  %3670 = vmatpush.bf16.msrb.mxu2 %v5153_v4 }
 0x40d   : > { %v2875_v57 = vadd.f32 %v2874_v61, %v6948_v36  ;;  %v5214_v61 = vld [vmem:[#allocation8 + $0x198] sm:$0xf0] }
 0x40e   : > { %3553 = vmatmul.bf16.gmra.mxu3 %v7036_v14  ;;  %v7039_v58 = vpop.f32.mrf.mxu0 }
 0x40f   : > { %v2917_v13 = vpop.f32.mrf.mxu3  ;;  %v7041_v16 = vpop.f32.mrf.mxu1 }
 0x410   : > { %v2918_v49 = vadd.f32 %v2917_v13, %v2875_v57  ;;  %3671 = vmatpush.bf16.msrb.mxu2 %v5145_v51 }
 0x412   : > { %v2963_v36 = vmax.f32 %v2918_v49, 0.0  ;;  %v5206_v49 = vld [vmem:[#allocation8 + $0x188] sm:$0xf0] }
 0x414   : > { %v2876_v46 = vpop.f32.mrf.mxu2 }
 0x415   : > { %v2877_v42 = vadd.f32 %v2876_v46, %v6955_v54 }
 0x416   : > { %v3430_v3 = vpop.f32.mrf.mxu0 }
 0x417   : > { %v2919_v53 = vpop.f32.mrf.mxu3  ;;  %v3431_v52 = vadd.f32 %v3430_v3, %v6999_v10  ;;  %v3473_v28 = vpop.f32.mrf.mxu1 }
 0x418   : > { %v2920_v15 = vadd.f32 %v2919_v53, %v2877_v42  ;;  %v5209_v42 = vor.u32 %v5581_v40, %v5206_v49  ;;  %v7100_v40 = vperm.slane %v6995_v45, 1  ;;  %v5599_v49 = vld [vmem:[#allocation10 + $0x10] sm:$0xff] }
 0x419   : > { %v7046_v8 = vadd.f32 %v3473_v28, %v3431_v52  ;;  %3525 = vmatmul.bf16.gmra.mxu2 %v6889_v23  ;;  %3606 = vmatmul.bf16.gmra.mxu0 %v7474_v34  ;;  %v5217_v34 = vor.u32 %v5583_v29, %v5214_v61 }
 0x41a   : > { %v2967_v26 = vmax.f32 %v2920_v15, 0.0  ;;  %3649 = vmatmul.bf16.gmra.mxu1 %v7475_v39 }
 0x41b   : > { %3713 = vmatpush.bf16.msrb.mxu3 %v5217_v34 }
 0x41c   : > { %v7051_v1 = vpack.c.bf16 %v2967_v26, %v2963_v36  ;;  %v2879_v54 = vpop.f32.mrf.mxu2 }
 0x41d   : > { %v2880_v48 = vadd.f32 %v2879_v54, %v6961_v17 }
 0x41e   : > { %3558 = vmatmul.bf16.gmra.mxu3 %v7051_v1  ;;  %v7054_v27 = vpop.f32.mrf.mxu0 }
 0x41f   : > { %v2922_v19 = vpop.f32.mrf.mxu3  ;;  %v7056_v44 = vpop.f32.mrf.mxu1  ;;  %3714 = vmatpush.bf16.msrb.mxu3 %v5209_v42 }
 0x420   : > { %v2923_v33 = vadd.f32 %v2922_v19, %v2880_v48 }
 0x422   : > { %v2971_v41 = vmax.f32 %v2923_v33, 0.0 }
 0x424   : > { %v2881_v38 = vpop.f32.mrf.mxu2 }
 0x425   : > { %v2882_v39 = vadd.f32 %v2881_v38, %v6968_v43  ;;  %v5604_v38 = vld [vmem:[#allocation10 + $0x38] sm:$0xff] }
 0x426   : > { %v3435_v62 = vpop.f32.mrf.mxu0  ;;  %3922 = vmatpush.bf16.msrb.mxu0 %v5604_v38 }
 0x427   : > { %v2924_v13 = vpop.f32.mrf.mxu3  ;;  %v3436_v57 = vadd.f32 %v3435_v62, %v6999_v10  ;;  %v3478_v4 = vpop.f32.mrf.mxu1 }
 0x428   : > { %v2925_v59 = vadd.f32 %v2924_v13, %v2882_v39 }
 0x429   : > { %v7064_v37 = vadd.f32 %v3478_v4, %v3436_v57  ;;  %3530 = vmatmul.bf16.gmra.mxu2 %v7061_v2  ;;  %3611 = vmatmul.bf16.gmra.mxu0 %v7476_v47  ;;  %v5601_v4 = vld [vmem:[#allocation10 + $0x20] sm:$0xff] }
 0x42a   : > { %v2975_v17 = vmax.f32 %v2925_v59, 0.0  ;;  %3654 = vmatmul.bf16.gmra.mxu1 %v7477_v12  ;;  %v5602_v59 = vld [vmem:[#allocation10 + $0x28] sm:$0xff] }
 0x42c   : > { %v7069_v31 = vpack.c.bf16 %v2975_v17, %v2971_v41  ;;  %v2884_v43 = vpop.f32.mrf.mxu2 }
 0x42d   : > { %v2885_v53 = vadd.f32 %v2884_v43, %v6980_v25 }
 0x42e   : > { %3563 = vmatmul.bf16.gmra.mxu3 %v7069_v31  ;;  %v7072_v46 = vpop.f32.mrf.mxu0 }
 0x42f   : > { %v2927_v21 = vpop.f32.mrf.mxu3  ;;  %v7074_v18 = vpop.f32.mrf.mxu1 }
 0x430   : > { %v2928_v47 = vadd.f32 %v2927_v21, %v2885_v53  ;;  %v5600_v21 = vld [vmem:[#allocation10 + $0x18] sm:$0xff] }
 0x432   : > { %v2979_v26 = vmax.f32 %v2928_v47, 0.0  ;;  %v5598_v47 = vld [vmem:[#allocation10 + $0x8] sm:$0xff] }
 0x434   : > { %v2886_v51 = vpop.f32.mrf.mxu2 }
 0x435   : > { %v2887_v12 = vadd.f32 %v2886_v51, %v6985_v63 }
 0x436   : > { %v3440_v15 = vpop.f32.mrf.mxu0 }
 0x437   : > { %v2929_v3 = vpop.f32.mrf.mxu3  ;;  %v3441_v28 = vadd.f32 %v3440_v15, %v6999_v10  ;;  %v3483_v36 = vpop.f32.mrf.mxu1 }
 0x438   : > { %v2930_v52 = vadd.f32 %v2929_v3, %v2887_v12  ;;  %v5597_v3 = vld [vmem:[#allocation10] sm:$0xff] }
 0x439   : > { %v7079_v19 = vadd.f32 %v3483_v36, %v3441_v28  ;;  %3616 = vmatmul.bf16.gmra.mxu0 %v6974_v5  ;;  %3672 = vmatmul.bf16.vlgmr.msrb.gmra.mxu2 %v6828_v0  ;;  %v5603_v5 = vld [vmem:[#allocation10 + $0x30] sm:$0xff]  ;;  %v5612_v28 = vld [vmem:[#allocation10 + $0x78] sm:$0xff] }
 0x43a   : > { %v2983_v54 = vmax.f32 %v2930_v52, 0.0  ;;  %3659 = vmatmul.bf16.gmra.mxu1 %v6976_v35  ;;  %3923 = vmatpush.bf16.msrb.mxu0 %v5603_v5 }
 0x43b   : > { %3965 = vmatpush.bf16.msrb.mxu1 %v5612_v28 }
 0x43c   : > { %v7084_v25 = vpack.c.bf16 %v2983_v54, %v2979_v26  ;;  %v2889_v48 = vpop.f32.mrf.mxu2 }
 0x43d   : > { %v2890_v29 = vadd.f32 %v2889_v48, %v6987_v32 }
 0x43e   : > { %3568 = vmatmul.bf16.gmra.mxu3 %v7084_v25  ;;  %v7087_v9 = vpop.f32.mrf.mxu0  ;;  %3924 = vmatpush.bf16.msrb.mxu0 %v5602_v59 }
 0x43f   : > { %v2932_v63 = vpop.f32.mrf.mxu3  ;;  %v7090_v61 = vpop.f32.mrf.mxu1 }
 0x440   : > { %v2933_v34 = vadd.f32 %v2932_v63, %v2890_v29 }
 0x442   : > { %v2987_v39 = vmax.f32 %v2933_v34, 0.0  ;;  %3925 = vmatpush.bf16.msrb.mxu0 %v5601_v4 }
 0x444   : > { %v2891_v33 = vpop.f32.mrf.mxu2  ;;  %v7096_v32 = vpack.c.bf16 %v2987_v39, %v2987_v39 }
 0x446   : > { %v3445_v35 = vpop.f32.mrf.mxu0  ;;  %3926 = vmatpush.bf16.msrb.mxu0 %v5600_v21 }
 0x447   : > { %v2934_v0 = vpop.f32.mrf.mxu3  ;;  %v3446_v13 = vadd.f32 %v3445_v35, %v6999_v10  ;;  %v3488_v62 = vpop.f32.mrf.mxu1 }
 0x449   : > { %v7093_v57 = vadd.f32 %v3488_v62, %v3446_v13  ;;  %3677 = vmatmul.bf16.gmra.mxu2 %v6840_v50 }
 0x44a   : > { %3927 = vmatpush.bf16.msrb.mxu0 %v5599_v49 }
 0x44c   : > { %v3501_v41 = vpop.f32.mrf.mxu2 }
 0x44d   : > { %v3502_v33 = vadd.f32 %v3501_v41, %v7003_v60  ;;  %v5610_v60 = vld [vmem:[#allocation10 + $0x68] sm:$0xff] }
 0x44e   : > { %3573 = vmatmul.bf16.gmra.mxu3 %v7096_v32  ;;  %v3447_v17 = vpop.f32.mrf.mxu0  ;;  %3928 = vmatpush.bf16.msrb.mxu0 %v5598_v47 }
 0x44f   : > { %v3490_v43 = vpop.f32.mrf.mxu1 }
 0x452   : > { %3929 = vmatpush.bf16.msrb.mxu0 %v5597_v3 }
 0x454   : > { %v3503_v42 = vpop.f32.mrf.mxu2 }
 0x455   : > { %v3504_v35 = vadd.f32 %v3503_v42, %v7013_v24 }
 0x456   : > { %v3587_v53 = vpop.f32.mrf.mxu0 }
 0x457   : > { %v3588_v50 = vadd.f32 %v3587_v53, %v7100_v40  ;;  %v3630_v51 = vpop.f32.mrf.mxu1 }
 0x459   : > { %v7103_v12 = vadd.f32 %v3630_v51, %v3588_v50  ;;  %3682 = vmatmul.bf16.gmra.mxu2 %v6852_v56 }
 0x45c   : > { %v3506_v15 = vpop.f32.mrf.mxu2 }
 0x45e   : > { %3715 = vmatmul.bf16.vlgmr.msrb.gmra.mxu3 %v7008_v6  ;;  %v7107_v45 = vpop.f32.mrf.mxu0  ;;  %v5611_v6 = vld [vmem:[#allocation10 + $0x70] sm:$0xff] }
 0x45f   : > { %v7109_v52 = vpop.f32.mrf.mxu1  ;;  %3966 = vmatpush.bf16.msrb.mxu1 %v5611_v6 }
 0x463   : > { %3967 = vmatpush.bf16.msrb.mxu1 %v5610_v60 }
 0x464   : > { %v3508_v36 = vpop.f32.mrf.mxu2 }
 0x465   : > { %v3509_v47 = vadd.f32 %v3508_v36, %v7027_v55 }
 0x466   : > { %v3592_v26 = vpop.f32.mrf.mxu0 }
 0x467   : > { %v3593_v54 = vadd.f32 %v3592_v26, %v7100_v40  ;;  %v3635_v48 = vpop.f32.mrf.mxu1 }
 0x469   : > { %v7112_v63 = vadd.f32 %v3635_v48, %v3593_v54  ;;  %3687 = vmatmul.bf16.gmra.mxu2 %v6864_v11 }
 0x46c   : > { %v3511_v56 = vpop.f32.mrf.mxu2 }
 0x46e   : > { %3720 = vmatmul.bf16.gmra.mxu3 %v7022_v20  ;;  %v7116_v29 = vpop.f32.mrf.mxu0 }
 0x46f   : > { %v7118_v38 = vpop.f32.mrf.mxu1 }
 0x471   : > { %v3544_v34 = vpop.f32.mrf.mxu3 }
 0x472   : > { %v3545_v39 = vadd.f32 %v3544_v34, %v3502_v33 }
 0x474   : > { %v3513_v5 = vpop.f32.mrf.mxu2  ;;  %v3750_v4 = vmax.f32 %v3545_v39, 0.0  ;;  %v3428_v39 = vadd.f32 %v7039_v58, %v6999_v10  ;;  %v5608_v58 = vld [vmem:[#allocation10 + $0x58] sm:$0xff] }
 0x476   : > { %v3597_v0 = vpop.f32.mrf.mxu0 }
 0x477   : > { %v3598_v13 = vadd.f32 %v3597_v0, %v7100_v40  ;;  %v3640_v11 = vpop.f32.mrf.mxu1 }
 0x479   : > { %v3546_v62 = vpop.f32.mrf.mxu3  ;;  %v7123_v59 = vadd.f32 %v3640_v11, %v3598_v13  ;;  %3692 = vmatmul.bf16.gmra.mxu2 %v6876_v22  ;;  %v3507_v22 = vadd.f32 %v3506_v15, %v7017_v30  ;;  %v5609_v15 = vld [vmem:[#allocation10 + $0x60] sm:$0xff]  ;;  %v3471_v11 = vadd.f32 %v7041_v16, %v3428_v39 }
 0x47a   : > { %v3547_v20 = vadd.f32 %v3546_v62, %v3504_v35  ;;  %3968 = vmatpush.bf16.msrb.mxu1 %v5609_v15  ;;  %v3512_v62 = vadd.f32 %v3511_v56, %v7031_v7 }
 0x47c   : > { %v3752_v17 = vmax.f32 %v3547_v20, 0.0  ;;  %v7126_v43 = vpop.f32.mrf.mxu2  ;;  %v3514_v20 = vadd.f32 %v3513_v5, %v3471_v11  ;;  %v3438_v11 = vadd.f32 %v7072_v46, %v6999_v10 }
 0x47e   : > { %v3776_v21 = vpack.c.bf16 %v3752_v17, %v3750_v4  ;;  %3725 = vmatmul.bf16.gmra.mxu3 %v7036_v14  ;;  %v3599_v41 = vpop.f32.mrf.mxu0  ;;  %3969 = vmatpush.bf16.msrb.mxu1 %v5608_v58 }
 0x47f   : > { %v3600_v24 = vadd.f32 %v3599_v41, %v7100_v40  ;;  %v3642_v49 = vpop.f32.mrf.mxu1 }
 0x480   : > { %3930 = vmatmul.bf16.vlgmr.msrb.gmra.mxu0 %v3776_v21 }
 0x481   : > { %v3549_v42 = vpop.f32.mrf.mxu3  ;;  %v7130_v53 = vadd.f32 %v3642_v49, %v3600_v24 }
 0x482   : > { %v3550_v3 = vadd.f32 %v3549_v42, %v3507_v22 }
 0x484   : > { %v3518_v50 = vpop.f32.mrf.mxu2  ;;  %v3754_v6 = vmax.f32 %v3550_v3, 0.0 }
 0x486   : > { %v3602_v51 = vpop.f32.mrf.mxu0 }
 0x487   : > { %v3603_v28 = vadd.f32 %v3602_v51, %v7100_v40  ;;  %v3645_v14 = vpop.f32.mrf.mxu1 }
 0x489   : > { %v3551_v26 = vpop.f32.mrf.mxu3  ;;  %v7135_v54 = vadd.f32 %v3645_v14, %v3603_v28  ;;  %3697 = vmatmul.bf16.gmra.mxu2 %v6889_v23  ;;  %v3517_v14 = vadd.f32 %v7126_v43, %v7046_v8 }
 0x48a   : > { %v3552_v48 = vadd.f32 %v3551_v26, %v3509_v47  ;;  %v3433_v47 = vadd.f32 %v7054_v27, %v6999_v10  ;;  %v5607_v26 = vld [vmem:[#allocation10 + $0x50] sm:$0xff] }
 0x48b   : > { %3970 = vmatpush.bf16.msrb.mxu1 %v5607_v26 }
 0x48c   : > { %v3756_v34 = vmax.f32 %v3552_v48, 0.0  ;;  %v7138_v33 = vpop.f32.mrf.mxu2  ;;  %v3476_v28 = vadd.f32 %v7056_v44, %v3433_v47 }
 0x48e   : > { %3730 = vmatmul.bf16.gmra.mxu3 %v7051_v1  ;;  %v3778_v30 = vpack.c.bf16 %v3756_v34, %v3754_v6  ;;  %v3604_v0 = vpop.f32.mrf.mxu0 }
 0x48f   : > { %v3605_v55 = vadd.f32 %v3604_v0, %v7100_v40  ;;  %v3647_v36 = vpop.f32.mrf.mxu1 }
 0x490   : > { %3935 = vmatmul.bf16.gmra.mxu0 %v3778_v30 }
 0x491   : > { %v3554_v35 = vpop.f32.mrf.mxu3  ;;  %v7144_v13 = vadd.f32 %v3647_v36, %v3605_v55 }
 0x492   : > { %v3555_v4 = vadd.f32 %v3554_v35, %v3512_v62 }
 0x494   : > { %v3523_v23 = vpop.f32.mrf.mxu2  ;;  %v3758_v49 = vmax.f32 %v3555_v4, 0.0  ;;  %v3522_v4 = vadd.f32 %v7138_v33, %v7064_v37 }
 0x496   : > { %v3607_v1 = vpop.f32.mrf.mxu0 }
 0x497   : > { %v3608_v17 = vadd.f32 %v3607_v1, %v7100_v40  ;;  %v3650_v21 = vpop.f32.mrf.mxu1 }
 0x499   : > { %v3556_v60 = vpop.f32.mrf.mxu3  ;;  %v7149_v41 = vadd.f32 %v3650_v21, %v3608_v17  ;;  %3702 = vmatmul.bf16.gmra.mxu2 %v7061_v2  ;;  %v5606_v17 = vld [vmem:[#allocation10 + $0x48] sm:$0xff] }
 0x49a   : > { %v3557_v24 = vadd.f32 %v3556_v60, %v3514_v20  ;;  %v3481_v20 = vadd.f32 %v7074_v18, %v3438_v11  ;;  %3971 = vmatpush.bf16.msrb.mxu1 %v5606_v17 }
 0x49c   : > { %v3760_v42 = vmax.f32 %v3557_v24, 0.0  ;;  %v3526_v22 = vpop.f32.mrf.mxu2 }
 0x49e   : > { %v3780_v16 = vpack.c.bf16 %v3760_v42, %v3758_v49  ;;  %3735 = vmatmul.bf16.gmra.mxu3 %v7069_v31  ;;  %v3609_v7 = vpop.f32.mrf.mxu0  ;;  %v3519_v31 = vadd.f32 %v3518_v50, %v3476_v28 }
 0x49f   : > { %v3610_v56 = vadd.f32 %v3609_v7, %v7100_v40  ;;  %v3652_v5 = vpop.f32.mrf.mxu1 }
 0x4a0   : > { %3940 = vmatmul.bf16.gmra.mxu0 %v3780_v16 }
 0x4a1   : > { %v3559_v51 = vpop.f32.mrf.mxu3  ;;  %v7156_v3 = vadd.f32 %v3652_v5, %v3610_v56 }
 0x4a2   : > { %v3560_v6 = vadd.f32 %v3559_v51, %v3517_v14  ;;  %v5605_v51 = vld [vmem:[#allocation10 + $0x40] sm:$0xff]  ;;  %v3527_v14 = vadd.f32 %v3526_v22, %v7079_v19  ;;  %v3590_v22 = vadd.f32 %v7107_v45, %v7100_v40 }
 0x4a3   : > { %3972 = vmatpush.bf16.msrb.mxu1 %v5605_v51 }
 0x4a4   : > { %v3528_v2 = vpop.f32.mrf.mxu2  ;;  %v3762_v55 = vmax.f32 %v3560_v6, 0.0 }
 0x4a6   : > { %v3612_v48 = vpop.f32.mrf.mxu0 }
 0x4a7   : > { %v3613_v34 = vadd.f32 %v3612_v48, %v7100_v40  ;;  %v3655_v30 = vpop.f32.mrf.mxu1 }
 0x4a9   : > { %v3561_v15 = vpop.f32.mrf.mxu3  ;;  %v7162_v0 = vadd.f32 %v3655_v30, %v3613_v34 }
 0x4aa   : > { %v3562_v27 = vadd.f32 %v3561_v15, %v3519_v31 }
 0x4ac   : > { %v3764_v36 = vmax.f32 %v3562_v27, 0.0  ;;  %v3531_v35 = vpop.f32.mrf.mxu2 }
 0x4ae   : > { %v3782_v39 = vpack.c.bf16 %v3764_v36, %v3762_v55  ;;  %3740 = vmatmul.bf16.gmra.mxu3 %v7084_v25  ;;  %v3614_v44 = vpop.f32.mrf.mxu0  ;;  %v3524_v25 = vadd.f32 %v3523_v23, %v3481_v20  ;;  %v3443_v23 = vadd.f32 %v7087_v9, %v6999_v10  ;;  %v3532_v55 = vadd.f32 %v3531_v35, %v7093_v57 }
 0x4af   : > { %v3615_v8 = vadd.f32 %v3614_v44, %v7100_v40  ;;  %v3657_v43 = vpop.f32.mrf.mxu1 }
 0x4b0   : > { %3945 = vmatmul.bf16.gmra.mxu0 %v3782_v39  ;;  %v3486_v28 = vadd.f32 %v7090_v61, %v3443_v23 }
 0x4b1   : > { %v3564_v50 = vpop.f32.mrf.mxu3  ;;  %v7168_v62 = vadd.f32 %v3657_v43, %v3615_v8  ;;  %v3633_v8 = vadd.f32 %v7109_v52, %v3590_v22 }
 0x4b2   : > { %v3565_v60 = vadd.f32 %v3564_v50, %v3522_v4  ;;  %v3529_v26 = vadd.f32 %v3528_v2, %v3486_v28 }
 0x4b4   : > { %v3533_v1 = vpop.f32.mrf.mxu2  ;;  %v3766_v16 = vmax.f32 %v3565_v60, 0.0 }
 0x4b6   : > { %v3617_v21 = vpop.f32.mrf.mxu0 }
 0x4b7   : > { %v3618_v24 = vadd.f32 %v3617_v21, %v7100_v40  ;;  %v3660_v58 = vpop.f32.mrf.mxu1 }
 0x4b9   : > { %v3566_v49 = vpop.f32.mrf.mxu3  ;;  %v7174_v42 = vadd.f32 %v3660_v58, %v3618_v24 }
 0x4ba   : > { %v3567_v46 = vadd.f32 %v3566_v49, %v3524_v25  ;;  %v3595_v25 = vadd.f32 %v7116_v29, %v7100_v40 }
 0x4bc   : > { %v3768_v7 = vmax.f32 %v3567_v46, 0.0  ;;  %v3673_v56 = vpop.f32.mrf.mxu2  ;;  %v3638_v45 = vadd.f32 %v7118_v38, %v3595_v25 }
 0x4bd   : > { %v3674_v43 = vadd.f32 %v3673_v56, %v7103_v12 }
 0x4be   : > { %v3784_v5 = vpack.c.bf16 %v3768_v7, %v3766_v16  ;;  %3745 = vmatmul.bf16.gmra.mxu3 %v7096_v32  ;;  %v3619_v18 = vpop.f32.mrf.mxu0 }
 0x4bf   : > { %v3662_v37 = vpop.f32.mrf.mxu1 }
 0x4c0   : > { %3950 = vmatmul.bf16.gmra.mxu0 %v3784_v5 }
 0x4c1   : > { %v3569_v33 = vpop.f32.mrf.mxu3 }
 0x4c2   : > { %v3570_v48 = vadd.f32 %v3569_v33, %v3527_v14 }
 0x4c4   : > { %v3675_v47 = vpop.f32.mrf.mxu2  ;;  %v3770_v34 = vmax.f32 %v3570_v48, 0.0 }
 0x4c5   : > { %v3676_v50 = vadd.f32 %v3675_v47, %v3633_v8 }
 0x4c9   : > { %v3571_v31 = vpop.f32.mrf.mxu3 }
 0x4ca   : > { %v3572_v6 = vadd.f32 %v3571_v31, %v3529_v26 }
 0x4cc   : > { %v3772_v32 = vmax.f32 %v3572_v6, 0.0  ;;  %v3678_v30 = vpop.f32.mrf.mxu2 }
 0x4cd   : > { %v3679_v52 = vadd.f32 %v3678_v30, %v7112_v63 }
 0x4ce   : > { %v3786_v15 = vpack.c.bf16 %v3772_v32, %v3770_v34 }
 0x4d0   : > { %3955 = vmatmul.bf16.gmra.mxu0 %v3786_v15 }
 0x4d1   : > { %v3574_v27 = vpop.f32.mrf.mxu3 }
 0x4d2   : > { %v3575_v9 = vadd.f32 %v3574_v27, %v3532_v55 }
 0x4d4   : > { %v3680_v10 = vpop.f32.mrf.mxu2  ;;  %v3774_v39 = vmax.f32 %v3575_v9, 0.0 }
 0x4d5   : > { %v3681_v24 = vadd.f32 %v3680_v10, %v3638_v45 }
 0x4d6   : > { %v3788_v44 = vpack.c.bf16 %v3774_v39, %v3774_v39 }
 0x4d9   : > { %v3576_v36 = vpop.f32.mrf.mxu3 }
 0x4dc   : > { %v3683_v61 = vpop.f32.mrf.mxu2 }
 0x4dd   : > { %v3684_v40 = vadd.f32 %v3683_v61, %v7123_v59 }
 0x4e0   : > { %3960 = vmatmul.bf16.gmra.mxu0 %v3788_v44 }
 0x4e1   : > { %v3716_v19 = vpop.f32.mrf.mxu3 }
 0x4e2   : > { %v3717_v11 = vadd.f32 %v3716_v19, %v3674_v43 }
 0x4e4   : > { %v3685_v2 = vpop.f32.mrf.mxu2  ;;  %v3751_v35 = vmax.f32 %v3717_v11, 0.0 }
 0x4e5   : > { %v3686_v29 = vadd.f32 %v3685_v2, %v7130_v53 }
 0x4e9   : > { %v3718_v1 = vpop.f32.mrf.mxu3 }
 0x4ea   : > { %v3719_v57 = vadd.f32 %v3718_v1, %v3676_v50 }
 0x4ec   : > { %v3753_v20 = vmax.f32 %v3719_v57, 0.0  ;;  %v3688_v4 = vpop.f32.mrf.mxu2 }
 0x4ed   : > { %v3689_v34 = vadd.f32 %v3688_v4, %v7135_v54 }
 0x4ee   : > { %v3777_v17 = vpack.c.bf16 %v3753_v20, %v3751_v35 }
 0x4f0   : > { %3973 = vmatmul.bf16.vlgmr.msrb.gmra.mxu1 %v3777_v17 }
 0x4f1   : > { %v3721_v21 = vpop.f32.mrf.mxu3 }
 0x4f2   : > { %v3722_v12 = vadd.f32 %v3721_v21, %v3679_v52 }
 0x4f4   : > { %v3690_v60 = vpop.f32.mrf.mxu2  ;;  %v3755_v46 = vmax.f32 %v3722_v12, 0.0 }
 0x4f5   : > { %v3691_v59 = vadd.f32 %v3690_v60, %v7144_v13 }
 0x4f9   : > { %v3723_v58 = vpop.f32.mrf.mxu3 }
 0x4fa   : > { %v3724_v49 = vadd.f32 %v3723_v58, %v3681_v24 }
 0x4fc   : > { %v3757_v16 = vmax.f32 %v3724_v49, 0.0  ;;  %v3693_v7 = vpop.f32.mrf.mxu2 }
 0x4fd   : > { %v7190_v56 = vpop.f32.mrf.mxu0  ;;  %v3694_v44 = vadd.f32 %v3693_v7, %v7149_v41 }
 0x4fe   : > { %v3779_v5 = vpack.c.bf16 %v3757_v16, %v3755_v46 }
 0x500   : > { %3978 = vmatmul.bf16.gmra.mxu1 %v3779_v5  ;;  %v5760_v5 = vld [vmem:[%s7299_s6] ss:$0 sm:$0xff] }
 0x501   : > { %v3726_v18 = vpop.f32.mrf.mxu3 }
 0x502   : > { %v3727_v63 = vadd.f32 %v3726_v18, %v3684_v40  ;;  %v3932_v18 = vadd.f32 %v5760_v5, %v7190_v56 }
 0x504   : > { %v3695_v37 = vpop.f32.mrf.mxu2  ;;  %v3759_v51 = vmax.f32 %v3727_v63, 0.0 }
 0x505   : > { %v7192_v33 = vpop.f32.mrf.mxu0  ;;  %v3696_v19 = vadd.f32 %v3695_v37, %v7156_v3 }
 0x509   : > { %v3728_v38 = vpop.f32.mrf.mxu3 }
 0x50a   : > { %v3729_v23 = vadd.f32 %v3728_v38, %v3686_v29 }
 0x50c   : > { %v3761_v47 = vmax.f32 %v3729_v23, 0.0  ;;  %v3698_v28 = vpop.f32.mrf.mxu2 }
 0x50d   : > { %v7196_v14 = vpop.f32.mrf.mxu0  ;;  %v3699_v57 = vadd.f32 %v3698_v28, %v7162_v0 }
 0x50e   : > { %v3781_v26 = vpack.c.bf16 %v3761_v47, %v3759_v51  ;;  %v3937_v47 = vadd.f32 %v5760_v5, %v7196_v14 }
 0x510   : > { %3983 = vmatmul.bf16.gmra.mxu1 %v3781_v26 }
 0x511   : > { %v3731_v48 = vpop.f32.mrf.mxu3 }
 0x512   : > { %v3732_v32 = vadd.f32 %v3731_v48, %v3689_v34 }
 0x514   : > { %v3700_v31 = vpop.f32.mrf.mxu2  ;;  %v3763_v15 = vmax.f32 %v3732_v32, 0.0 }
 0x515   : > { %v7198_v6 = vpop.f32.mrf.mxu0  ;;  %v3701_v35 = vadd.f32 %v3700_v31, %v7168_v62 }
 0x516   : > { %v3939_v28 = vadd.f32 %v5760_v5, %v7198_v6 }
 0x519   : > { %v3733_v53 = vpop.f32.mrf.mxu3 }
 0x51a   : > { %v3734_v30 = vadd.f32 %v3733_v53, %v3691_v59 }
 0x51c   : > { %v3765_v27 = vmax.f32 %v3734_v30, 0.0  ;;  %v3703_v55 = vpop.f32.mrf.mxu2 }
 0x51d   : > { %v7202_v10 = vpop.f32.mrf.mxu0  ;;  %v3704_v45 = vadd.f32 %v3703_v55, %v7174_v42  ;;  %v3934_v42 = vadd.f32 %v5760_v5, %v7192_v33 }
 0x51e   : > { %v3783_v9 = vpack.c.bf16 %v3765_v27, %v3763_v15  ;;  %v3942_v32 = vadd.f32 %v5760_v5, %v7202_v10 }
 0x520   : > { %3988 = vmatmul.bf16.gmra.mxu1 %v3783_v9 }
 0x521   : > { %v3736_v36 = vpop.f32.mrf.mxu3 }
 0x522   : > { %v3737_v54 = vadd.f32 %v3736_v36, %v3694_v44 }
 0x524   : > { %v3705_v39 = vpop.f32.mrf.mxu2  ;;  %v3767_v2 = vmax.f32 %v3737_v54, 0.0 }
 0x525   : > { %v3943_v61 = vpop.f32.mrf.mxu0 }
 0x526   : > { %v3944_v53 = vadd.f32 %v5760_v5, %v3943_v61 }
 0x529   : > { %v3738_v22 = vpop.f32.mrf.mxu3 }
 0x52a   : > { %v3739_v13 = vadd.f32 %v3738_v22, %v3696_v19 }
 0x52c   : > { %v3769_v8 = vmax.f32 %v3739_v13, 0.0 }
 0x52d   : > { %v3946_v43 = vpop.f32.mrf.mxu0 }
 0x52e   : > { %v3785_v50 = vpack.c.bf16 %v3769_v8, %v3767_v2  ;;  %v3947_v36 = vadd.f32 %v5760_v5, %v3946_v43 }
 0x530   : > { %3993 = vmatmul.bf16.gmra.mxu1 %v3785_v50 }
 0x531   : > { %v3741_v11 = vpop.f32.mrf.mxu3 }
 0x532   : > { %v3742_v20 = vadd.f32 %v3741_v11, %v3699_v57 }
 0x534   : > { %v3771_v41 = vmax.f32 %v3742_v20, 0.0 }
 0x535   : > { %v3948_v1 = vpop.f32.mrf.mxu0 }
 0x536   : > { %v3949_v39 = vadd.f32 %v5760_v5, %v3948_v1 }
 0x539   : > { %v3743_v4 = vpop.f32.mrf.mxu3 }
 0x53a   : > { %v3744_v17 = vadd.f32 %v3743_v4, %v3701_v35 }
 0x53c   : > { %v3773_v21 = vmax.f32 %v3744_v17, 0.0 }
 0x53d   : > { %v3951_v3 = vpop.f32.mrf.mxu0 }
 0x53e   : > { %v3787_v25 = vpack.c.bf16 %v3773_v21, %v3771_v41  ;;  %v3952_v61 = vadd.f32 %v5760_v5, %v3951_v3 }
 0x540   : > { %3998 = vmatmul.bf16.gmra.mxu1 %v3787_v25 }
 0x541   : > { %v3746_v60 = vpop.f32.mrf.mxu3 }
 0x542   : > { %v3747_v24 = vadd.f32 %v3746_v60, %v3704_v45 }
 0x544   : > { %v3775_v58 = vmax.f32 %v3747_v24, 0.0 }
 0x545   : > { %v3953_v52 = vpop.f32.mrf.mxu0 }
 0x546   : > { %v3789_v0 = vpack.c.bf16 %v3775_v58, %v3775_v58  ;;  %v3954_v8 = vadd.f32 %v5760_v5, %v3953_v52 }
 0x549   : > { %v3748_v12 = vpop.f32.mrf.mxu3 }
 0x54d   : > { %v3956_v49 = vpop.f32.mrf.mxu0 }
 0x54e   : > { %v3957_v1 = vadd.f32 %v5760_v5, %v3956_v49 }
 0x550   : > { %4003 = vmatmul.bf16.gmra.mxu1 %v3789_v0 }
 0x555   : > { %v3958_v62 = vpop.f32.mrf.mxu0 }
 0x556   : > { %v3959_v17 = vadd.f32 %v5760_v5, %v3958_v62 }
 0x55d   : > { %v7209_v46 = vpop.f32.mrf.mxu0 }
 0x55e   : > { %v3962_v52 = vadd.f32 %v5760_v5, %v7209_v46 }
 0x565   : > { %v3963_v16 = vpop.f32.mrf.mxu0 }
 0x56d   : > { %v3974_v7 = vpop.f32.mrf.mxu1 }
 0x56e   : > { %v3975_v37 = vadd.f32 %v3974_v7, %v3932_v18 }
 0x570   : > { %v4008_v63 = vmax.f32 %v3975_v37, 0.0 }
 0x575   : > { %v3976_v40 = vpop.f32.mrf.mxu1 }
 0x576   : > { %v3977_v29 = vadd.f32 %v3976_v40, %v3934_v42 }
 0x578   : > { %v4009_v38 = vmax.f32 %v3977_v29, 0.0 }
 0x57a   : > { %v5617_v23 = vpack.c.bf16 %v4009_v38, %v4008_v63 }
 0x57c   : > { %5618 = vst [vmem:[%s7217_s19] sm:$0xff] %v5617_v23  }
 0x57d   : > { %v3979_v51 = vpop.f32.mrf.mxu1 }
 0x57e   : > { %v3980_v56 = vadd.f32 %v3979_v51, %v3937_v47 }
 0x580   : > { %v4010_v48 = vmax.f32 %v3980_v56, 0.0 }
 0x585   : > { %v3981_v33 = vpop.f32.mrf.mxu1 }
 0x586   : > { %v3982_v26 = vadd.f32 %v3981_v33, %v3939_v28 }
 0x588   : > { %v4011_v31 = vmax.f32 %v3982_v26, 0.0 }
 0x58a   : > { %v5622_v34 = vpack.c.bf16 %v4011_v31, %v4010_v48 }
 0x58c   : > { %5644 = vst [vmem:[%s7217_s19 + $0x8] sm:$0xff] %v5622_v34  }
 0x58d   : > { %v3984_v59 = vpop.f32.mrf.mxu1 }
 0x58e   : > { %v3985_v30 = vadd.f32 %v3984_v59, %v3942_v32 }
 0x590   : > { %v4012_v55 = vmax.f32 %v3985_v30, 0.0 }
 0x595   : > { %v3986_v15 = vpop.f32.mrf.mxu1 }
 0x596   : > { %v3987_v27 = vadd.f32 %v3986_v15, %v3944_v53 }
 0x598   : > { %v4013_v14 = vmax.f32 %v3987_v27, 0.0 }
 0x59a   : > { %v5627_v9 = vpack.c.bf16 %v4013_v14, %v4012_v55 }
 0x59c   : > { %5645 = vst [vmem:[%s7217_s19 + $0x10] sm:$0xff] %v5627_v9  }
 0x59d   : > { %v3989_v6 = vpop.f32.mrf.mxu1 }
 0x59e   : > { %v3990_v44 = vadd.f32 %v3989_v6, %v3947_v36 }
 0x5a0   : > { %v4014_v22 = vmax.f32 %v3990_v44, 0.0 }
 0x5a5   : > { %v3991_v19 = vpop.f32.mrf.mxu1 }
 0x5a6   : > { %v3992_v54 = vadd.f32 %v3991_v19, %v3949_v39 }
 0x5a8   : > { %v4015_v13 = vmax.f32 %v3992_v54, 0.0 }
 0x5aa   : > { %v5632_v2 = vpack.c.bf16 %v4015_v13, %v4014_v22 }
 0x5ac   : > { %5646 = vst [vmem:[%s7217_s19 + $0x18] sm:$0xff] %v5632_v2  }
 0x5ad   : > { %v3994_v10 = vpop.f32.mrf.mxu1 }
 0x5ae   : > { %v3995_v50 = vadd.f32 %v3994_v10, %v3952_v61 }
 0x5b0   : > { %v4016_v35 = vmax.f32 %v3995_v50, 0.0 }
 0x5b5   : > { %v3996_v11 = vpop.f32.mrf.mxu1 }
 0x5b6   : > { %v3997_v57 = vadd.f32 %v3996_v11, %v3954_v8 }
 0x5b8   : > { %v4017_v20 = vmax.f32 %v3997_v57, 0.0 }
 0x5ba   : > { %v5637_v4 = vpack.c.bf16 %v4017_v20, %v4016_v35 }
 0x5bc   : > { %5647 = vst [vmem:[%s7217_s19 + $0x20] sm:$0xff] %v5637_v4  }
 0x5bd   : > { %v3999_v43 = vpop.f32.mrf.mxu1 }
 0x5be   : > { %v4000_v41 = vadd.f32 %v3999_v43, %v3957_v1 }
 0x5c0   : > { %v4018_v60 = vmax.f32 %v4000_v41, 0.0 }
 0x5c5   : > { %v4001_v21 = vpop.f32.mrf.mxu1 }
 0x5c6   : > { %v4002_v25 = vadd.f32 %v4001_v21, %v3959_v17 }
 0x5c8   : > { %v4019_v45 = vmax.f32 %v4002_v25, 0.0 }
 0x5ca   : > { %v5642_v3 = vpack.c.bf16 %v4019_v45, %v4018_v60 }
 0x5cc   : > { %5648 = vst [vmem:[%s7217_s19 + $0x28] sm:$0xff] %v5642_v3  }
 0x5cd   : > { %v4004_v24 = vpop.f32.mrf.mxu1 }
 0x5ce   : > { %v4005_v12 = vadd.f32 %v4004_v24, %v3962_v52 }
 0x5d0   : > { %v4020_v58 = vmax.f32 %v4005_v12, 0.0 }
 0x5d1   : > { %4054 = sbr.rel (!%p6116_p11) target bundleno = 1525 (0x5f5), region = 72 }
 0x5d2   : > { %v4033_v0 = vpack.c.bf16 %v4020_v58, %v4020_v58 }
 0x5d4   : > { %4046 = vst [vmem:[%s7217_s19 + $0x30] sm:$0xf] %v4033_v0 }
 0x5d5   : > { %v4006_v16 = vpop.f32.mrf.mxu1 }
 0x5d6   : > { %s7497_s29 = smov (!%p4057_p6, %s4056_s29), 13 }
 0x5d7   : > { %s5330_s21 = sshll.u32 %s7497_s29, 2 }
 0x5d8   : > { %s4060_s9 = ssub.s32 52, %s5330_s21 }
 0x5d9   : > { %s4061_s16 = sshll.u32 %s4060_s9, 4 }
 0x5da   : > { %4062 = vsyncadd %s4048_s20, %s4061_s16  ;;  %p7239_p7 = scmp.ne.s32.totalorder %s5330_s21, 0  ;;  %s5613_s22 = smul.u32 52, %s6085_s28 }
 0x5db   : > { %s4067_s23 = sshll.u32 %s7217_s19, 4  ;;  %s5334_s18 = sshll.u32 %s7497_s29, 6  ;;  %s7249_s23 = int_to_ptr.vmem [resolvable:$true] %s4067_s23 }
 0x5dc   : > { %s7481_s24 = sld [smem:[#allocation52_spill]]  ;;  %s5921_s15 = sshra.s32 %s7249_s23, 4  ;;  %s5922_s15 = int_to_ptr.vmem [resolvable:$true] %s5921_s15 }
 0x5dd   : > { %s5923_s7 = sshrl.u32 %s5334_s18, 4  ;;  %s6021_s28 = smov [#allocation11]  }
 0x5de   : > { %s5928_s11 = scalar_lea.vmem %s5922_s15, %s5923_s7  ;;  %s5932_s17 = scalar_lea.vmem %s6021_s28, 104 }
 0x5df   : > { %p5929_p11 = scmp.ne.s32.totalorder %s5922_s15, %s5928_s11  ;;  %p5934_p0 = scmp.lt.s32.totalorder %s5932_s17, %s5928_s11 }
 0x5e1   : > { %p5930_p10 = pnand %p5929_p11, %p7239_p7 }
 0x5e2   : > { %s7482_s30 = smov %s7481_s24  ;;  %s4065_s10 = scalar_lea.hbm %s7481_s24, %s5613_s22 }
 0x5e3   : > { %s4069_s12 = sshll.u32 %s4065_s10, 4  ;;  %p5931_p1 = pneg %p5930_p10  ;;  %s7251_s12 = int_to_ptr.hbm [resolvable:$true] %s4069_s12 }
 0x5e5   : > { %p5936_p3 = pnand %p5934_p0, %p5931_p1 }
 0x5e7   : > { %5939 = shalt.err (!%p5936_p3)
}
 0x5e8   : > { %s5940_s19 = sshra.s32 %s7251_s12, 4  ;;  %s5951_s16 = scalar_lea.hbm %s7482_s30, 100  ;;  %s5941_s19 = int_to_ptr.hbm [resolvable:$true] %s5940_s19 }
 0x5e9   : > { %s5947_s14 = scalar_lea.hbm %s5941_s19, %s5923_s7  ;;  %p5952_p4 = scmp.lt.s32.totalorder %s5941_s19, %s7482_s30 }
 0x5ea   : > { %p5948_p5 = scmp.ne.s32.totalorder %s5941_s19, %s5947_s14  ;;  %p5953_p12 = scmp.lt.s32.totalorder %s5951_s16, %s5947_s14 }
 0x5ec   : > { %p5949_p8 = pnand %p5948_p5, %p7239_p7  ;;  %p5954_p13 = por %p5953_p12, %p5952_p4 }
 0x5ee   : > { %p5950_p9 = pneg %p5949_p8 }
 0x5f0   : > { %p5955_p2 = pnand %p5954_p13, %p5950_p9 }
 0x5f2   : > { %5958 = shalt.err (!%p5955_p2)
}
 0x5f3   : > { %s6022_s8 = smov 64   ;;  %s6023_s24 = smov 4  }
 0x5f4   : > { %4075 = dma.vmem_to_hbm [thread:$0]  (%p7239_p7), %s7249_s23, %s5334_s18, %s7251_s12, %s4048_s20, %s6022_s8, %s6022_s8, %s6023_s24  }
 0x5f5 PF: > { %s7483_s10 = sld [smem:[#allocation16_spill]]  ;;  %p7486_p11 = scmp.ge.s32.totalorder %s6006_s27, 2 }
 0x5f6   : > { %s7484_s15 = sld [smem:[#allocation19_spill]] }
 0x5fb   : > { %s4084_s7 = sand.u32 1, %s7483_s10  }
 0x5fc   : > { %p7485_p6 = scmp.ne.s32.totalorder %s7484_s15, 0  ;;  %s4085_s11 = scalar_lea.sflag [#allocation4], %s4084_s7 }
 0x5fe   : > { %p5701_p10 = pnand %p7486_p11, %p7485_p6 }
 0x600   : > { %p5702_p1 = pneg %p5701_p10 }
 0x602   : > { %5989 = dma.done.wait (%p5702_p1), %s4085_s11, 832  }
 0x603   : > { %5991 = vsyncadd (%p5702_p1), %s4085_s11, 4294966464  ;;  %s7487_s27 = sld [smem:[#allocation17_spill]]  ;;  %s7489_s24 = smov %s5998_s25 }
 0x604   : > { %s7488_s13 = sld [smem:[#allocation18_spill]]  ;;  %s7490_s25 = smov %s6002_s26 }
 0x609   : > { %p22_p0 = scmp.ge.s32.totalorder %s7487_s27, 4  }
 0x60a   : > { %s7491_s26 = smov %s7488_s13 }
 0x60b   :  { %24 = sbr.rel (!%p22_p0) target bundleno = 11 (0xb), region = 109 }
 0x610   :  { %4091 = vsyncpa [#allocation3], 1 }
 0x611   :  { %4093 = vsyncpa [#allocation3 + $0x1], 1 }
 0x612   :  { %4094 = vsyncpa [#allocation6], 1 }
 0x613   :  { %4095 = vsyncpa [#allocation9], 1 }
 0x614   :  { %4096 = vsyncpa [#allocation4], 1 }
 0x615   :  { %4098 = vsyncpa [#allocation4 + $0x1], 1 }

</bundles_post_ra>
